<compile_context>
chip_gen: v7x
topology: tpu7x:2x2x1
jax: 0.10.0
libtpu: 0.0.40
codegen_flags: <defaults>
</compile_context>

<pallas_src>
import jax
import jax.numpy as jnp
import numpy as np
from jax.experimental import pallas as pl
from jax.experimental.pallas import tpu as pltpu

BN_EPS = 1e-5
LANE = 128


def _round_up(x, m):
    return -(-x // m) * m


def _make_kernel(B, H, W, C, KP, CoutP):
    """Kernel closure over the static shape parameters."""
    N = B * H * W
    inv_n = float(1.0 / N)

    def kernel(cols1_ref, xres_ref, w1_ref, w2_ref,
               g1_ref, b1_ref, g2_ref, b2_ref,
               out_ref, cols2_ref):
        # ---- conv1: ONE MXU matmul. K = 9*C real columns padded once to KP. ----
        a1 = jnp.dot(cols1_ref[...], w1_ref[...],
                     preferred_element_type=jnp.float32)           # (N, KP) f32

        # ---- bn1: single-pass batch stats folded into per-lane scale/shift + relu.
        # (padded lanes have gamma=beta=0 -> output exactly 0 there)
        s1 = jnp.sum(a1, axis=0, keepdims=True) * inv_n
        q1 = jnp.sum(a1 * a1, axis=0, keepdims=True) * inv_n
        var1 = q1 - s1 * s1
        scale1 = g1_ref[...] * jax.lax.rsqrt(var1 + BN_EPS)
        shift1 = b1_ref[...] - s1 * scale1
        h1 = jnp.maximum(a1 * scale1 + shift1, 0.0)                # (N, KP) f32

        # ---- conv2 im2col, built directly (no midpad scratch).
        # conv1's output lanes are tap-replicated (lane t*C+c == channel c), so
        # tap t only needs a *spatial* shift written into its own lane block —
        # no cross-lane movement.  Zero the buffer once (halo + padded lanes),
        # then 9 small masked stores.
        cdt = cols2_ref.dtype
        cols2_ref[...] = jnp.zeros_like(cols2_ref)
        h1b = h1.reshape(B, H, W, KP)
        for t in range(9):
            oy, ox = t // 3 - 1, t % 3 - 1
            dh0, dh1 = max(0, -oy), H - max(0, oy)     # destination rows
            dw0, dw1 = max(0, -ox), W - max(0, ox)
            sh0, sh1 = max(0, oy), H - max(0, -oy)     # source rows (dst + offset)
            sw0, sw1 = max(0, ox), W - max(0, -ox)
            cols2_ref[:, dh0:dh1, dw0:dw1, t * C:(t + 1) * C] = (
                h1b[:, sh0:sh1, sw0:sw1, t * C:(t + 1) * C].astype(cdt))

        # ---- conv2: ONE MXU matmul on a contiguous full-buffer view (no hidden
        # slice/reshape copies). ----
        a2 = jnp.dot(cols2_ref[...].reshape(N, KP), w2_ref[...],
                     preferred_element_type=jnp.float32)           # (N, CoutP) f32

        # ---- bn2 (fused scale/shift) + identity residual (f32, unrounded) + relu.
        s2 = jnp.sum(a2, axis=0, keepdims=True) * inv_n
        q2 = jnp.sum(a2 * a2, axis=0, keepdims=True) * inv_n
        var2 = q2 - s2 * s2
        scale2 = g2_ref[...] * jax.lax.rsqrt(var2 + BN_EPS)
        shift2 = b2_ref[...] - s2 * scale2
        h2 = a2 * scale2 + shift2 + xres_ref[...].reshape(N, CoutP)
        out_ref[...] = jnp.maximum(h2, 0.0).reshape(B, H, W, CoutP).astype(out_ref.dtype)

    return kernel


def basic_block(x_nchw, w1_oihw, w2_oihw, gamma1, beta1, gamma2, beta2,
                *, matmul_dtype=jnp.bfloat16):
    """x_nchw: (B, C, H, W) float32; conv weights in PyTorch OIHW layout.

    matmul_dtype=jnp.bfloat16 is the performance mode (f32 accumulation);
    matmul_dtype=jnp.float32 is validation-only (bit-faithful-ish to PyTorch).
    """
    B, C, H, W = x_nchw.shape
    assert w1_oihw.shape[0] == C and w2_oihw.shape[0] == C, \
        "identity residual requires inplanes == planes (stride=1, downsample=None)"

    K_real = 9 * C                                   # real contraction width
    KP = max(LANE, _round_up(K_real, LANE))          # padded ONCE to a lane block
    CoutP = max(LANE, _round_up(C, LANE))            # lane-dense output channels
    N = B * H * W
    itemsize = jnp.dtype(matmul_dtype).itemsize

    x_nhwc = jnp.transpose(x_nchw, (0, 2, 3, 1)).astype(jnp.float32)

    # Packed im2col for conv1 at the REAL channel count (wrapper-side layout
    # plumbing on a static input; the kernel then sees a lane-dense (N, KP) slab).
    xp = jnp.pad(x_nhwc, ((0, 0), (1, 1), (1, 1), (0, 0)))
    taps = [xp[:, dy:dy + H, dx:dx + W, :] for dy in range(3) for dx in range(3)]
    cols1 = jnp.concatenate(taps, axis=-1).reshape(N, K_real)
    cols1 = jnp.pad(cols1, ((0, 0), (0, KP - K_real))).astype(matmul_dtype)

    # Identity residual: f32, channel-padded to a full lane block.
    xres = jnp.pad(x_nhwc, ((0, 0), (0, 0), (0, 0), (0, CoutP - C)))

    def pack_w(w):                                   # OIHW -> ((ky*3+kx)*Cin + i, o)
        return jnp.transpose(w, (2, 3, 1, 0)).reshape(K_real, w.shape[0])

    # conv1 weight: replicate the C output columns once per tap so the bn1+relu
    # result's lane layout already matches conv2's im2col lane layout.
    w1m = jnp.tile(pack_w(w1_oihw), (1, 9))                              # (9C, 9C)
    w1k = jnp.pad(w1m, ((0, KP - K_real), (0, KP - 9 * C))).astype(matmul_dtype)
    w2k = jnp.pad(pack_w(w2_oihw),
                  ((0, KP - K_real), (0, CoutP - C))).astype(matmul_dtype)

    # NOTE: padded lanes of gamma/beta MUST stay zero-padded (not ones) so the
    # padded channels of each BN output are exactly zero.
    g1 = jnp.pad(jnp.tile(gamma1.astype(jnp.float32), 9), (0, KP - 9 * C)).reshape(1, KP)
    b1 = jnp.pad(jnp.tile(beta1.astype(jnp.float32), 9), (0, KP - 9 * C)).reshape(1, KP)
    g2 = jnp.pad(gamma2.astype(jnp.float32), (0, CoutP - C)).reshape(1, CoutP)
    b2 = jnp.pad(beta2.astype(jnp.float32), (0, CoutP - C)).reshape(1, CoutP)

    # Explicit VMEM budget (inputs + output + scratch + f32 value temps for
    # a1/h1/a2), kept comfortably inside v7x's 64 MiB physical VMEM.
    footprint = (N * KP * itemsize                     # cols1
                 + N * CoutP * 4                       # residual (f32)
                 + KP * KP * itemsize                  # w1
                 + KP * CoutP * itemsize               # w2
                 + (2 * KP + 2 * CoutP) * 4            # bn scale/shift vectors
                 + N * CoutP * 4                       # output (f32)
                 + N * KP * itemsize                   # cols2 scratch
                 + 3 * N * max(KP, CoutP) * 4)         # a1/h1/a2 value temps
    vmem_limit = int(min(48 * 2 ** 20, max(16 * 2 ** 20, 2 * footprint)))

    hbm_bytes = (N * KP * itemsize + N * CoutP * 4
                 + KP * KP * itemsize + KP * CoutP * itemsize
                 + (2 * KP + 2 * CoutP) * 4 + N * CoutP * 4)
    cost = pl.CostEstimate(flops=int(2 * N * KP * (KP + CoutP)),
                           transcendentals=int(2 * (KP + CoutP)),
                           bytes_accessed=int(hbm_bytes))

    vmem = pl.BlockSpec(memory_space=pltpu.MemorySpace.VMEM)
    out_nhwc = pl.pallas_call(
        _make_kernel(B, H, W, C, KP, CoutP),
        out_shape=jax.ShapeDtypeStruct((B, H, W, CoutP), jnp.float32),
        in_specs=[vmem] * 8,
        out_specs=vmem,
        scratch_shapes=[pltpu.VMEM((B, H, W, KP), matmul_dtype)],  # conv2 im2col
        compiler_params=pltpu.CompilerParams(vmem_limit_bytes=vmem_limit),
        cost_estimate=cost,
    )(cols1, xres, w1k, w2k, g1, b1, g2, b2)

    return jnp.transpose(out_nhwc[..., :C], (0, 3, 1, 2))              # back to NCHW


# ---- pure-JAX reference (NCHW, matches PyTorch forward in training mode). ----
# conv_dtype lets us build a reference whose conv inputs are rounded to bf16
# exactly like the perf-mode kernel (accumulation stays f32 in both).
def basic_block_ref(x, w1, w2, g1, b1, g2, b2, eps=BN_EPS, conv_dtype=jnp.float32):
    def conv(h, w):
        return jax.lax.conv_general_dilated(
            h.astype(conv_dtype), w.astype(conv_dtype),
            window_strides=(1, 1), padding=((1, 1), (1, 1)),
            dimension_numbers=("NCHW", "OIHW", "NCHW"),
            preferred_element_type=jnp.float32)

    def bn(h, g, b):
        mean = jnp.mean(h, axis=(0, 2, 3), keepdims=True)
        var = jnp.mean((h - mean) ** 2, axis=(0, 2, 3), keepdims=True)
        return (h - mean) * jax.lax.rsqrt(var + eps) * g.reshape(1, -1, 1, 1) \
            + b.reshape(1, -1, 1, 1)

    out = jax.nn.relu(bn(conv(x, w1), g1, b1))
    out = bn(conv(out, w2), g2, b2)
    return jax.nn.relu(out + x)


if __name__ == "__main__":
    B, C, H, W = 2, 4, 16, 16
    planes = C  # inplanes == planes, stride=1, downsample=None

    key = jax.random.PRNGKey(0)
    kx, kw1, kw2, kg1, kb1, kg2, kb2 = jax.random.split(key, 7)

    x = jax.random.normal(kx, (B, C, H, W), jnp.float32)
    w1 = jax.random.normal(kw1, (planes, C, 3, 3), jnp.float32) * 0.1
    w2 = jax.random.normal(kw2, (planes, planes, 3, 3), jnp.float32) * 0.1
    gamma1 = 1.0 + 0.1 * jax.random.normal(kg1, (planes,), jnp.float32)
    beta1 = 0.1 * jax.random.normal(kb1, (planes,), jnp.float32)
    gamma2 = 1.0 + 0.1 * jax.random.normal(kg2, (planes,), jnp.float32)
    beta2 = 0.1 * jax.random.normal(kb2, (planes,), jnp.float32)

    ref_f32 = jax.block_until_ready(
        basic_block_ref(x, w1, w2, gamma1, beta1, gamma2, beta2))

    # Perf mode: bf16 MXU inputs, f32 accumulation (the mode to ship on v5e/v6e/v7x).
    out_bf16 = jax.block_until_ready(
        basic_block(x, w1, w2, gamma1, beta1, gamma2, beta2,
                    matmul_dtype=jnp.bfloat16))
    ref_bf16 = jax.block_until_ready(
        basic_block_ref(x, w1, w2, gamma1, beta1, gamma2, beta2,
                        conv_dtype=jnp.bfloat16))
    # Tight check against a reference with identical conv-input rounding...
    np.testing.assert_allclose(np.asarray(out_bf16), np.asarray(ref_bf16),
                               rtol=5e-3, atol=5e-3)
    # ...and a looser check against exact f32 module semantics (bf16 input rounding).
    np.testing.assert_allclose(np.asarray(out_bf16), np.asarray(ref_f32),
                               rtol=1e-1, atol=1e-1)

    # Strict mode (validation-only): f32 matmul inputs match PyTorch numerics tightly.
    out_f32 = jax.block_until_ready(
        basic_block(x, w1, w2, gamma1, beta1, gamma2, beta2,
                    matmul_dtype=jnp.float32))
    np.testing.assert_allclose(np.asarray(out_f32), np.asarray(ref_f32),
                               rtol=1e-3, atol=5e-4)

    print("KERNEL_OK")
</pallas_src>

<mosaic_0001>
module attributes {stable_mosaic.version = 11 : i64} {
  func.func @kernel(%arg0: memref<512x128xbf16, #tpu.memory_space<vmem>>, %arg1: memref<2x16x16x128xf32, #tpu.memory_space<vmem>>, %arg2: memref<128x128xbf16, #tpu.memory_space<vmem>>, %arg3: memref<128x128xbf16, #tpu.memory_space<vmem>>, %arg4: memref<1x128xf32, #tpu.memory_space<vmem>>, %arg5: memref<1x128xf32, #tpu.memory_space<vmem>>, %arg6: memref<1x128xf32, #tpu.memory_space<vmem>>, %arg7: memref<1x128xf32, #tpu.memory_space<vmem>>, %arg8: memref<2x16x16x128xf32, #tpu.memory_space<vmem>>, %arg9: memref<2x16x16x128xbf16, #tpu.memory_space<vmem>>) attributes {dimension_semantics = [], scalar_prefetch = 0 : i64, scratch_operands = 1 : i64, tpu.core_type = #tpu.core_type<tc>} {
    %c0 = arith.constant 0 : index
    %c0_0 = arith.constant 0 : index
    %0 = vector.load %arg0[%c0, %c0_0] : memref<512x128xbf16, #tpu.memory_space<vmem>>, vector<512x128xbf16>
    %c0_1 = arith.constant 0 : index
    %c0_2 = arith.constant 0 : index
    %1 = vector.load %arg2[%c0_1, %c0_2] : memref<128x128xbf16, #tpu.memory_space<vmem>>, vector<128x128xbf16>
    %cst = arith.constant dense<0.000000e+00> : vector<512x128xf32>
    %2 = tpu.matmul %0, %1, %cst {dimension_numbers = #tpu.dot_dimension_numbers<[1], [0], [0], [1], [0, 0, 1, 1], [], []>} : vector<512x128xbf16>, vector<128x128xbf16>, vector<512x128xf32> -> vector<512x128xf32>
    %cst_3 = arith.constant dense<0.000000e+00> : vector<128xf32>
    %3 = vector.multi_reduction <add>, %2, %cst_3 [0] : vector<512x128xf32> to vector<128xf32>
    %4 = vector.shape_cast %3 : vector<128xf32> to vector<1x128xf32>
    %cst_4 = arith.constant 0.001953125 : f32
    %5 = vector.broadcast %cst_4 : f32 to vector<1x128xf32>
    %6 = arith.mulf %4, %5 : vector<1x128xf32>
    %7 = arith.mulf %2, %2 : vector<512x128xf32>
    %cst_5 = arith.constant dense<0.000000e+00> : vector<128xf32>
    %8 = vector.multi_reduction <add>, %7, %cst_5 [0] : vector<512x128xf32> to vector<128xf32>
    %9 = vector.shape_cast %8 : vector<128xf32> to vector<1x128xf32>
    %cst_6 = arith.constant 0.001953125 : f32
    %10 = vector.broadcast %cst_6 : f32 to vector<1x128xf32>
    %11 = arith.mulf %9, %10 : vector<1x128xf32>
    %12 = arith.mulf %6, %6 : vector<1x128xf32>
    %13 = arith.subf %11, %12 : vector<1x128xf32>
    %c0_7 = arith.constant 0 : index
    %c0_8 = arith.constant 0 : index
    %14 = vector.load %arg4[%c0_7, %c0_8] : memref<1x128xf32, #tpu.memory_space<vmem>>, vector<1x128xf32>
    %cst_9 = arith.constant 9.99999974E-6 : f32
    %15 = vector.broadcast %cst_9 : f32 to vector<1x128xf32>
    %16 = arith.addf %13, %15 : vector<1x128xf32>
    %17 = math.rsqrt %16 : vector<1x128xf32>
    %18 = arith.mulf %14, %17 : vector<1x128xf32>
    %c0_10 = arith.constant 0 : index
    %c0_11 = arith.constant 0 : index
    %19 = vector.load %arg5[%c0_10, %c0_11] : memref<1x128xf32, #tpu.memory_space<vmem>>, vector<1x128xf32>
    %20 = arith.mulf %6, %18 : vector<1x128xf32>
    %21 = arith.subf %19, %20 : vector<1x128xf32>
    %22 = vector.broadcast %18 : vector<1x128xf32> to vector<512x128xf32>
    %23 = arith.mulf %2, %22 : vector<512x128xf32>
    %24 = vector.broadcast %21 : vector<1x128xf32> to vector<512x128xf32>
    %25 = arith.addf %23, %24 : vector<512x128xf32>
    %cst_12 = arith.constant 0.000000e+00 : f32
    %26 = vector.broadcast %cst_12 : f32 to vector<512x128xf32>
    %27 = arith.maximumf %25, %26 : vector<512x128xf32>
    %cst_13 = arith.constant 0.000000e+00 : bf16
    %28 = vector.broadcast %cst_13 : bf16 to vector<2x16x16x128xbf16>
    %c0_14 = arith.constant 0 : index
    %c0_15 = arith.constant 0 : index
    %c0_16 = arith.constant 0 : index
    %c0_17 = arith.constant 0 : index
    %29 = vector.load %arg9[%c0_14, %c0_15, %c0_16, %c0_17] : memref<2x16x16x128xbf16, #tpu.memory_space<vmem>>, vector<2x16x16x128xbf16>
    tpu.vector_store %arg9[%c0_14, %c0_15, %c0_16, %c0_17], %28 {strides = array<i32>} : memref<2x16x16x128xbf16, #tpu.memory_space<vmem>>, vector<2x16x16x128xbf16>,
    %30 = vector.shape_cast %27 : vector<512x128xf32> to vector<2x16x16x128xf32>
    %31 = vector.extract_strided_slice %30 {offsets = [0, 0, 0, 0], sizes = [2, 15, 15, 4], strides = [1, 1, 1, 1]} : vector<2x16x16x128xf32> to vector<2x15x15x4xf32>
    %32 = arith.truncf %31 : vector<2x15x15x4xf32> to vector<2x15x15x4xbf16>
    %c0_18 = arith.constant 0 : index
    %c1 = arith.constant 1 : index
    %c1_19 = arith.constant 1 : index
    %c0_20 = arith.constant 0 : index
    %33 = vector.load %arg9[%c0_18, %c1, %c1_19, %c0_20] : memref<2x16x16x128xbf16, #tpu.memory_space<vmem>>, vector<2x15x15x4xbf16>
    tpu.vector_store %arg9[%c0_18, %c1, %c1_19, %c0_20], %32 {strides = array<i32>} : memref<2x16x16x128xbf16, #tpu.memory_space<vmem>>, vector<2x15x15x4xbf16>,
    %34 = vector.extract_strided_slice %30 {offsets = [0, 0, 0, 4], sizes = [2, 15, 16, 4], strides = [1, 1, 1, 1]} : vector<2x16x16x128xf32> to vector<2x15x16x4xf32>
    %35 = arith.truncf %34 : vector<2x15x16x4xf32> to vector<2x15x16x4xbf16>
    %c0_21 = arith.constant 0 : index
    %c1_22 = arith.constant 1 : index
    %c0_23 = arith.constant 0 : index
    %c4 = arith.constant 4 : index
    %36 = vector.load %arg9[%c0_21, %c1_22, %c0_23, %c4] : memref<2x16x16x128xbf16, #tpu.memory_space<vmem>>, vector<2x15x16x4xbf16>
    tpu.vector_store %arg9[%c0_21, %c1_22, %c0_23, %c4], %35 {strides = array<i32>} : memref<2x16x16x128xbf16, #tpu.memory_space<vmem>>, vector<2x15x16x4xbf16>,
    %37 = vector.extract_strided_slice %30 {offsets = [0, 0, 1, 8], sizes = [2, 15, 15, 4], strides = [1, 1, 1, 1]} : vector<2x16x16x128xf32> to vector<2x15x15x4xf32>
    %38 = arith.truncf %37 : vector<2x15x15x4xf32> to vector<2x15x15x4xbf16>
    %c0_24 = arith.constant 0 : index
    %c1_25 = arith.constant 1 : index
    %c0_26 = arith.constant 0 : index
    %c8 = arith.constant 8 : index
    %39 = vector.load %arg9[%c0_24, %c1_25, %c0_26, %c8] : memref<2x16x16x128xbf16, #tpu.memory_space<vmem>>, vector<2x15x15x4xbf16>
    tpu.vector_store %arg9[%c0_24, %c1_25, %c0_26, %c8], %38 {strides = array<i32>} : memref<2x16x16x128xbf16, #tpu.memory_space<vmem>>, vector<2x15x15x4xbf16>,
    %40 = vector.extract_strided_slice %30 {offsets = [0, 0, 0, 12], sizes = [2, 16, 15, 4], strides = [1, 1, 1, 1]} : vector<2x16x16x128xf32> to vector<2x16x15x4xf32>
    %41 = arith.truncf %40 : vector<2x16x15x4xf32> to vector<2x16x15x4xbf16>
    %c0_27 = arith.constant 0 : index
    %c0_28 = arith.constant 0 : index
    %c1_29 = arith.constant 1 : index
    %c12 = arith.constant 12 : index
    %42 = vector.load %arg9[%c0_27, %c0_28, %c1_29, %c12] : memref<2x16x16x128xbf16, #tpu.memory_space<vmem>>, vector<2x16x15x4xbf16>
    tpu.vector_store %arg9[%c0_27, %c0_28, %c1_29, %c12], %41 {strides = array<i32>} : memref<2x16x16x128xbf16, #tpu.memory_space<vmem>>, vector<2x16x15x4xbf16>,
    %43 = vector.extract_strided_slice %30 {offsets = [0, 0, 0, 16], sizes = [2, 16, 16, 4], strides = [1, 1, 1, 1]} : vector<2x16x16x128xf32> to vector<2x16x16x4xf32>
    %44 = arith.truncf %43 : vector<2x16x16x4xf32> to vector<2x16x16x4xbf16>
    %c0_30 = arith.constant 0 : index
    %c0_31 = arith.constant 0 : index
    %c0_32 = arith.constant 0 : index
    %c16 = arith.constant 16 : index
    %45 = vector.load %arg9[%c0_30, %c0_31, %c0_32, %c16] : memref<2x16x16x128xbf16, #tpu.memory_space<vmem>>, vector<2x16x16x4xbf16>
    tpu.vector_store %arg9[%c0_30, %c0_31, %c0_32, %c16], %44 {strides = array<i32>} : memref<2x16x16x128xbf16, #tpu.memory_space<vmem>>, vector<2x16x16x4xbf16>,
    %46 = vector.extract_strided_slice %30 {offsets = [0, 0, 1, 20], sizes = [2, 16, 15, 4], strides = [1, 1, 1, 1]} : vector<2x16x16x128xf32> to vector<2x16x15x4xf32>
    %47 = arith.truncf %46 : vector<2x16x15x4xf32> to vector<2x16x15x4xbf16>
    %c0_33 = arith.constant 0 : index
    %c0_34 = arith.constant 0 : index
    %c0_35 = arith.constant 0 : index
    %c20 = arith.constant 20 : index
    %48 = vector.load %arg9[%c0_33, %c0_34, %c0_35, %c20] : memref<2x16x16x128xbf16, #tpu.memory_space<vmem>>, vector<2x16x15x4xbf16>
    tpu.vector_store %arg9[%c0_33, %c0_34, %c0_35, %c20], %47 {strides = array<i32>} : memref<2x16x16x128xbf16, #tpu.memory_space<vmem>>, vector<2x16x15x4xbf16>,
    %49 = vector.extract_strided_slice %30 {offsets = [0, 1, 0, 24], sizes = [2, 15, 15, 4], strides = [1, 1, 1, 1]} : vector<2x16x16x128xf32> to vector<2x15x15x4xf32>
    %50 = arith.truncf %49 : vector<2x15x15x4xf32> to vector<2x15x15x4xbf16>
    %c0_36 = arith.constant 0 : index
    %c0_37 = arith.constant 0 : index
    %c1_38 = arith.constant 1 : index
    %c24 = arith.constant 24 : index
    %51 = vector.load %arg9[%c0_36, %c0_37, %c1_38, %c24] : memref<2x16x16x128xbf16, #tpu.memory_space<vmem>>, vector<2x15x15x4xbf16>
    tpu.vector_store %arg9[%c0_36, %c0_37, %c1_38, %c24], %50 {strides = array<i32>} : memref<2x16x16x128xbf16, #tpu.memory_space<vmem>>, vector<2x15x15x4xbf16>,
    %52 = vector.extract_strided_slice %30 {offsets = [0, 1, 0, 28], sizes = [2, 15, 16, 4], strides = [1, 1, 1, 1]} : vector<2x16x16x128xf32> to vector<2x15x16x4xf32>
    %53 = arith.truncf %52 : vector<2x15x16x4xf32> to vector<2x15x16x4xbf16>
    %c0_39 = arith.constant 0 : index
    %c0_40 = arith.constant 0 : index
    %c0_41 = arith.constant 0 : index
    %c28 = arith.constant 28 : index
    %54 = vector.load %arg9[%c0_39, %c0_40, %c0_41, %c28] : memref<2x16x16x128xbf16, #tpu.memory_space<vmem>>, vector<2x15x16x4xbf16>
    tpu.vector_store %arg9[%c0_39, %c0_40, %c0_41, %c28], %53 {strides = array<i32>} : memref<2x16x16x128xbf16, #tpu.memory_space<vmem>>, vector<2x15x16x4xbf16>,
    %55 = vector.extract_strided_slice %30 {offsets = [0, 1, 1, 32], sizes = [2, 15, 15, 4], strides = [1, 1, 1, 1]} : vector<2x16x16x128xf32> to vector<2x15x15x4xf32>
    %56 = arith.truncf %55 : vector<2x15x15x4xf32> to vector<2x15x15x4xbf16>
    %c0_42 = arith.constant 0 : index
    %c0_43 = arith.constant 0 : index
    %c0_44 = arith.constant 0 : index
    %c32 = arith.constant 32 : index
    %57 = vector.load %arg9[%c0_42, %c0_43, %c0_44, %c32] : memref<2x16x16x128xbf16, #tpu.memory_space<vmem>>, vector<2x15x15x4xbf16>
    tpu.vector_store %arg9[%c0_42, %c0_43, %c0_44, %c32], %56 {strides = array<i32>} : memref<2x16x16x128xbf16, #tpu.memory_space<vmem>>, vector<2x15x15x4xbf16>,
    %c0_45 = arith.constant 0 : index
    %c0_46 = arith.constant 0 : index
    %c0_47 = arith.constant 0 : index
    %c0_48 = arith.constant 0 : index
    %58 = vector.load %arg9[%c0_45, %c0_46, %c0_47, %c0_48] : memref<2x16x16x128xbf16, #tpu.memory_space<vmem>>, vector<2x16x16x128xbf16>
    %59 = vector.shape_cast %58 : vector<2x16x16x128xbf16> to vector<512x128xbf16>
    %c0_49 = arith.constant 0 : index
    %c0_50 = arith.constant 0 : index
    %60 = vector.load %arg3[%c0_49, %c0_50] : memref<128x128xbf16, #tpu.memory_space<vmem>>, vector<128x128xbf16>
    %cst_51 = arith.constant dense<0.000000e+00> : vector<512x128xf32>
    %61 = tpu.matmul %59, %60, %cst_51 {dimension_numbers = #tpu.dot_dimension_numbers<[1], [0], [0], [1], [0, 0, 1, 1], [], []>} : vector<512x128xbf16>, vector<128x128xbf16>, vector<512x128xf32> -> vector<512x128xf32>
    %cst_52 = arith.constant dense<0.000000e+00> : vector<128xf32>
    %62 = vector.multi_reduction <add>, %61, %cst_52 [0] : vector<512x128xf32> to vector<128xf32>
    %63 = vector.shape_cast %62 : vector<128xf32> to vector<1x128xf32>
    %cst_53 = arith.constant 0.001953125 : f32
    %64 = vector.broadcast %cst_53 : f32 to vector<1x128xf32>
    %65 = arith.mulf %63, %64 : vector<1x128xf32>
    %66 = arith.mulf %61, %61 : vector<512x128xf32>
    %cst_54 = arith.constant dense<0.000000e+00> : vector<128xf32>
    %67 = vector.multi_reduction <add>, %66, %cst_54 [0] : vector<512x128xf32> to vector<128xf32>
    %68 = vector.shape_cast %67 : vector<128xf32> to vector<1x128xf32>
    %cst_55 = arith.constant 0.001953125 : f32
    %69 = vector.broadcast %cst_55 : f32 to vector<1x128xf32>
    %70 = arith.mulf %68, %69 : vector<1x128xf32>
    %71 = arith.mulf %65, %65 : vector<1x128xf32>
    %72 = arith.subf %70, %71 : vector<1x128xf32>
    %c0_56 = arith.constant 0 : index
    %c0_57 = arith.constant 0 : index
    %73 = vector.load %arg6[%c0_56, %c0_57] : memref<1x128xf32, #tpu.memory_space<vmem>>, vector<1x128xf32>
    %cst_58 = arith.constant 9.99999974E-6 : f32
    %74 = vector.broadcast %cst_58 : f32 to vector<1x128xf32>
    %75 = arith.addf %72, %74 : vector<1x128xf32>
    %76 = math.rsqrt %75 : vector<1x128xf32>
    %77 = arith.mulf %73, %76 : vector<1x128xf32>
    %c0_59 = arith.constant 0 : index
    %c0_60 = arith.constant 0 : index
    %78 = vector.load %arg7[%c0_59, %c0_60] : memref<1x128xf32, #tpu.memory_space<vmem>>, vector<1x128xf32>
    %79 = arith.mulf %65, %77 : vector<1x128xf32>
    %80 = arith.subf %78, %79 : vector<1x128xf32>
    %81 = vector.broadcast %77 : vector<1x128xf32> to vector<512x128xf32>
    %82 = arith.mulf %61, %81 : vector<512x128xf32>
    %83 = vector.broadcast %80 : vector<1x128xf32> to vector<512x128xf32>
    %84 = arith.addf %82, %83 : vector<512x128xf32>
    %c0_61 = arith.constant 0 : index
    %c0_62 = arith.constant 0 : index
    %c0_63 = arith.constant 0 : index
    %c0_64 = arith.constant 0 : index
    %85 = vector.load %arg1[%c0_61, %c0_62, %c0_63, %c0_64] : memref<2x16x16x128xf32, #tpu.memory_space<vmem>>, vector<2x16x16x128xf32>
    %86 = vector.shape_cast %85 : vector<2x16x16x128xf32> to vector<512x128xf32>
    %87 = arith.addf %84, %86 : vector<512x128xf32>
    %cst_65 = arith.constant 0.000000e+00 : f32
    %88 = vector.broadcast %cst_65 : f32 to vector<512x128xf32>
    %89 = arith.maximumf %87, %88 : vector<512x128xf32>
    %90 = vector.shape_cast %89 : vector<512x128xf32> to vector<2x16x16x128xf32>
    %c0_66 = arith.constant 0 : index
    %c0_67 = arith.constant 0 : index
    %c0_68 = arith.constant 0 : index
    %c0_69 = arith.constant 0 : index
    %91 = vector.load %arg8[%c0_66, %c0_67, %c0_68, %c0_69] : memref<2x16x16x128xf32, #tpu.memory_space<vmem>>, vector<2x16x16x128xf32>
    tpu.vector_store %arg8[%c0_66, %c0_67, %c0_68, %c0_69], %90 {strides = array<i32>} : memref<2x16x16x128xf32, #tpu.memory_space<vmem>>, vector<2x16x16x128xf32>,
    return
  }
}

</mosaic_0001>

<bundles_post_ra>
// kernel: tpu_custom_call.1
= control target key start
LH: loop header
LB: loop body
LE: loop exit
PB: predicated region body
PF: predicated region fallthrough
CT: control target
= control target key end

     0   :  { %13 = vsyncpa [#allocation4], 0  ;;  %s7186_s0 = inlined_call_operand.hbm [shape: bf16[512,128], index: 0, kind: input, shape index: {}]   ;;  %s7187_s1 = inlined_call_operand.hbm [shape: f32[2,16,16,128], index: 1, kind: input, shape index: {}]   ;;  %s7188_s2 = inlined_call_operand.hbm [shape: bf16[128,128], index: 2, kind: input, shape index: {}]   ;;  %s7189_s3 = inlined_call_operand.hbm [shape: bf16[128,128], index: 3, kind: input, shape index: {}]   ;;  %s7190_s4 = inlined_call_operand.vmem [shape: f32[1,128], index: 4, kind: input, shape index: {}]   ;;  %s7191_s5 = inlined_call_operand.vmem [shape: f32[1,128], index: 5, kind: input, shape index: {}]   ;;  %s7192_s6 = inlined_call_operand.vmem [shape: f32[1,128], index: 6, kind: input, shape index: {}]   ;;  %s7193_s7 = inlined_call_operand.vmem [shape: f32[1,128], index: 7, kind: input, shape index: {}]   ;;  %s7194_s8 = inlined_call_operand.hbm [shape: f32[2,16,16,128], index: 8, kind: output, shape index: {}]  }
   0x1   :  { %14 = vsyncpa [#allocation7], 0 }
   0x2   :  { %15 = vsyncpa [#allocation10], 0 }
   0x3   :  { %16 = vsyncpa [#allocation5], 0  ;;  %s3671_s27 = smov [#allocation6]   ;;  %s3553_s9 = scalar_lea.hbm %s7187_s1, 8192 }
   0x4   :  { %s34_s28 = sshll.u32 %s3671_s27, 4  ;;  %p3554_p0 = scmp.ne.s32.totalorder %s7187_s1, %s3553_s9  ;;  %s35_s28 = int_to_ptr.vmem [resolvable:$true] %s34_s28 }
   0x5   :  { %p3557_p1 = scmp.lt.u32.totalorder %s3553_s9, %s7187_s1 }
   0x7   :  { %p3559_p2 = pnand %p3557_p1, %p3554_p0 }
   0x9   :  { %3562 = shalt.err (!%p3559_p2)
}
   0xa   :  { %s3563_s14 = scalar_lea.vmem %s35_s28, 8192  ;;  %p3568_p4 = scmp.lt.s32.totalorder %s35_s28, %s35_s28 }
   0xb   :  { %p3564_p3 = scmp.ne.s32.totalorder %s35_s28, %s3563_s14  ;;  %p3569_p5 = scmp.lt.s32.totalorder %s3563_s14, %s3563_s14 }
   0xd   :  { %p3570_p6 = por %p3569_p5, %p3568_p4 }
   0xf   :  { %p3571_p7 = pnand %p3570_p6, %p3564_p3 }
  0x11   :  { %3574 = shalt.err (!%p3571_p7)
}
  0x12   :  { %s3672_s15 = smov 128   ;;  %s3673_s16 = smov 8  }
  0x13   :  { %40 = dma.hbm_to_vmem [thread:$0]  %s7187_s1, 8192, %s35_s28, [#allocation7], %s3672_s15, %s3672_s15, %s3673_s16  }
  0x14   :  { %s3674_s19 = smov [#allocation3]   ;;  %s3575_s23 = scalar_lea.hbm %s7186_s0, 4096 }
  0x15   :  { %s22_s20 = sshll.u32 %s3674_s19, 4  ;;  %p3576_p8 = scmp.ne.s32.totalorder %s7186_s0, %s3575_s23  ;;  %s23_s20 = int_to_ptr.vmem [resolvable:$true] %s22_s20 }
  0x16   :  { %p3579_p9 = scmp.lt.u32.totalorder %s3575_s23, %s7186_s0 }
  0x18   :  { %p3581_p10 = pnand %p3579_p9, %p3576_p8 }
  0x1a   :  { %3584 = shalt.err (!%p3581_p10)
}
  0x1b   :  { %s3585_s29 = scalar_lea.vmem %s23_s20, 4096  ;;  %p3590_p12 = scmp.lt.s32.totalorder %s23_s20, %s23_s20 }
  0x1c   :  { %p3586_p11 = scmp.ne.s32.totalorder %s23_s20, %s3585_s29  ;;  %p3591_p13 = scmp.lt.s32.totalorder %s3585_s29, %s3585_s29 }
  0x1e   :  { %p3592_p0 = por %p3591_p13, %p3590_p12 }
  0x20   :  { %p3593_p1 = pnand %p3592_p0, %p3586_p11 }
  0x22   :  { %3596 = shalt.err (!%p3593_p1)
}
  0x23   :  { %s3675_s1 = smov 64   ;;  %s3676_s28 = smov 4  }
  0x24   :  { %28 = dma.hbm_to_vmem [thread:$0]  %s7186_s0, 4096, %s23_s20, [#allocation4], %s3675_s1, %s3675_s1, %s3676_s28  }
  0x25   :  { %s3677_s10 = smov [#allocation8]   ;;  %s3678_s12 = smov [#allocation9]  }
  0x26   :  { %s46_s11 = sshll.u32 %s3677_s10, 4  ;;  %s58_s13 = sshll.u32 %s3678_s12, 4  ;;  %s47_s11 = int_to_ptr.vmem [resolvable:$true] %s46_s11  ;;  %s3755_s13 = int_to_ptr.vmem [resolvable:$true] %s58_s13 }
  0x27   :  { %s3597_s18 = scalar_lea.hbm %s7188_s2, 1024 }
  0x28   :  { %p3598_p2 = scmp.ne.s32.totalorder %s7188_s2, %s3597_s18  ;;  %p3601_p3 = scmp.lt.u32.totalorder %s3597_s18, %s7188_s2 }
  0x2a   :  { %p3603_p4 = pnand %p3601_p3, %p3598_p2 }
  0x2c   :  { %3606 = shalt.err (!%p3603_p4)
}
  0x2d   :  { %s3607_s0 = scalar_lea.vmem %s47_s11, 1024  ;;  %p3612_p6 = scmp.lt.s32.totalorder %s47_s11, %s47_s11 }
  0x2e   :  { %p3608_p5 = scmp.ne.s32.totalorder %s47_s11, %s3607_s0  ;;  %p3613_p7 = scmp.lt.s32.totalorder %s3607_s0, %s3607_s0 }
  0x30   :  { %p3614_p8 = por %p3613_p7, %p3612_p6 }
  0x32   :  { %p3615_p9 = pnand %p3614_p8, %p3608_p5 }
  0x34   :  { %3618 = shalt.err (!%p3615_p9)
}
  0x35   :  { %52 = dma.hbm_to_vmem [thread:$0]  %s7188_s2, 1024, %s47_s11, [#allocation7], %s3675_s1, %s3675_s1, %s3676_s28  }
  0x36   :  { %s3619_s27 = scalar_lea.hbm %s7189_s3, 1024 }
  0x37   :  { %p3620_p10 = scmp.ne.s32.totalorder %s7189_s3, %s3619_s27  ;;  %p3623_p11 = scmp.lt.u32.totalorder %s3619_s27, %s7189_s3 }
  0x39   :  { %p3625_p12 = pnand %p3623_p11, %p3620_p10 }
  0x3b   :  { %3628 = shalt.err (!%p3625_p12)
}
  0x3c   :  { %s3629_s12 = scalar_lea.vmem %s3755_s13, 1024  ;;  %p3634_p0 = scmp.lt.s32.totalorder %s3755_s13, %s3755_s13 }
  0x3d   :  { %p3630_p13 = scmp.ne.s32.totalorder %s3755_s13, %s3629_s12  ;;  %p3635_p1 = scmp.lt.s32.totalorder %s3629_s12, %s3629_s12 }
  0x3f   :  { %p3636_p2 = por %p3635_p1, %p3634_p0 }
  0x41   :  { %p3637_p3 = pnand %p3636_p2, %p3630_p13 }
  0x43   :  { %3640 = shalt.err (!%p3637_p3)
}
  0x44   :  { %64 = dma.hbm_to_vmem [thread:$0]  %s7189_s3, 1024, %s3755_s13, [#allocation10], %s3675_s1, %s3675_s1, %s3676_s28  }
  0x45   :  { %3663 = dma.done.wait [#allocation4], 4096  }
  0x46   :  { %3664 = vsyncadd [#allocation4], 4294963200 }
  0x47   :  { %3665 = dma.done.wait [#allocation7], 9216  }
  0x48   :  { %3666 = vsyncadd [#allocation7], 4294958080 }
  0x49   :  { %3667 = dma.done.wait [#allocation10], 1024  }
  0x4a   :  { %3668 = vsyncadd [#allocation10], 4294966272  ;;  %v3501_v0 = vld [vmem:[#allocation8] sm:$0xff]   ;;  %v3502_v1 = vld [vmem:[#allocation8 + $0x8] sm:$0xff]   ;;  %vm1415_vm0 = vcmask 31744   ;;  %vm1508_vm2 = vcmask 64544  }
  0x4b   :  { %3331 = vmatprep.subr.bf16.mxu0 %v3501_v0  ;;  %v3503_v2 = vld [vmem:[#allocation8 + $0x10] sm:$0xff]   ;;  %v3504_v3 = vld [vmem:[#allocation8 + $0x18] sm:$0xff]   ;;  %v3509_v4 = vld [vmem:[#allocation3] sm:$0xff]   ;;  %vm1416_vm1 = vsmask.f32 7938  ;;  %vm1629_vm3 = vcmask 97344  }
  0x4c   :  { %3332 = vmatpush3.bf16.msra.mxu0 %v3501_v0  ;;  %3347 = vmatprep.mubr.bf16.mxu0 %v3509_v4  ;;  %v3505_v5 = vld [vmem:[#allocation8 + $0x20] sm:$0xff]   ;;  %v3506_v6 = vld [vmem:[#allocation8 + $0x28] sm:$0xff]   ;;  %v3507_v7 = vld [vmem:[#allocation8 + $0x30] sm:$0xff]   ;;  %vm1630_vm4 = vsmask.f32 7424  ;;  %vm1740_vm6 = vcmask 130144  }
  0x4d   :  { %3333 = vmatprep.subr.bf16.mxu0 %v3502_v1  ;;  %v3508_v8 = vld [vmem:[#allocation8 + $0x38] sm:$0xff]   ;;  %v3510_v9 = vld [vmem:[#allocation3 + $0x8] sm:$0xff]   ;;  %v3511_v10 = vld [vmem:[#allocation3 + $0x10] sm:$0xff]   ;;  %vm1838_vm7 = vcmask 162944   ;;  %vm1877_vm9 = vcmask 195744   ;;  %vm1975_vm11 = vcmask 228544  }
  0x4e   :  { %v3512_v11 = vld [vmem:[#allocation3 + $0x18] sm:$0xff]   ;;  %v3513_v12 = vld [vmem:[#allocation3 + $0x20] sm:$0xff]   ;;  %v3514_v13 = vld [vmem:[#allocation3 + $0x28] sm:$0xff]   ;;  %vm2067_vm12 = vcmask 261344   ;;  %vm2098_vm13 = vcmask 294144  }
  0x4f   :  { %v3515_v14 = vld [vmem:[#allocation3 + $0x30] sm:$0xff]   ;;  %v3516_v15 = vld [vmem:[#allocation3 + $0x38] sm:$0xff]   ;;  %v3517_v16 = vld [vmem:[#allocation3 + $0x40] sm:$0xff]  }
  0x50   :  { %3334 = vmatpush3.bf16.msra.mxu0 %v3502_v1  ;;  %v3518_v17 = vld [vmem:[#allocation3 + $0x48] sm:$0xff]   ;;  %v3519_v18 = vld [vmem:[#allocation3 + $0x50] sm:$0xff]   ;;  %v3520_v19 = vld [vmem:[#allocation3 + $0x58] sm:$0xff]  }
  0x51   :  { %3335 = vmatprep.subr.bf16.mxu0 %v3503_v2  ;;  %v3521_v20 = vld [vmem:[#allocation3 + $0x60] sm:$0xff]   ;;  %v3522_v21 = vld [vmem:[#allocation3 + $0x68] sm:$0xff]   ;;  %v3523_v22 = vld [vmem:[#allocation3 + $0x70] sm:$0xff]  }
  0x52   :  { %v3524_v23 = vld [vmem:[#allocation3 + $0x78] sm:$0xff]   ;;  %v3525_v24 = vld [vmem:[#allocation3 + $0x80] sm:$0xff]   ;;  %v3526_v25 = vld [vmem:[#allocation3 + $0x88] sm:$0xff]  }
  0x53   :  { %v3527_v26 = vld [vmem:[#allocation3 + $0x90] sm:$0xff]   ;;  %v3528_v27 = vld [vmem:[#allocation3 + $0x98] sm:$0xff]   ;;  %v3529_v28 = vld [vmem:[#allocation3 + $0xa0] sm:$0xff]  }
  0x54   :  { %3336 = vmatpush3.bf16.msra.mxu0 %v3503_v2  ;;  %v3530_v29 = vld [vmem:[#allocation3 + $0xa8] sm:$0xff]   ;;  %v3531_v30 = vld [vmem:[#allocation3 + $0xb0] sm:$0xff]   ;;  %v3532_v31 = vld [vmem:[#allocation3 + $0xb8] sm:$0xff]  }
  0x55   :  { %3337 = vmatprep.subr.bf16.mxu0 %v3504_v3  ;;  %v3533_v32 = vld [vmem:[#allocation3 + $0xc0] sm:$0xff]   ;;  %v3534_v33 = vld [vmem:[#allocation3 + $0xc8] sm:$0xff]   ;;  %v3535_v34 = vld [vmem:[#allocation3 + $0xd0] sm:$0xff]  }
  0x56   :  { %v3536_v35 = vld [vmem:[#allocation3 + $0xd8] sm:$0xff]   ;;  %v3537_v36 = vld [vmem:[#allocation3 + $0xe0] sm:$0xff]   ;;  %v3538_v37 = vld [vmem:[#allocation3 + $0xe8] sm:$0xff]  }
  0x57   :  { %v3539_v38 = vld [vmem:[#allocation3 + $0xf0] sm:$0xff]   ;;  %v3540_v39 = vld [vmem:[#allocation3 + $0xf8] sm:$0xff]   ;;  %vm4166_vm5 = vmand %vm1415_vm0, %vm1416_vm1 }
  0x58   :  { %3338 = vmatpush3.bf16.msra.mxu0 %v3504_v3  ;;  %vm4313_vm8 = vmand %vm1629_vm3, %vm1630_vm4 }
  0x59   :  { %3339 = vmatprep.subr.bf16.mxu0 %v3505_v5  ;;  %vm4367_vm10 = vmand %vm1740_vm6, %vm1416_vm1 }
  0x5a   :  { %vm4533_vm14 = vmand %vm1877_vm9, %vm1630_vm4 }
  0x5b   :  { %vm4555_vm15 = vmand %vm1975_vm11, %vm1416_vm1 }
  0x5c   :  { %3340 = vmatpush3.bf16.msra.mxu0 %v3505_v5  ;;  %vm4691_vm0 = vmand %vm2098_vm13, %vm1630_vm4 }
  0x5d   :  { %3341 = vmatprep.subr.bf16.mxu0 %v3506_v6 }
  0x60   :  { %3342 = vmatpush3.bf16.msra.mxu0 %v3506_v6 }
  0x61   :  { %3343 = vmatprep.subr.bf16.mxu0 %v3507_v7 }
  0x64   :  { %3344 = vmatpush3.bf16.msra.mxu0 %v3507_v7 }
  0x65   :  { %3345 = vmatprep.subr.bf16.mxu0 %v3508_v8 }
  0x68   :  { %3346 = vmatpush3.bf16.msra.mxu0 %v3508_v8 }
  0x6b   :  { %3348 = vmatmul.mubr.bf16.vlgmr.msra.gmra.mrb[0].mxu0 %v3510_v9 }
  0x6c   :  { %3351 = vmatprep.mubr.bf16.mxu0 %v3511_v10 }
  0x73   :  { %3352 = vmatmul.mubr.bf16.gmra.mrb[4].mxu0 %v3512_v11 }
  0x74   :  { %3355 = vmatprep.mubr.bf16.mxu0 %v3513_v12 }
  0x7b   :  { %3356 = vmatmul.mubr.bf16.gmra.mrb[8].mxu0 %v3514_v13 }
  0x7c   :  { %3359 = vmatprep.mubr.bf16.mxu0 %v3515_v14 }
  0x83   :  { %3360 = vmatmul.mubr.bf16.gmra.mrb[12].mxu0 %v3516_v15 }
  0x84   :  { %3363 = vmatprep.mubr.bf16.mxu0 %v3517_v16 }
  0x8b   :  { %3364 = vmatmul.mubr.bf16.gmra.mrb[16].mxu0 %v3518_v17 }
  0x8c   :  { %3367 = vmatprep.mubr.bf16.mxu0 %v3519_v18 }
  0x93   :  { %3368 = vmatmul.mubr.bf16.gmra.mrb[20].mxu0 %v3520_v19 }
  0x94   :  { %3371 = vmatprep.mubr.bf16.mxu0 %v3521_v20 }
  0x9b   :  { %3372 = vmatmul.mubr.bf16.gmra.mrb[24].mxu0 %v3522_v21 }
  0x9c   :  { %3375 = vmatprep.mubr.bf16.mxu0 %v3523_v22 }
  0xa3   :  { %3376 = vmatmul.mubr.bf16.gmra.mrb[28].mxu0 %v3524_v23 }
  0xa4   :  { %3379 = vmatprep.mubr.bf16.mxu0 %v3525_v24 }
  0xab   :  { %3380 = vmatmul.mubr.bf16.gmra.mrb[32].mxu0 %v3526_v25 }
  0xac   :  { %3383 = vmatprep.mubr.bf16.mxu0 %v3527_v26 }
  0xb3   :  { %3384 = vmatmul.mubr.bf16.gmra.mrb[36].mxu0 %v3528_v27 }
  0xb4   :  { %3387 = vmatprep.mubr.bf16.mxu0 %v3529_v28 }
  0xbb   :  { %3388 = vmatmul.mubr.bf16.gmra.mrb[40].mxu0 %v3530_v29 }
  0xbc   :  { %3391 = vmatprep.mubr.bf16.mxu0 %v3531_v30 }
  0xc3   :  { %3392 = vmatmul.mubr.bf16.gmra.mrb[44].mxu0 %v3532_v31 }
  0xc4   :  { %3395 = vmatprep.mubr.bf16.mxu0 %v3533_v32 }
  0xcb   :  { %3396 = vmatmul.mubr.bf16.gmra.mrb[48].mxu0 %v3534_v33 }
  0xcc   :  { %3399 = vmatprep.mubr.bf16.mxu0 %v3535_v34 }
  0xd3   :  { %3400 = vmatmul.mubr.bf16.gmra.mrb[52].mxu0 %v3536_v35 }
  0xd4   :  { %3403 = vmatprep.mubr.bf16.mxu0 %v3537_v36 }
  0xdb   :  { %3404 = vmatmul.mubr.bf16.gmra.mrb[56].mxu0 %v3538_v37 }
  0xdc   :  { %3407 = vmatprep.mubr.bf16.mxu0 %v3539_v38 }
  0xe3   :  { %3408 = vmatmul.mubr.bf16.gmra.mrb[60].mxu0 %v3540_v39 }
 0x13e   :  { %v3792_v40 = vpop.f32.mrb[0].mxu0 }
 0x13f   :  { %v3794_v41 = vpop.f32.mrb[1].mxu0  ;;  %v767_v47 = vmul.f32 %v3792_v40, %v3792_v40 }
 0x140   :  { %v3796_v42 = vpop.f32.mrb[2].mxu0  ;;  %v765_v44 = vmul.f32 %v3794_v41, %v3794_v41 }
 0x141   :  { %v3798_v43 = vpop.f32.mrb[3].mxu0  ;;  %v768_v50 = vmul.f32 %v3796_v42, %v3796_v42 }
 0x142   :  { %v695_v45 = vadd.f32 %v3798_v43, %v3794_v41  ;;  %v766_v46 = vmul.f32 %v3798_v43, %v3798_v43 }
 0x144   :  { %v696_v48 = vadd.f32 %v3792_v40, %v695_v45  ;;  %v829_v49 = vadd.f32 %v766_v46, %v765_v44 }
 0x146   :  { %v830_v51 = vadd.f32 %v829_v49, %v767_v47  ;;  %v3811_v52 = vpop.f32.mrb[4].mxu0  ;;  %v697_v53 = vadd.f32 %v3796_v42, %v696_v48 }
 0x147   :  { %v3814_v54 = vpop.f32.mrb[5].mxu0  ;;  %v771_v63 = vmul.f32 %v3811_v52, %v3811_v52 }
 0x148   :  { %v698_v55 = vadd.f32 %v697_v53, %v3814_v54  ;;  %v769_v56 = vmul.f32 %v3814_v54, %v3814_v54  ;;  %v831_v57 = vadd.f32 %v830_v51, %v768_v50  ;;  %v3819_v58 = vpop.f32.mrb[6].mxu0 }
 0x149   :  { %v3821_v59 = vpop.f32.mrb[7].mxu0  ;;  %v772_v2 = vmul.f32 %v3819_v58, %v3819_v58 }
 0x14a   :  { %v832_v60 = vadd.f32 %v831_v57, %v769_v56  ;;  %v699_v61 = vadd.f32 %v698_v55, %v3821_v59  ;;  %v770_v62 = vmul.f32 %v3821_v59, %v3821_v59 }
 0x14c   :  { %v700_v0 = vadd.f32 %v3811_v52, %v699_v61  ;;  %v833_v1 = vadd.f32 %v832_v60, %v770_v62 }
 0x14e   :  { %v834_v3 = vadd.f32 %v833_v1, %v771_v63  ;;  %v3831_v4 = vpop.f32.mrb[8].mxu0  ;;  %v701_v5 = vadd.f32 %v3819_v58, %v700_v0 }
 0x14f   :  { %v3834_v6 = vpop.f32.mrb[9].mxu0  ;;  %v775_v15 = vmul.f32 %v3831_v4, %v3831_v4 }
 0x150   :  { %v702_v7 = vadd.f32 %v701_v5, %v3834_v6  ;;  %v773_v8 = vmul.f32 %v3834_v6, %v3834_v6  ;;  %v835_v9 = vadd.f32 %v834_v3, %v772_v2  ;;  %v3839_v10 = vpop.f32.mrb[10].mxu0 }
 0x151   :  { %v3841_v11 = vpop.f32.mrb[11].mxu0  ;;  %v776_v18 = vmul.f32 %v3839_v10, %v3839_v10 }
 0x152   :  { %v836_v12 = vadd.f32 %v835_v9, %v773_v8  ;;  %v703_v13 = vadd.f32 %v702_v7, %v3841_v11  ;;  %v774_v14 = vmul.f32 %v3841_v11, %v3841_v11 }
 0x154   :  { %v704_v16 = vadd.f32 %v3831_v4, %v703_v13  ;;  %v837_v17 = vadd.f32 %v836_v12, %v774_v14 }
 0x156   :  { %v838_v19 = vadd.f32 %v837_v17, %v775_v15  ;;  %v3851_v20 = vpop.f32.mrb[12].mxu0  ;;  %v705_v21 = vadd.f32 %v3839_v10, %v704_v16 }
 0x157   :  { %v3854_v22 = vpop.f32.mrb[13].mxu0  ;;  %v779_v31 = vmul.f32 %v3851_v20, %v3851_v20 }
 0x158   :  { %v706_v23 = vadd.f32 %v705_v21, %v3854_v22  ;;  %v777_v24 = vmul.f32 %v3854_v22, %v3854_v22  ;;  %v839_v25 = vadd.f32 %v838_v19, %v776_v18  ;;  %v3859_v26 = vpop.f32.mrb[14].mxu0 }
 0x159   :  { %v3861_v27 = vpop.f32.mrb[15].mxu0  ;;  %v780_v34 = vmul.f32 %v3859_v26, %v3859_v26 }
 0x15a   :  { %v840_v28 = vadd.f32 %v839_v25, %v777_v24  ;;  %v707_v29 = vadd.f32 %v706_v23, %v3861_v27  ;;  %v778_v30 = vmul.f32 %v3861_v27, %v3861_v27 }
 0x15c   :  { %v708_v32 = vadd.f32 %v3851_v20, %v707_v29  ;;  %v841_v33 = vadd.f32 %v840_v28, %v778_v30 }
 0x15e   :  { %v842_v35 = vadd.f32 %v841_v33, %v779_v31  ;;  %v3871_v36 = vpop.f32.mrb[16].mxu0  ;;  %v709_v37 = vadd.f32 %v3859_v26, %v708_v32 }
 0x15f   :  { %v3874_v38 = vpop.f32.mrb[17].mxu0  ;;  %v783_v51 = vmul.f32 %v3871_v36, %v3871_v36 }
 0x160   :  { %v710_v39 = vadd.f32 %v709_v37, %v3874_v38  ;;  %v781_v44 = vmul.f32 %v3874_v38, %v3874_v38  ;;  %v843_v45 = vadd.f32 %v842_v35, %v780_v34  ;;  %v3879_v46 = vpop.f32.mrb[18].mxu0 }
 0x161   :  { %v3881_v47 = vpop.f32.mrb[19].mxu0  ;;  %v784_v56 = vmul.f32 %v3879_v46, %v3879_v46 }
 0x162   :  { %v844_v48 = vadd.f32 %v843_v45, %v781_v44  ;;  %v711_v49 = vadd.f32 %v710_v39, %v3881_v47  ;;  %v782_v50 = vmul.f32 %v3881_v47, %v3881_v47 }
 0x164   :  { %v712_v53 = vadd.f32 %v3871_v36, %v711_v49  ;;  %v845_v55 = vadd.f32 %v844_v48, %v782_v50 }
 0x166   :  { %v846_v57 = vadd.f32 %v845_v55, %v783_v51  ;;  %v3891_v60 = vpop.f32.mrb[20].mxu0  ;;  %v713_v61 = vadd.f32 %v3879_v46, %v712_v53 }
 0x167   :  { %v3894_v62 = vpop.f32.mrb[21].mxu0  ;;  %v787_v9 = vmul.f32 %v3891_v60, %v3891_v60 }
 0x168   :  { %v714_v63 = vadd.f32 %v713_v61, %v3894_v62  ;;  %v785_v0 = vmul.f32 %v3894_v62, %v3894_v62  ;;  %v847_v1 = vadd.f32 %v846_v57, %v784_v56  ;;  %v3899_v2 = vpop.f32.mrb[22].mxu0 }
 0x169   :  { %v3901_v3 = vpop.f32.mrb[23].mxu0  ;;  %v788_v14 = vmul.f32 %v3899_v2, %v3899_v2 }
 0x16a   :  { %v848_v5 = vadd.f32 %v847_v1, %v785_v0  ;;  %v715_v7 = vadd.f32 %v714_v63, %v3901_v3  ;;  %v786_v8 = vmul.f32 %v3901_v3, %v3901_v3 }
 0x16c   :  { %v716_v12 = vadd.f32 %v3891_v60, %v715_v7  ;;  %v849_v13 = vadd.f32 %v848_v5, %v786_v8 }
 0x16e   :  { %v850_v15 = vadd.f32 %v849_v13, %v787_v9  ;;  %v3911_v16 = vpop.f32.mrb[24].mxu0  ;;  %v717_v17 = vadd.f32 %v3899_v2, %v716_v12 }
 0x16f   :  { %v3914_v18 = vpop.f32.mrb[25].mxu0  ;;  %v791_v31 = vmul.f32 %v3911_v16, %v3911_v16 }
 0x170   :  { %v718_v19 = vadd.f32 %v717_v17, %v3914_v18  ;;  %v789_v21 = vmul.f32 %v3914_v18, %v3914_v18  ;;  %v851_v23 = vadd.f32 %v850_v15, %v788_v14  ;;  %v3919_v24 = vpop.f32.mrb[26].mxu0 }
 0x171   :  { %v3921_v25 = vpop.f32.mrb[27].mxu0  ;;  %v792_v34 = vmul.f32 %v3919_v24, %v3919_v24 }
 0x172   :  { %v852_v28 = vadd.f32 %v851_v23, %v789_v21  ;;  %v719_v29 = vadd.f32 %v718_v19, %v3921_v25  ;;  %v790_v30 = vmul.f32 %v3921_v25, %v3921_v25 }
 0x174   :  { %v720_v32 = vadd.f32 %v3911_v16, %v719_v29  ;;  %v853_v33 = vadd.f32 %v852_v28, %v790_v30 }
 0x176   :  { %v854_v35 = vadd.f32 %v853_v33, %v791_v31  ;;  %v3931_v37 = vpop.f32.mrb[28].mxu0  ;;  %v721_v39 = vadd.f32 %v3919_v24, %v720_v32 }
 0x177   :  { %v3934_v44 = vpop.f32.mrb[29].mxu0  ;;  %v795_v57 = vmul.f32 %v3931_v37, %v3931_v37 }
 0x178   :  { %v722_v45 = vadd.f32 %v721_v39, %v3934_v44  ;;  %v793_v48 = vmul.f32 %v3934_v44, %v3934_v44  ;;  %v855_v49 = vadd.f32 %v854_v35, %v792_v34  ;;  %v3939_v50 = vpop.f32.mrb[30].mxu0 }
 0x179   :  { %v3941_v51 = vpop.f32.mrb[31].mxu0  ;;  %v796_v0 = vmul.f32 %v3939_v50, %v3939_v50 }
 0x17a   :  { %v856_v53 = vadd.f32 %v855_v49, %v793_v48  ;;  %v723_v55 = vadd.f32 %v722_v45, %v3941_v51  ;;  %v794_v56 = vmul.f32 %v3941_v51, %v3941_v51 }
 0x17c   :  { %v724_v61 = vadd.f32 %v3931_v37, %v723_v55  ;;  %v857_v63 = vadd.f32 %v856_v53, %v794_v56 }
 0x17e   :  { %v858_v1 = vadd.f32 %v857_v63, %v795_v57  ;;  %v3951_v5 = vpop.f32.mrb[32].mxu0  ;;  %v725_v7 = vadd.f32 %v3939_v50, %v724_v61 }
 0x17f   :  { %7437 = vst [vmem:[#allocation16_spill] sm:$0xff] %v3951_v5  ;;  %v3954_v8 = vpop.f32.mrb[33].mxu0  ;;  %v799_v23 = vmul.f32 %v3951_v5, %v3951_v5 }
 0x180   :  { %7438 = vst [vmem:[#allocation17_spill] sm:$0xff] %v3954_v8  ;;  %v726_v9 = vadd.f32 %v725_v7, %v3954_v8  ;;  %v797_v12 = vmul.f32 %v3954_v8, %v3954_v8  ;;  %v859_v13 = vadd.f32 %v858_v1, %v796_v0  ;;  %v3959_v14 = vpop.f32.mrb[34].mxu0 }
 0x181   :  { %7439 = vst [vmem:[#allocation18_spill] sm:$0xff] %v3959_v14  ;;  %v3961_v15 = vpop.f32.mrb[35].mxu0  ;;  %v800_v30 = vmul.f32 %v3959_v14, %v3959_v14 }
 0x182   :  { %7440 = vst [vmem:[#allocation19_spill] sm:$0xff] %v3961_v15  ;;  %v860_v17 = vadd.f32 %v859_v13, %v797_v12  ;;  %v727_v19 = vadd.f32 %v726_v9, %v3961_v15  ;;  %v798_v21 = vmul.f32 %v3961_v15, %v3961_v15 }
 0x184   :  { %v728_v28 = vadd.f32 %v3951_v5, %v727_v19  ;;  %v861_v29 = vadd.f32 %v860_v17, %v798_v21 }
 0x186   :  { %v862_v31 = vadd.f32 %v861_v29, %v799_v23  ;;  %v3971_v32 = vpop.f32.mrb[36].mxu0  ;;  %v729_v33 = vadd.f32 %v3959_v14, %v728_v28 }
 0x187   :  { %7441 = vst [vmem:[#allocation20_spill] sm:$0xff] %v3971_v32  ;;  %v3974_v34 = vpop.f32.mrb[37].mxu0  ;;  %v803_v57 = vmul.f32 %v3971_v32, %v3971_v32 }
 0x188   :  { %7442 = vst [vmem:[#allocation21_spill] sm:$0xff] %v3974_v34  ;;  %v730_v35 = vadd.f32 %v729_v33, %v3974_v34  ;;  %v801_v39 = vmul.f32 %v3974_v34, %v3974_v34  ;;  %v863_v45 = vadd.f32 %v862_v31, %v800_v30  ;;  %v3979_v48 = vpop.f32.mrb[38].mxu0 }
 0x189   :  { %7443 = vst [vmem:[#allocation22_spill] sm:$0xff] %v3979_v48  ;;  %v3981_v49 = vpop.f32.mrb[39].mxu0  ;;  %v804_v0 = vmul.f32 %v3979_v48, %v3979_v48 }
 0x18a   :  { %7444 = vst [vmem:[#allocation23_spill] sm:$0xff] %v3981_v49  ;;  %v864_v53 = vadd.f32 %v863_v45, %v801_v39  ;;  %v731_v55 = vadd.f32 %v730_v35, %v3981_v49  ;;  %v802_v56 = vmul.f32 %v3981_v49, %v3981_v49 }
 0x18c   :  { %v732_v61 = vadd.f32 %v3971_v32, %v731_v55  ;;  %v865_v63 = vadd.f32 %v864_v53, %v802_v56 }
 0x18e   :  { %v866_v1 = vadd.f32 %v865_v63, %v803_v57  ;;  %v3991_v7 = vpop.f32.mrb[40].mxu0  ;;  %v733_v9 = vadd.f32 %v3979_v48, %v732_v61 }
 0x18f   :  { %7445 = vst [vmem:[#allocation24_spill] sm:$0xff] %v3991_v7  ;;  %v3994_v12 = vpop.f32.mrb[41].mxu0  ;;  %v807_v31 = vmul.f32 %v3991_v7, %v3991_v7 }
 0x190   :  { %7446 = vst [vmem:[#allocation25_spill] sm:$0xff] %v3994_v12  ;;  %v734_v13 = vadd.f32 %v733_v9, %v3994_v12  ;;  %v805_v17 = vmul.f32 %v3994_v12, %v3994_v12  ;;  %v867_v19 = vadd.f32 %v866_v1, %v804_v0  ;;  %v3999_v21 = vpop.f32.mrb[42].mxu0 }
 0x191   :  { %7447 = vst [vmem:[#allocation26_spill] sm:$0xff] %v3999_v21  ;;  %v4001_v23 = vpop.f32.mrb[43].mxu0  ;;  %v808_v39 = vmul.f32 %v3999_v21, %v3999_v21 }
 0x192   :  { %7448 = vst [vmem:[#allocation27_spill] sm:$0xff] %v4001_v23  ;;  %v868_v28 = vadd.f32 %v867_v19, %v805_v17  ;;  %v735_v29 = vadd.f32 %v734_v13, %v4001_v23  ;;  %v806_v30 = vmul.f32 %v4001_v23, %v4001_v23 }
 0x194   :  { %v736_v33 = vadd.f32 %v3991_v7, %v735_v29  ;;  %v869_v35 = vadd.f32 %v868_v28, %v806_v30 }
 0x196   :  { %v870_v45 = vadd.f32 %v869_v35, %v807_v31  ;;  %v4011_v53 = vpop.f32.mrb[44].mxu0  ;;  %v737_v55 = vadd.f32 %v3999_v21, %v736_v33 }
 0x197   :  { %7449 = vst [vmem:[#allocation28_spill] sm:$0xff] %v4011_v53  ;;  %v4014_v56 = vpop.f32.mrb[45].mxu0  ;;  %v811_v19 = vmul.f32 %v4011_v53, %v4011_v53 }
 0x198   :  { %7450 = vst [vmem:[#allocation29_spill] sm:$0xff] %v4014_v56  ;;  %v738_v57 = vadd.f32 %v737_v55, %v4014_v56  ;;  %v809_v61 = vmul.f32 %v4014_v56, %v4014_v56  ;;  %v871_v63 = vadd.f32 %v870_v45, %v808_v39  ;;  %v4019_v0 = vpop.f32.mrb[46].mxu0 }
 0x199   :  { %7451 = vst [vmem:[#allocation30_spill] sm:$0xff] %v4019_v0  ;;  %v4021_v1 = vpop.f32.mrb[47].mxu0  ;;  %v812_v30 = vmul.f32 %v4019_v0, %v4019_v0 }
 0x19a   :  { %7452 = vst [vmem:[#allocation31_spill] sm:$0xff] %v4021_v1  ;;  %v872_v9 = vadd.f32 %v871_v63, %v809_v61  ;;  %v739_v13 = vadd.f32 %v738_v57, %v4021_v1  ;;  %v810_v17 = vmul.f32 %v4021_v1, %v4021_v1 }
 0x19c   :  { %v740_v28 = vadd.f32 %v4011_v53, %v739_v13  ;;  %v873_v29 = vadd.f32 %v872_v9, %v810_v17 }
 0x19e   :  { %v874_v31 = vadd.f32 %v873_v29, %v811_v19  ;;  %v4031_v33 = vpop.f32.mrb[48].mxu0  ;;  %v741_v35 = vadd.f32 %v4019_v0, %v740_v28 }
 0x19f   :  { %7453 = vst [vmem:[#allocation32_spill] sm:$0xff] %v4031_v33  ;;  %v4034_v39 = vpop.f32.mrb[49].mxu0  ;;  %v815_v19 = vmul.f32 %v4031_v33, %v4031_v33 }
 0x1a0   :  { %7454 = vst [vmem:[#allocation33_spill] sm:$0xff] %v4034_v39  ;;  %v742_v45 = vadd.f32 %v741_v35, %v4034_v39  ;;  %v813_v55 = vmul.f32 %v4034_v39, %v4034_v39  ;;  %v875_v57 = vadd.f32 %v874_v31, %v812_v30  ;;  %v4039_v61 = vpop.f32.mrb[50].mxu0 }
 0x1a1   :  { %7455 = vst [vmem:[#allocation34_spill] sm:$0xff] %v4039_v61  ;;  %v4041_v63 = vpop.f32.mrb[51].mxu0  ;;  %v816_v35 = vmul.f32 %v4039_v61, %v4039_v61 }
 0x1a2   :  { %7456 = vst [vmem:[#allocation35_spill] sm:$0xff] %v4041_v63  ;;  %v876_v9 = vadd.f32 %v875_v57, %v813_v55  ;;  %v743_v13 = vadd.f32 %v742_v45, %v4041_v63  ;;  %v814_v17 = vmul.f32 %v4041_v63, %v4041_v63 }
 0x1a4   :  { %v744_v28 = vadd.f32 %v4031_v33, %v743_v13  ;;  %v877_v29 = vadd.f32 %v876_v9, %v814_v17 }
 0x1a6   :  { %v878_v30 = vadd.f32 %v877_v29, %v815_v19  ;;  %v4051_v31 = vpop.f32.mrb[52].mxu0  ;;  %v745_v39 = vadd.f32 %v4039_v61, %v744_v28 }
 0x1a7   :  { %7457 = vst [vmem:[#allocation36_spill] sm:$0xff] %v4051_v31  ;;  %v4054_v55 = vpop.f32.mrb[53].mxu0  ;;  %v819_v28 = vmul.f32 %v4051_v31, %v4051_v31 }
 0x1a8   :  { %7458 = vst [vmem:[#allocation37_spill] sm:$0xff] %v4054_v55  ;;  %v746_v45 = vadd.f32 %v745_v39, %v4054_v55  ;;  %v817_v57 = vmul.f32 %v4054_v55, %v4054_v55  ;;  %v879_v63 = vadd.f32 %v878_v30, %v816_v35  ;;  %v4059_v0 = vpop.f32.mrb[54].mxu0 }
 0x1a9   :  { %7459 = vst [vmem:[#allocation38_spill] sm:$0xff] %v4059_v0  ;;  %v4061_v13 = vpop.f32.mrb[55].mxu0  ;;  %v820_v55 = vmul.f32 %v4059_v0, %v4059_v0 }
 0x1aa   :  { %7460 = vst [vmem:[#allocation39_spill] sm:$0xff] %v4061_v13  ;;  %v880_v9 = vadd.f32 %v879_v63, %v817_v57  ;;  %v747_v17 = vadd.f32 %v746_v45, %v4061_v13  ;;  %v818_v19 = vmul.f32 %v4061_v13, %v4061_v13 }
 0x1ac   :  { %v748_v29 = vadd.f32 %v4051_v31, %v747_v17  ;;  %v881_v39 = vadd.f32 %v880_v9, %v818_v19 }
 0x1ae   :  { %v882_v35 = vadd.f32 %v881_v39, %v819_v28  ;;  %v4071_v30 = vpop.f32.mrb[56].mxu0  ;;  %v749_v61 = vadd.f32 %v4059_v0, %v748_v29 }
 0x1af   :  { %v664_v63 = vpop.f32.mrb[57].mxu0  ;;  %v823_v9 = vmul.f32 %v4071_v30, %v4071_v30 }
 0x1b0   :  { %v750_v57 = vadd.f32 %v749_v61, %v664_v63  ;;  %v821_v45 = vmul.f32 %v664_v63, %v664_v63  ;;  %v883_v33 = vadd.f32 %v882_v35, %v820_v55  ;;  %v3406_v53 = vpop.f32.mrb[58].mxu0 }
 0x1b1   :  { %v667_v13 = vpop.f32.mrb[59].mxu0  ;;  %v824_v28 = vmul.f32 %v3406_v53, %v3406_v53 }
 0x1b2   :  { %v884_v1 = vadd.f32 %v883_v33, %v821_v45  ;;  %v751_v56 = vadd.f32 %v750_v57, %v667_v13  ;;  %v822_v21 = vmul.f32 %v667_v13, %v667_v13 }
 0x1b4   :  { %v752_v17 = vadd.f32 %v4071_v30, %v751_v56  ;;  %v885_v19 = vadd.f32 %v884_v1, %v822_v21 }
 0x1b6   :  { %v886_v39 = vadd.f32 %v885_v19, %v823_v9  ;;  %v3409_v31 = vpop.f32.mrb[60].mxu0  ;;  %v753_v7 = vadd.f32 %v3406_v53, %v752_v17 }
 0x1b7   :  { %v680_v29 = vpop.f32.mrb[61].mxu0  ;;  %v827_v45 = vmul.f32 %v3409_v31, %v3409_v31 }
 0x1b8   :  { %v754_v0 = vadd.f32 %v753_v7, %v680_v29  ;;  %v825_v61 = vmul.f32 %v680_v29, %v680_v29  ;;  %v887_v23 = vadd.f32 %v886_v39, %v824_v28  ;;  %v3410_v55 = vpop.f32.mrb[62].mxu0 }
 0x1b9   :  { %v683_v35 = vpop.f32.mrb[63].mxu0  ;;  %v828_v49 = vmul.f32 %v3410_v55, %v3410_v55 }
 0x1ba   :  { %v888_v12 = vadd.f32 %v887_v23, %v825_v61  ;;  %v755_v33 = vadd.f32 %v754_v0, %v683_v35  ;;  %v826_v57 = vmul.f32 %v683_v35, %v683_v35 }
 0x1bc   :  { %v756_v48 = vadd.f32 %v3409_v31, %v755_v33  ;;  %v889_v32 = vadd.f32 %v888_v12, %v826_v57 }
 0x1be   :  { %v757_v34 = vadd.f32 %v3410_v55, %v756_v48  ;;  %v890_v56 = vadd.f32 %v889_v32, %v827_v45  ;;  %v909_v32 = vlaneseq }
 0x1c0   :  { %v758_v21 = vrot.slane %v757_v34, 4  ;;  %v891_v1 = vadd.f32 %v890_v56, %v828_v49  ;;  %v910_v48 = vshrl.u32 %v909_v32, 7 }
 0x1c2   :  { %v759_v9 = vadd.f32 %v758_v21, %v757_v34  ;;  %v892_v19 = vrot.slane %v891_v1, 4  ;;  %v901_v34 = vld [vmem:[%s7190_s4] sm:$0x1]  ;;  %v4080_v49 = vsub.s32 0, %v910_v48 }
 0x1c4   :  { %v760_v17 = vrot.slane %v759_v9, 2  ;;  %v893_v14 = vadd.f32 %v892_v19, %v891_v1  ;;  %7461 = vst [vmem:[#allocation40_spill] sm:$0xff] %v4080_v49 }
 0x1c6   :  { %v761_v7 = vadd.f32 %v760_v17, %v759_v9  ;;  %v894_v5 = vrot.slane %v893_v14, 2 }
 0x1c8   :  { %v762_v28 = vrot.slane %v761_v7, 1  ;;  %v895_v39 = vadd.f32 %v894_v5, %v893_v14  ;;  %v905_v5 = vld [vmem:[%s7191_s5] sm:$0x1] }
 0x1ca   :  { %v763_v15 = vadd.f32 %v762_v28, %v761_v7  ;;  %v896_v23 = vrot.slane %v895_v39, 1 }
 0x1cc   :  { %v764_v0 = vmul.f32 0.001953125, %v763_v15  ;;  %v897_v61 = vadd.f32 %v896_v23, %v895_v39 }
 0x1ce   :  { %v898_v8 = vmul.f32 0.001953125, %v897_v61  ;;  %v899_v33 = vmul.f32 %v764_v0, %v764_v0 }
 0x1d0   :  { %v900_v12 = vsub.f32 %v898_v8, %v899_v33 }
 0x1d2   :  { %v902_v57 = vadd.f32 1e-05, %v900_v12 }
 0x1d4   :  { %3549 = vrsqrt.f32 %v902_v57 }
 0x1de   :  { %v3550_v45 = vpop.eup %3549 }
 0x1df   :  { %v904_v56 = vmul.f32 %v3550_v45, %v901_v34 }
 0x1e1   :  { %v906_v14 = vmul.f32 %v904_v56, %v764_v0  ;;  %v4086_v15 = vrot.slane %v904_v56, %v4080_v49  ;;  %v3542_v56 = vld [vmem:[#allocation9 + $0x8] sm:$0xff]  }
 0x1e3   :  { %v907_v8 = vsub.f32 %v905_v5, %v906_v14  ;;  %v970_v21 = vmul.f32 %v4086_v15, %v664_v63  ;;  %v971_v1 = vmul.f32 %v4086_v15, %v667_v13  ;;  %v972_v9 = vmul.f32 %v4071_v30, %v4086_v15 }
 0x1e4   :  { %v973_v19 = vmul.f32 %v3406_v53, %v4086_v15  ;;  %v974_v17 = vmul.f32 %v4086_v15, %v680_v29  ;;  %v975_v7 = vmul.f32 %v4086_v15, %v683_v35  ;;  %v976_v28 = vmul.f32 %v3409_v31, %v4086_v15  ;;  %v3541_v29 = vld [vmem:[#allocation9] sm:$0xff]  }
 0x1e5   :  { %v977_v39 = vmul.f32 %v3410_v55, %v4086_v15  ;;  %v4098_v23 = vrot.slane %v907_v8, %v4080_v49  ;;  %v4102_v13 = vmul.f32 %v4086_v15, %v3794_v41  ;;  %v4106_v53 = vmul.f32 %v4086_v15, %v3798_v43  ;;  %3411 = vmatprep.subr.bf16.mxu1 %v3541_v29 }
 0x1e6   :  { %v4110_v30 = vmul.f32 %v3792_v40, %v4086_v15  ;;  %v4114_v31 = vmul.f32 %v3796_v42, %v4086_v15  ;;  %v4118_v63 = vmul.f32 %v4086_v15, %v3814_v54  ;;  %v4122_v41 = vmul.f32 %v4086_v15, %v3821_v59  ;;  %3412 = vmatpush3.bf16.msra.mxu1 %v3541_v29 }
 0x1e7   :  { %v1040_v43 = vadd.f32 %v4098_v23, %v970_v21  ;;  %v1041_v55 = vadd.f32 %v4098_v23, %v971_v1  ;;  %v1042_v40 = vadd.f32 %v4098_v23, %v972_v9  ;;  %v1043_v35 = vadd.f32 %v4098_v23, %v973_v19  ;;  %3413 = vmatprep.subr.bf16.mxu1 %v3542_v56 }
 0x1e8   :  { %v1044_v42 = vadd.f32 %v4098_v23, %v974_v17  ;;  %v1045_v0 = vadd.f32 %v4098_v23, %v975_v7  ;;  %v1046_v54 = vadd.f32 %v4098_v23, %v976_v28  ;;  %v1047_v61 = vadd.f32 %v4098_v23, %v977_v39 }
 0x1e9   :  { %v1104_v59 = vmax.f32 %v1040_v43, 0.0  ;;  %v1105_v33 = vmax.f32 %v1041_v55, 0.0  ;;  %v1106_v12 = vmax.f32 %v1042_v40, 0.0  ;;  %v1107_v57 = vmax.f32 %v1043_v35, 0.0 }
 0x1ea   :  { %v1108_v32 = vmax.f32 %v1044_v42, 0.0  ;;  %v1109_v48 = vmax.f32 %v1045_v0, 0.0  ;;  %v1110_v34 = vmax.f32 %v1046_v54, 0.0  ;;  %v1111_v45 = vmax.f32 %v1047_v61, 0.0  ;;  %3414 = vmatpush3.bf16.msra.mxu1 %v3542_v56 }
 0x1eb   :  { %v4132_v5 = vpack.c.bf16 %v1105_v33, %v1104_v59  ;;  %v4134_v14 = vpack.c.bf16 %v1107_v57, %v1106_v12  ;;  %v4138_v8 = vmul.f32 %v3811_v52, %v4086_v15  ;;  %v4142_v21 = vmul.f32 %v3819_v58, %v4086_v15 }
 0x1ec   :  { %v4144_v1 = vpack.c.bf16 %v1109_v48, %v1108_v32  ;;  %v4146_v9 = vpack.c.bf16 %v1111_v45, %v1110_v34  ;;  %v4150_v19 = vmul.f32 %v4086_v15, %v3834_v6  ;;  %v4154_v17 = vmul.f32 %v4086_v15, %v3841_v11  ;;  %v3543_v11 = vld [vmem:[#allocation9 + $0x10] sm:$0xff]  }
 0x1ed   :  { %7462 = vst [vmem:[#allocation41_spill] sm:$0xff] %v4132_v5  ;;  %7463 = vst [vmem:[#allocation42_spill] sm:$0xff] %v4134_v14  ;;  %v1364_v52 = vshrl.u32 %v4132_v5, 16  ;;  %v1367_v7 = vshll.u32 %v4132_v5, 16  ;;  %v1371_v58 = vshrl.u32 %v4134_v14, 16  ;;  %v1374_v28 = vshll.u32 %v4134_v14, 16  ;;  %3415 = vmatprep.subr.bf16.mxu1 %v3543_v11 }
 0x1ee   :  { %7464 = vst [vmem:[#allocation43_spill] sm:$0xff] %v4146_v9  ;;  %v1378_v39 = vshrl.u32 %v4144_v1, 16  ;;  %v1381_v29 = vshll.u32 %v4144_v1, 16  ;;  %v7219_v6 = vshrl.u32 %v4146_v9, 16  ;;  %v7220_v43 = vshll.u32 %v4146_v9, 16  ;;  %3416 = vmatpush3.bf16.msra.mxu1 %v3543_v11 }
 0x1ef   :  { %v1366_v55 = vrot.slane %v1364_v52, 7  ;;  %v1373_v40 = vrot.slane %v1371_v58, 7  ;;  %v1593_v35 = vrot.slane %v1367_v7, 1  ;;  %v1595_v42 = vrot.slane %v1374_v28, 1 }
 0x1f0   :  { %v7465_v0 = vmov 0  ;;  %v1380_v54 = vrot.slane %v1378_v39, 7  ;;  %v1597_v61 = vrot.slane %v1381_v29, 1  ;;  %v1734_v59 = vrot.slane %v7219_v6, 7  ;;  %v7486_v6 = vld [vmem:[#allocation27_spill] sm:$0xff] }
 0x1f1   :  { %v7466_v0 = vsel %vm4166_vm5, 4294967295, %v7465_v0  ;;  %v4174_v33 = vmul.f32 %v3831_v4, %v4086_v15  ;;  %v4176_v12 = vor.u32 %v1367_v7, %v1366_v55  ;;  %v4178_v57 = vor.u32 %v1374_v28, %v1373_v40  ;;  %v3544_v7 = vld [vmem:[#allocation9 + $0x18] sm:$0xff]   ;;  %v3545_v55 = vld [vmem:[#allocation9 + $0x20] sm:$0xff]  }
 0x1f2   :  { %7467 = vst [vmem:[#allocation44_spill] sm:$0xff] %v7466_v0  ;;  %v4180_v32 = vor.u32 %v1593_v35, %v1364_v52  ;;  %v4182_v48 = vor.u32 %v1595_v42, %v1371_v58  ;;  %v4184_v34 = vor.u32 %v1381_v29, %v1380_v54  ;;  %v4186_v45 = vor.u32 %v1597_v61, %v1378_v39  ;;  %v7472_v35 = vld [vmem:[#allocation17_spill] sm:$0xff]  ;;  %v7473_v42 = vld [vmem:[#allocation19_spill] sm:$0xff] }
 0x1f3   :  { %7468 = vst [vmem:[#allocation45_spill] sm:$0xff] %v4176_v12  ;;  %7469 = vst [vmem:[#allocation46_spill] sm:$0xff] %v4178_v57  ;;  %v4190_v56 = vor.u32 %v7220_v43, %v1734_v59  ;;  %v4194_v4 = vmul.f32 %v3839_v10, %v4086_v15  ;;  %v1500_v52 = vsel %vm4166_vm5, %v4176_v12, 0  ;;  %v1503_v58 = vsel %vm4166_vm5, %v4178_v57, 0  ;;  %3417 = vmatprep.subr.bf16.mxu1 %v3544_v7  ;;  %v7476_v59 = vld [vmem:[#allocation21_spill] sm:$0xff] }
 0x1f4   :  { %7470 = vst [vmem:[#allocation47_spill] sm:$0xff] %v4180_v32  ;;  %7471 = vst [vmem:[#allocation48_spill] sm:$0xff] %v4182_v48  ;;  %v4204_v28 = vmul.f32 %v4086_v15, %v3854_v22  ;;  %v4208_v39 = vmul.f32 %v4086_v15, %v3861_v27  ;;  %v1506_v10 = vsel %vm4166_vm5, %v4184_v34, 0  ;;  %v4215_v29 = vmul.f32 %v3851_v20, %v4086_v15  ;;  %v7492_v12 = vld [vmem:[#allocation29_spill] sm:$0xff] }
 0x1f5   :  { %1501 = vst [vmem:[#allocation2 + $0xe8] sm:$0xff] %v1500_v52  ;;  %1504 = vst [vmem:[#allocation2 + $0xf0] sm:$0xff] %v1503_v58  ;;  %v4219_v11 = vmul.f32 %v3859_v26, %v4086_v15  ;;  %v4223_v22 = vmul.f32 %v4086_v15, %v3874_v38  ;;  %v4231_v20 = vmul.f32 %v4086_v15, %v3881_v47  ;;  %3418 = vmatpush3.bf16.msra.mxu1 %v3544_v7  ;;  %v7477_v7 = vmov 0  ;;  %v7480_v52 = vld [vmem:[#allocation23_spill] sm:$0xff] }
 0x1f6   :  { %1507 = vst [vmem:[#allocation2 + $0xf8] sm:$0xff] %v1506_v10  ;;  %1536 = vst.msk [vmem:[#allocation2 + $0xe8] sm:$0xff] %vm1508_vm2, %v4132_v5  ;;  %v4235_v26 = vmul.f32 %v3871_v36, %v4086_v15  ;;  %v4239_v27 = vmul.f32 %v3879_v46, %v4086_v15  ;;  %v4243_v38 = vmul.f32 %v4086_v15, %v3894_v62  ;;  %3419 = vmatprep.subr.bf16.mxu1 %v3545_v55  ;;  %v7481_v10 = vld [vmem:[#allocation20_spill] sm:$0xff] }
 0x1f7   :  { %1537 = vst.msk [vmem:[#allocation2 + $0xf0] sm:$0xff] %vm1508_vm2, %v4134_v14  ;;  %1538 = vst.msk [vmem:[#allocation2 + $0xf8] sm:$0xff] %vm1508_vm2, %v4144_v1  ;;  %v4249_v47 = vmul.f32 %v4086_v15, %v3901_v3  ;;  %v4253_v36 = vmul.f32 %v3891_v60, %v4086_v15  ;;  %v4257_v46 = vmul.f32 %v3899_v2, %v4086_v15  ;;  %v7478_v7 = vsel %vm4313_vm8, 4294967295, %v7477_v7 }
 0x1f8   :  { %v4261_v62 = vmul.f32 %v4086_v15, %v3914_v18  ;;  %v4265_v40 = vmul.f32 %v4086_v15, %v3921_v25  ;;  %v4269_v3 = vmul.f32 %v3911_v16, %v4086_v15  ;;  %v4273_v60 = vmul.f32 %v3919_v24, %v4086_v15  ;;  %7479 = vst [vmem:[#allocation17_spill] sm:$0xff] %v7478_v7 }
 0x1f9   :  { %v4277_v2 = vmul.f32 %v4086_v15, %v3934_v44  ;;  %v4281_v18 = vmul.f32 %v4086_v15, %v3941_v51  ;;  %v4285_v25 = vmul.f32 %v3931_v37, %v4086_v15  ;;  %v4289_v16 = vmul.f32 %v3939_v50, %v4086_v15  ;;  %v7474_v51 = vld [vmem:[#allocation16_spill] sm:$0xff]  ;;  %v7475_v37 = vld [vmem:[#allocation18_spill] sm:$0xff]  ;;  %3420 = vmatpush3.bf16.msra.mxu1 %v3545_v55 }
 0x1fa   :  { %v4293_v24 = vmul.f32 %v4086_v15, %v7472_v35  ;;  %v4297_v44 = vmul.f32 %v4086_v15, %v7473_v42  ;;  %v4301_v54 = vmul.f32 %v7474_v51, %v4086_v15  ;;  %v4305_v61 = vmul.f32 %v7475_v37, %v4086_v15  ;;  %v7482_v42 = vld [vmem:[#allocation22_spill] sm:$0xff]  ;;  %v7484_v37 = vld [vmem:[#allocation25_spill] sm:$0xff] }
 0x1fb   :  { %v4309_v50 = vmul.f32 %v4086_v15, %v7476_v59  ;;  %v4319_v58 = vmul.f32 %v4086_v15, %v7480_v52  ;;  %v4323_v35 = vmul.f32 %v7481_v10, %v4086_v15  ;;  %v4327_v51 = vmul.f32 %v7482_v42, %v4086_v15  ;;  %v3546_v59 = vld [vmem:[#allocation9 + $0x28] sm:$0xff]   ;;  %v7488_v52 = vld [vmem:[#allocation24_spill] sm:$0xff]  ;;  %v7490_v10 = vld [vmem:[#allocation26_spill] sm:$0xff] }
 0x1fc   :  { %v4331_v55 = vmul.f32 %v4086_v15, %v7484_v37  ;;  %v4335_v43 = vmul.f32 %v4086_v15, %v7486_v6  ;;  %v4339_v49 = vmul.f32 %v7488_v52, %v4086_v15  ;;  %v4343_v5 = vmul.f32 %v7490_v10, %v4086_v15  ;;  %v7496_v6 = vld [vmem:[#allocation28_spill] sm:$0xff]  ;;  %v7498_v52 = vld [vmem:[#allocation30_spill] sm:$0xff]  ;;  %v7500_v10 = vld [vmem:[#allocation33_spill] sm:$0xff]  ;;  %3421 = vmatprep.subr.bf16.mxu1 %v3546_v59 }
 0x1fd   :  { %7483 = vst [vmem:[#allocation19_spill] sm:$0xff] %v4327_v51  ;;  %v4347_v42 = vmul.f32 %v4086_v15, %v7492_v12  ;;  %v1713_v37 = vld [vmem:[#allocation2 + $0xe8] sm:$0xff]  ;;  %v7502_v12 = vmov 0  ;;  %3422 = vmatpush3.bf16.msra.mxu1 %v3546_v59 }
 0x1fe   :  { %7485 = vst [vmem:[#allocation16_spill] sm:$0xff] %v4331_v55  ;;  %7487 = vst [vmem:[#allocation18_spill] sm:$0xff] %v4335_v43  ;;  %v1716_v0 = vld [vmem:[#allocation2 + $0xf0] sm:$0xff]  ;;  %v7494_v55 = vld [vmem:[#allocation31_spill] sm:$0xff]  ;;  %v4355_v43 = vmul.f32 %v7496_v6, %v4086_v15  ;;  %v7503_v12 = vsel %vm4367_vm10, 4294967295, %v7502_v12 }
 0x1ff   :  { %7489 = vst [vmem:[#allocation21_spill] sm:$0xff] %v4339_v49  ;;  %7491 = vst [vmem:[#allocation23_spill] sm:$0xff] %v4343_v5  ;;  %v4351_v51 = vmul.f32 %v4086_v15, %v7494_v55  ;;  %v4359_v49 = vmul.f32 %v7498_v52, %v4086_v15  ;;  %v4363_v5 = vmul.f32 %v4086_v15, %v7500_v10  ;;  %v1719_v52 = vld [vmem:[#allocation2 + $0xf8] sm:$0xff] }
 0x200   :  { %7493 = vst [vmem:[#allocation20_spill] sm:$0xff] %v4347_v42  ;;  %7497 = vst [vmem:[#allocation25_spill] sm:$0xff] %v4355_v43  ;;  %v1714_v55 = vsel %vm4313_vm8, %v4180_v32, %v1713_v37  ;;  %v1717_v6 = vsel %vm4313_vm8, %v4182_v48, %v1716_v0  ;;  %v1720_v42 = vsel %vm4313_vm8, %v4186_v45, %v1719_v52  ;;  %v7509_v52 = vld [vmem:[#allocation37_spill] sm:$0xff] }
 0x201   :  { %7495 = vst [vmem:[#allocation22_spill] sm:$0xff] %v4351_v51  ;;  %7499 = vst [vmem:[#allocation27_spill] sm:$0xff] %v4359_v49  ;;  %v7505_v49 = vld [vmem:[#allocation35_spill] sm:$0xff]  ;;  %v3547_v51 = vld [vmem:[#allocation9 + $0x30] sm:$0xff]   ;;  %v1830_v37 = vsel %vm4367_vm10, %v4178_v57, %v1714_v55  ;;  %v1833_v0 = vsel %vm4367_vm10, %v4184_v34, %v1717_v6  ;;  %v1836_v59 = vsel %vm4367_vm10, %v4190_v56, %v1720_v42 }
 0x202   :  { %7501 = vst [vmem:[#allocation24_spill] sm:$0xff] %v4363_v5  ;;  %7504 = vst [vmem:[#allocation26_spill] sm:$0xff] %v7503_v12  ;;  %v4379_v10 = vmul.f32 %v4086_v15, %v7505_v49  ;;  %v7506_v5 = vld [vmem:[#allocation32_spill] sm:$0xff]  ;;  %v7508_v49 = vld [vmem:[#allocation34_spill] sm:$0xff]  ;;  %v4403_v7 = vmul.f32 %v4086_v15, %v7509_v52  ;;  %3423 = vmatprep.subr.bf16.mxu1 %v3547_v51  ;;  %v4427_v52 = vadd.f32 %v4098_v23, %v4102_v13 }
 0x203   :  { %v4383_v43 = vmul.f32 %v7506_v5, %v4086_v15  ;;  %v4396_v32 = vmul.f32 %v7508_v49, %v4086_v15  ;;  %v3548_v5 = vld [vmem:[#allocation9 + $0x38] sm:$0xff]   ;;  %1831 = vst [vmem:[#allocation2 + $0xe8] sm:$0xff] %v1830_v37  ;;  %1834 = vst [vmem:[#allocation2 + $0xf0] sm:$0xff] %v1833_v0  ;;  %v7511_v6 = vld [vmem:[#allocation36_spill] sm:$0xff]  ;;  %v7513_v0 = vshll.u32 %v4146_v9, 16  ;;  %v4449_v13 = vadd.f32 %v4098_v23, %v4122_v41 }
 0x204   :  { %v7510_v55 = vld [vmem:[#allocation39_spill] sm:$0xff]  ;;  %1837 = vst [vmem:[#allocation2 + $0xf8] sm:$0xff] %v1836_v59  ;;  %1868 = vst.msk [vmem:[#allocation2 + $0xe8] sm:$0xff] %vm1838_vm7, %v4134_v14  ;;  %v7512_v42 = vld [vmem:[#allocation38_spill] sm:$0xff]  ;;  %v4431_v59 = vadd.f32 %v4098_v23, %v4106_v53  ;;  %3424 = vmatpush3.bf16.msra.mxu1 %v3547_v51  ;;  %v4453_v53 = vadd.f32 %v4098_v23, %v4138_v8  ;;  %v4469_v41 = vadd.f32 %v4098_v23, %v4174_v33 }
 0x205   :  { %7507 = vst [vmem:[#allocation29_spill] sm:$0xff] %v4383_v43  ;;  %v4407_v57 = vmul.f32 %v4086_v15, %v7510_v55  ;;  %v4411_v43 = vmul.f32 %v7511_v6, %v4086_v15  ;;  %1869 = vst.msk [vmem:[#allocation2 + $0xf0] sm:$0xff] %vm1838_vm7, %v4144_v1  ;;  %v4419_v37 = vmul.f32 %v7512_v42, %v4086_v15  ;;  %v4423_v49 = vrot.slane %v7513_v0, 1 }
 0x206   :  { %1870 = vst.msk [vmem:[#allocation2 + $0xf8] sm:$0xff] %vm1838_vm7, %v4146_v9  ;;  %v4437_v55 = vadd.f32 %v4098_v23, %v4110_v30  ;;  %v4441_v15 = vadd.f32 %v4098_v23, %v4114_v31  ;;  %v4445_v6 = vadd.f32 %v4098_v23, %v4118_v63  ;;  %v4457_v30 = vadd.f32 %v4098_v23, %v4142_v21 }
 0x207   :  { %7514 = vst [vmem:[#allocation31_spill] sm:$0xff] %v4423_v49  ;;  %v4461_v31 = vadd.f32 %v4098_v23, %v4150_v19  ;;  %v4465_v63 = vadd.f32 %v4098_v23, %v4154_v17  ;;  %3425 = vmatprep.subr.bf16.mxu1 %v3548_v5  ;;  %v4473_v8 = vadd.f32 %v4098_v23, %v4194_v4  ;;  %v7518_v42 = vmov 0 }
 0x208   :  { %v4477_v21 = vadd.f32 %v4098_v23, %v4204_v28  ;;  %v4481_v19 = vadd.f32 %v4098_v23, %v4208_v39  ;;  %v4485_v17 = vadd.f32 %v4098_v23, %v4215_v29  ;;  %v4489_v33 = vadd.f32 %v4098_v23, %v4219_v11  ;;  %3426 = vmatpush3.bf16.msra.mxu1 %v3548_v5  ;;  %v7529_v14 = vld [vmem:[#allocation22_spill] sm:$0xff] }
 0x209   :  { %v4493_v4 = vadd.f32 %v4098_v23, %v4223_v22  ;;  %v4497_v28 = vadd.f32 %v4098_v23, %v4231_v20  ;;  %v4501_v39 = vadd.f32 %v4098_v23, %v4235_v26  ;;  %v4505_v29 = vadd.f32 %v4098_v23, %v4239_v27  ;;  %v7532_v49 = vld [vmem:[#allocation24_spill] sm:$0xff] }
 0x20a   :  { %v4509_v11 = vadd.f32 %v4098_v23, %v4243_v38  ;;  %v4513_v22 = vadd.f32 %v4098_v23, %v4249_v47  ;;  %v4517_v20 = vadd.f32 %v4098_v23, %v4253_v36  ;;  %v4521_v26 = vadd.f32 %v4098_v23, %v4257_v46 }
 0x20b   :  { %v4525_v27 = vadd.f32 %v4098_v23, %v4261_v62  ;;  %v4529_v38 = vadd.f32 %v4098_v23, %v4265_v40  ;;  %v7515_v47 = vmov 0  ;;  %v1966_v36 = vld [vmem:[#allocation2 + $0xe8] sm:$0xff]  ;;  %v4539_v46 = vadd.f32 %v4098_v23, %v4269_v3 }
 0x20c   :  { %v7516_v47 = vsel %vm4533_vm14, 4294967295, %v7515_v47  ;;  %v1969_v51 = vld [vmem:[#allocation2 + $0xf0] sm:$0xff]  ;;  %v4543_v62 = vadd.f32 %v4098_v23, %v4273_v60  ;;  %v4547_v40 = vadd.f32 %v4098_v23, %v4277_v2  ;;  %v4551_v5 = vadd.f32 %v4098_v23, %v4281_v18 }
 0x20d   :  { %7517 = vst [vmem:[#allocation28_spill] sm:$0xff] %v7516_v47  ;;  %v7519_v42 = vsel %vm4555_vm15, 4294967295, %v7518_v42  ;;  %v1967_v3 = vsel %vm4533_vm14, %v4182_v48, %v1966_v36  ;;  %v1970_v60 = vsel %vm4533_vm14, %v4186_v45, %v1969_v51  ;;  %v4567_v2 = vadd.f32 %v4098_v23, %v4285_v25  ;;  %v7531_v47 = vld [vmem:[#allocation27_spill] sm:$0xff] }
 0x20e   :  { %7520 = vst [vmem:[#allocation30_spill] sm:$0xff] %v7519_v42  ;;  %v4571_v18 = vadd.f32 %v4098_v23, %v4289_v16  ;;  %v2062_v0 = vsel %vm4555_vm15, %v4184_v34, %v1967_v3  ;;  %v2065_v36 = vsel %vm4555_vm15, %v4190_v56, %v1970_v60  ;;  %v4581_v48 = vadd.f32 %v4098_v23, %v4293_v24  ;;  %v7530_v42 = vld [vmem:[#allocation25_spill] sm:$0xff] }
 0x20f   :  { %7521 = vst [vmem:[#allocation33_spill] sm:$0xff] %v4567_v2  ;;  %v4585_v25 = vadd.f32 %v4098_v23, %v4297_v44  ;;  %2063 = vst [vmem:[#allocation2 + $0xe8] sm:$0xff] %v2062_v0  ;;  %v4589_v16 = vadd.f32 %v4098_v23, %v4301_v54  ;;  %v4593_v34 = vadd.f32 %v4098_v23, %v4305_v61  ;;  %v7523_v54 = vld [vmem:[#allocation19_spill] sm:$0xff]  ;;  %v1048_v12 = vmax.f32 %v4427_v52, 0.0 }
 0x210   :  { %7522 = vst [vmem:[#allocation35_spill] sm:$0xff] %v4571_v18  ;;  %2066 = vst [vmem:[#allocation2 + $0xf0] sm:$0xff] %v2065_v36  ;;  %v4597_v56 = vadd.f32 %v4098_v23, %v4309_v50  ;;  %v4601_v24 = vadd.f32 %v4098_v23, %v4319_v58  ;;  %v4609_v44 = vadd.f32 %v4098_v23, %v4323_v35  ;;  %v7524_v50 = vld [vmem:[#allocation16_spill] sm:$0xff]  ;;  %v7525_v58 = vld [vmem:[#allocation18_spill] sm:$0xff] }
 0x211   :  { %2096 = vst.msk [vmem:[#allocation2 + $0xe8] sm:$0xff] %vm2067_vm12, %v4144_v1  ;;  %2097 = vst.msk [vmem:[#allocation2 + $0xf0] sm:$0xff] %vm2067_vm12, %v4146_v9  ;;  %v4613_v61 = vadd.f32 %v4098_v23, %v7523_v54  ;;  %v4617_v51 = vadd.f32 %v4098_v23, %v7524_v50  ;;  %v4621_v3 = vadd.f32 %v4098_v23, %v7525_v58  ;;  %v7526_v1 = vld [vmem:[#allocation21_spill] sm:$0xff]  ;;  %v7527_v0 = vld [vmem:[#allocation23_spill] sm:$0xff] }
 0x212   :  { %v4625_v60 = vadd.f32 %v4098_v23, %v7526_v1  ;;  %v4629_v35 = vadd.f32 %v4098_v23, %v7527_v0  ;;  %v7528_v36 = vld [vmem:[#allocation20_spill] sm:$0xff]  ;;  %v4637_v50 = vadd.f32 %v4098_v23, %v7529_v14  ;;  %v4641_v58 = vadd.f32 %v4098_v23, %v7530_v42  ;;  %v7533_v9 = vld [vmem:[#allocation29_spill] sm:$0xff] }
 0x213   :  { %v4633_v54 = vadd.f32 %v4098_v23, %v7528_v36  ;;  %v4645_v1 = vadd.f32 %v4098_v23, %v7531_v47  ;;  %v4649_v0 = vadd.f32 %v4098_v23, %v7532_v49  ;;  %v4653_v36 = vadd.f32 %v4098_v23, %v4379_v10 }
 0x214   :  { %v4657_v14 = vadd.f32 %v4098_v23, %v7533_v9  ;;  %v4661_v42 = vadd.f32 %v4098_v23, %v4396_v32  ;;  %v4665_v47 = vadd.f32 %v4098_v23, %v4403_v7  ;;  %v4669_v49 = vadd.f32 %v4098_v23, %v4407_v57 }
 0x215   :  { %v4673_v10 = vadd.f32 %v4098_v23, %v4411_v43  ;;  %v4677_v9 = vadd.f32 %v4098_v23, %v4419_v37  ;;  %v1049_v32 = vmax.f32 %v4431_v59, 0.0  ;;  %v1051_v7 = vmax.f32 %v4441_v15, 0.0 }
 0x216   :  { %7534 = vst [vmem:[#allocation32_spill] sm:$0xff] %v4661_v42  ;;  %7535 = vst [vmem:[#allocation34_spill] sm:$0xff] %v4665_v47  ;;  %v1050_v42 = vmax.f32 %v4437_v55, 0.0  ;;  %v1052_v47 = vmax.f32 %v4445_v6, 0.0  ;;  %v1053_v57 = vmax.f32 %v4449_v13, 0.0  ;;  %v1055_v43 = vmax.f32 %v4457_v30, 0.0 }
 0x217   :  { %7536 = vst [vmem:[#allocation37_spill] sm:$0xff] %v4669_v49  ;;  %7537 = vst [vmem:[#allocation39_spill] sm:$0xff] %v4673_v10  ;;  %v1054_v49 = vmax.f32 %v4453_v53, 0.0  ;;  %v1056_v10 = vmax.f32 %v4461_v31, 0.0  ;;  %v1057_v23 = vmax.f32 %v4465_v63, 0.0  ;;  %v7538_v37 = vmov 0 }
 0x218   :  { %v7539_v37 = vsel %vm4691_vm0, 4294967295, %v7538_v37  ;;  %v2184_v52 = vld [vmem:[#allocation2 + $0xe8] sm:$0xff]  ;;  %v1058_v59 = vmax.f32 %v4469_v41, 0.0  ;;  %v1059_v55 = vmax.f32 %v4473_v8, 0.0  ;;  %v1060_v15 = vmax.f32 %v4477_v21, 0.0 }
 0x219   :  { %7540 = vst [vmem:[#allocation36_spill] sm:$0xff] %v7539_v37  ;;  %v1061_v6 = vmax.f32 %v4481_v19, 0.0  ;;  %v2185_v13 = vsel %vm4691_vm0, %v4186_v45, %v2184_v52  ;;  %v1062_v53 = vmax.f32 %v4485_v17, 0.0  ;;  %v1063_v30 = vmax.f32 %v4489_v33, 0.0 }
 0x21a   :  { %v1064_v31 = vmax.f32 %v4493_v4, 0.0  ;;  %2186 = vst [vmem:[#allocation2 + $0xe8] sm:$0xff] %v2185_v13  ;;  %v1065_v63 = vmax.f32 %v4497_v28, 0.0  ;;  %v1066_v41 = vmax.f32 %v4501_v39, 0.0  ;;  %v1067_v8 = vmax.f32 %v4505_v29, 0.0 }
 0x21b   :  { %v1068_v21 = vmax.f32 %v4509_v11, 0.0  ;;  %v1069_v19 = vmax.f32 %v4513_v22, 0.0  ;;  %v1070_v37 = vmax.f32 %v4517_v20, 0.0  ;;  %v1071_v45 = vmax.f32 %v4521_v26, 0.0 }
 0x21c   :  { %v1072_v17 = vmax.f32 %v4525_v27, 0.0  ;;  %v1073_v33 = vmax.f32 %v4529_v38, 0.0  ;;  %v1074_v4 = vmax.f32 %v4539_v46, 0.0  ;;  %v1075_v28 = vmax.f32 %v4543_v62, 0.0 }
 0x21d   :  { %v1076_v39 = vmax.f32 %v4547_v40, 0.0  ;;  %v1077_v29 = vmax.f32 %v4551_v5, 0.0  ;;  %v1080_v20 = vmax.f32 %v4581_v48, 0.0  ;;  %v1081_v26 = vmax.f32 %v4585_v25, 0.0  ;;  %v7541_v22 = vld [vmem:[#allocation32_spill] sm:$0xff]  ;;  %v7542_v11 = vld [vmem:[#allocation34_spill] sm:$0xff] }
 0x21e   :  { %v1082_v27 = vmax.f32 %v4589_v16, 0.0  ;;  %v1083_v38 = vmax.f32 %v4593_v34, 0.0  ;;  %v1084_v46 = vmax.f32 %v4597_v56, 0.0  ;;  %v1085_v62 = vmax.f32 %v4601_v24, 0.0  ;;  %v7543_v18 = vld [vmem:[#allocation37_spill] sm:$0xff]  ;;  %v7544_v2 = vld [vmem:[#allocation39_spill] sm:$0xff] }
 0x21f   :  { %v1086_v40 = vmax.f32 %v4609_v44, 0.0  ;;  %v1087_v5 = vmax.f32 %v4613_v61, 0.0  ;;  %v1088_v52 = vmax.f32 %v4617_v51, 0.0  ;;  %v1089_v13 = vmax.f32 %v4621_v3, 0.0 }
 0x220   :  { %v1090_v48 = vmax.f32 %v4625_v60, 0.0  ;;  %v1091_v25 = vmax.f32 %v4629_v35, 0.0  ;;  %v1092_v16 = vmax.f32 %v4633_v54, 0.0  ;;  %v1093_v34 = vmax.f32 %v4637_v50, 0.0 }
 0x221   :  { %v1094_v56 = vmax.f32 %v4641_v58, 0.0  ;;  %v1095_v24 = vmax.f32 %v4645_v1, 0.0  ;;  %v1096_v44 = vmax.f32 %v4649_v0, 0.0  ;;  %v1097_v61 = vmax.f32 %v4653_v36, 0.0 }
 0x222   :  { %v1098_v51 = vmax.f32 %v4657_v14, 0.0  ;;  %v1099_v3 = vmax.f32 %v7541_v22, 0.0  ;;  %v1100_v60 = vmax.f32 %v7542_v11, 0.0  ;;  %v1101_v35 = vmax.f32 %v7543_v18, 0.0 }
 0x223   :  { %v1102_v54 = vmax.f32 %v7544_v2, 0.0  ;;  %v1103_v50 = vmax.f32 %v4677_v9, 0.0  ;;  %v4744_v58 = vpack.c.bf16 %v1049_v32, %v1048_v12  ;;  %v4746_v1 = vpack.c.bf16 %v1051_v7, %v1050_v42 }
 0x224   :  { %v4748_v0 = vpack.c.bf16 %v1053_v57, %v1052_v47  ;;  %v4750_v36 = vpack.c.bf16 %v1055_v43, %v1054_v49  ;;  %v4752_v14 = vpack.c.bf16 %v1057_v23, %v1056_v10  ;;  %v4754_v22 = vpack.c.bf16 %v1059_v55, %v1058_v59 }
 0x225   :  { %7545 = vst [vmem:[#allocation38_spill] sm:$0xff] %v4746_v1  ;;  %v4756_v11 = vpack.c.bf16 %v1061_v6, %v1060_v15  ;;  %v4758_v18 = vpack.c.bf16 %v1063_v30, %v1062_v53  ;;  %v4760_v2 = vpack.c.bf16 %v1065_v63, %v1064_v31  ;;  %v4762_v9 = vpack.c.bf16 %v1067_v8, %v1066_v41 }
 0x226   :  { %7546 = vst [vmem:[#allocation19_spill] sm:$0xff] %v4748_v0  ;;  %7547 = vst [vmem:[#allocation16_spill] sm:$0xff] %v4750_v36  ;;  %v4764_v12 = vpack.c.bf16 %v1069_v19, %v1068_v21  ;;  %v4766_v42 = vpack.c.bf16 %v1071_v45, %v1070_v37  ;;  %v4768_v47 = vpack.c.bf16 %v1073_v33, %v1072_v17  ;;  %v7269_v31 = vshrl.u32 %v4744_v58, 16 }
 0x227   :  { %7548 = vst [vmem:[#allocation18_spill] sm:$0xff] %v4752_v14  ;;  %7549 = vst [vmem:[#allocation21_spill] sm:$0xff] %v4754_v22  ;;  %v4770_v49 = vpack.c.bf16 %v1075_v28, %v1074_v4  ;;  %v4772_v10 = vpack.c.bf16 %v1077_v29, %v1076_v39  ;;  %v4774_v32 = vpack.c.bf16 %v1081_v26, %v1080_v20  ;;  %v7290_v63 = vshll.u32 %v4744_v58, 16 }
 0x228   :  { %7550 = vst [vmem:[#allocation23_spill] sm:$0xff] %v4756_v11  ;;  %7551 = vst [vmem:[#allocation20_spill] sm:$0xff] %v4758_v18  ;;  %v4776_v7 = vpack.c.bf16 %v1083_v38, %v1082_v27  ;;  %v4778_v57 = vpack.c.bf16 %v1085_v62, %v1084_v46  ;;  %v4780_v43 = vpack.c.bf16 %v1087_v5, %v1086_v40  ;;  %v7266_v41 = vshrl.u32 %v4746_v1, 16 }
 0x229   :  { %7552 = vst [vmem:[#allocation22_spill] sm:$0xff] %v4760_v2  ;;  %7553 = vst [vmem:[#allocation25_spill] sm:$0xff] %v4762_v9  ;;  %v4782_v23 = vpack.c.bf16 %v1089_v13, %v1088_v52  ;;  %v4784_v59 = vpack.c.bf16 %v1091_v25, %v1090_v48  ;;  %v4786_v37 = vpack.c.bf16 %v1093_v34, %v1092_v16  ;;  %v7287_v8 = vshll.u32 %v4746_v1, 16 }
 0x22a   :  { %7554 = vst [vmem:[#allocation27_spill] sm:$0xff] %v4764_v12  ;;  %7555 = vst [vmem:[#allocation24_spill] sm:$0xff] %v4766_v42  ;;  %v4788_v55 = vpack.c.bf16 %v1095_v24, %v1094_v56  ;;  %v4790_v15 = vpack.c.bf16 %v1097_v61, %v1096_v44  ;;  %v4792_v6 = vpack.c.bf16 %v1099_v3, %v1098_v51  ;;  %v7263_v21 = vshrl.u32 %v4748_v0, 16 }
 0x22b   :  { %7556 = vst [vmem:[#allocation29_spill] sm:$0xff] %v4768_v47  ;;  %7557 = vst [vmem:[#allocation32_spill] sm:$0xff] %v4770_v49  ;;  %v4794_v53 = vpack.c.bf16 %v1101_v35, %v1100_v60  ;;  %v4796_v30 = vpack.c.bf16 %v1103_v50, %v1102_v54  ;;  %v7284_v19 = vshll.u32 %v4748_v0, 16  ;;  %v1177_v45 = vrot.slane %v7269_v31, 7 }
 0x22c   :  { %7558 = vst [vmem:[#allocation34_spill] sm:$0xff] %v4772_v10  ;;  %7559 = vst [vmem:[#allocation37_spill] sm:$0xff] %v4774_v32  ;;  %v7257_v17 = vshrl.u32 %v4750_v36, 16  ;;  %v7281_v33 = vshll.u32 %v4750_v36, 16  ;;  %v7254_v4 = vshrl.u32 %v4752_v14, 16  ;;  %v1184_v28 = vrot.slane %v7266_v41, 7 }
 0x22d   :  { %7560 = vst [vmem:[#allocation39_spill] sm:$0xff] %v4776_v7  ;;  %7561 = vst [vmem:[#allocation49_spill] sm:$0xff] %v4778_v57  ;;  %v1191_v39 = vrot.slane %v7263_v21, 7  ;;  %v7278_v29 = vshll.u32 %v4752_v14, 16  ;;  %v7251_v20 = vshrl.u32 %v4754_v22, 16  ;;  %v4817_v26 = vor.u32 %v7290_v63, %v1177_v45 }
 0x22e   :  { %7562 = vst [vmem:[#allocation50_spill] sm:$0xff] %v4780_v43  ;;  %7563 = vst [vmem:[#allocation51_spill] sm:$0xff] %v4782_v23  ;;  %v1198_v27 = vrot.slane %v7257_v17, 7  ;;  %v1205_v38 = vrot.slane %v7254_v4, 7  ;;  %v7275_v46 = vshll.u32 %v4754_v22, 16  ;;  %v4826_v62 = vor.u32 %v7287_v8, %v1184_v28 }
 0x22f   :  { %7564 = vst [vmem:[#allocation52_spill] sm:$0xff] %v4784_v59  ;;  %7565 = vst [vmem:[#allocation53_spill] sm:$0xff] %v4786_v37  ;;  %v4830_v40 = vor.u32 %v7284_v19, %v1191_v39  ;;  %v1212_v5 = vrot.slane %v7251_v20, 7  ;;  %v7250_v52 = vshrl.u32 %v4756_v11, 16  ;;  %v7272_v25 = vshll.u32 %v4756_v11, 16 }
 0x230   :  { %7566 = vst [vmem:[#allocation54_spill] sm:$0xff] %v4788_v55  ;;  %7567 = vst [vmem:[#allocation55_spill] sm:$0xff] %v4790_v15  ;;  %v4837_v13 = vor.u32 %v7281_v33, %v1198_v27  ;;  %v4841_v48 = vor.u32 %v7278_v29, %v1205_v38  ;;  %v7248_v16 = vshrl.u32 %v4758_v18, 16  ;;  %v7260_v24 = vshll.u32 %v4758_v18, 16 }
 0x231   :  { %7568 = vst [vmem:[#allocation56_spill] sm:$0xff] %v4792_v6  ;;  %7569 = vst [vmem:[#allocation57_spill] sm:$0xff] %v4794_v53  ;;  %v4847_v34 = vor.u32 %v7275_v46, %v1212_v5  ;;  %v1219_v56 = vrot.slane %v7250_v52, 7  ;;  %v7247_v44 = vshrl.u32 %v4760_v2, 16  ;;  %v7253_v51 = vshll.u32 %v4760_v2, 16 }
 0x232   :  { %7570 = vst [vmem:[#allocation58_spill] sm:$0xff] %v4796_v30  ;;  %v1226_v61 = vrot.slane %v7248_v16, 7  ;;  %v7249_v3 = vshrl.u32 %v4762_v9, 16  ;;  %v7256_v60 = vshll.u32 %v4762_v9, 16  ;;  %v7252_v50 = vshrl.u32 %v4764_v12, 16 }
 0x233   :  { %v4860_v35 = vor.u32 %v7272_v25, %v1219_v56  ;;  %v1233_v54 = vrot.slane %v7247_v44, 7  ;;  %v7259_v45 = vshll.u32 %v4764_v12, 16  ;;  %v7255_v27 = vshrl.u32 %v4766_v42, 16 }
 0x234   :  { %v4868_v28 = vor.u32 %v7260_v24, %v1226_v61  ;;  %v1240_v39 = vrot.slane %v7249_v3, 7  ;;  %v7262_v38 = vshll.u32 %v4766_v42, 16  ;;  %v1247_v56 = vrot.slane %v7252_v50, 7 }
 0x235   :  { %v4876_v5 = vor.u32 %v7253_v51, %v1233_v54  ;;  %v7258_v44 = vshrl.u32 %v4768_v47, 16  ;;  %v7265_v16 = vshll.u32 %v4768_v47, 16  ;;  %v1254_v3 = vrot.slane %v7255_v27, 7 }
 0x236   :  { %v4884_v61 = vor.u32 %v7256_v60, %v1240_v39  ;;  %v7261_v52 = vshrl.u32 %v4770_v49, 16  ;;  %v7268_v20 = vshll.u32 %v4770_v49, 16  ;;  %v4892_v54 = vor.u32 %v7259_v45, %v1247_v56 }
 0x237   :  { %v1261_v50 = vrot.slane %v7258_v44, 7  ;;  %v7264_v51 = vshrl.u32 %v4772_v10, 16  ;;  %v7271_v4 = vshll.u32 %v4772_v10, 16  ;;  %v4900_v39 = vor.u32 %v7262_v38, %v1254_v3 }
 0x238   :  { %v1268_v27 = vrot.slane %v7261_v52, 7  ;;  %v7267_v60 = vshrl.u32 %v4774_v32, 16  ;;  %v7274_v17 = vshll.u32 %v4774_v32, 16  ;;  %v7270_v45 = vshrl.u32 %v4776_v7, 16 }
 0x239   :  { %7571 = vst [vmem:[#allocation59_spill] sm:$0xff] %v4900_v39  ;;  %v4908_v56 = vor.u32 %v7265_v16, %v1261_v50  ;;  %v1275_v44 = vrot.slane %v7264_v51, 7  ;;  %v7277_v24 = vshll.u32 %v4776_v7, 16  ;;  %v7273_v38 = vshrl.u32 %v4778_v57, 16 }
 0x23a   :  { %v4916_v3 = vor.u32 %v7268_v20, %v1268_v27  ;;  %v1282_v52 = vrot.slane %v7267_v60, 7  ;;  %v7280_v21 = vshll.u32 %v4778_v57, 16  ;;  %v1289_v51 = vrot.slane %v7270_v45, 7 }
 0x23b   :  { %7572 = vst [vmem:[#allocation60_spill] sm:$0xff] %v4908_v56  ;;  %v4924_v50 = vor.u32 %v7271_v4, %v1275_v44  ;;  %v7276_v16 = vshrl.u32 %v4780_v43, 16  ;;  %v7283_v41 = vshll.u32 %v4780_v43, 16  ;;  %v1296_v60 = vrot.slane %v7273_v38, 7 }
 0x23c   :  { %7573 = vst [vmem:[#allocation61_spill] sm:$0xff] %v4916_v3  ;;  %v4932_v27 = vor.u32 %v7274_v17, %v1282_v52  ;;  %v7279_v20 = vshrl.u32 %v4782_v23, 16  ;;  %v7286_v31 = vshll.u32 %v4782_v23, 16  ;;  %v4940_v44 = vor.u32 %v7277_v24, %v1289_v51 }
 0x23d   :  { %7574 = vst [vmem:[#allocation62_spill] sm:$0xff] %v4924_v50  ;;  %v1303_v45 = vrot.slane %v7276_v16, 7  ;;  %v7282_v4 = vshrl.u32 %v4784_v59, 16  ;;  %v7289_v25 = vshll.u32 %v4784_v59, 16  ;;  %v4948_v52 = vor.u32 %v7280_v21, %v1296_v60 }
 0x23e   :  { %7575 = vst [vmem:[#allocation63_spill] sm:$0xff] %v4932_v27  ;;  %7576 = vst [vmem:[#allocation64_spill] sm:$0xff] %v4940_v44  ;;  %v1310_v38 = vrot.slane %v7279_v20, 7  ;;  %v7285_v17 = vshrl.u32 %v4786_v37, 16  ;;  %v7292_v46 = vshll.u32 %v4786_v37, 16  ;;  %v7288_v24 = vshrl.u32 %v4788_v55, 16 }
 0x23f   :  { %7577 = vst [vmem:[#allocation65_spill] sm:$0xff] %v4948_v52  ;;  %v4956_v51 = vor.u32 %v7283_v41, %v1303_v45  ;;  %v1317_v16 = vrot.slane %v7282_v4, 7  ;;  %v7294_v29 = vshll.u32 %v4788_v55, 16  ;;  %v7291_v21 = vshrl.u32 %v4790_v15, 16 }
 0x240   :  { %v4964_v60 = vor.u32 %v7286_v31, %v1310_v38  ;;  %v1324_v20 = vrot.slane %v7285_v17, 7  ;;  %v7296_v33 = vshll.u32 %v4790_v15, 16  ;;  %v1331_v4 = vrot.slane %v7288_v24, 7 }
 0x241   :  { %7578 = vst [vmem:[#allocation66_spill] sm:$0xff] %v4956_v51  ;;  %v4972_v45 = vor.u32 %v7289_v25, %v1317_v16  ;;  %v7293_v41 = vshrl.u32 %v4792_v6, 16  ;;  %v7298_v19 = vshll.u32 %v4792_v6, 16  ;;  %v1338_v17 = vrot.slane %v7291_v21, 7 }
 0x242   :  { %7579 = vst [vmem:[#allocation67_spill] sm:$0xff] %v4964_v60  ;;  %v4980_v38 = vor.u32 %v7292_v46, %v1324_v20  ;;  %v7295_v31 = vshrl.u32 %v4794_v53, 16  ;;  %v4988_v16 = vor.u32 %v7294_v29, %v1331_v4  ;;  %v7297_v25 = vshrl.u32 %v4796_v30, 16 }
 0x243   :  { %7580 = vst [vmem:[#allocation68_spill] sm:$0xff] %v4972_v45  ;;  %v1345_v24 = vrot.slane %v7293_v41, 7  ;;  %v4996_v20 = vor.u32 %v7296_v33, %v1338_v17  ;;  %v1419_v8 = vsel %vm4166_vm5, %v4817_v26, 0  ;;  %v1422_v4 = vsel %vm4166_vm5, %v4826_v62, 0 }
 0x244   :  { %7581 = vst [vmem:[#allocation69_spill] sm:$0xff] %v4980_v38  ;;  %7582 = vst [vmem:[#allocation70_spill] sm:$0xff] %v4988_v16  ;;  %v1352_v21 = vrot.slane %v7295_v31, 7  ;;  %v1359_v29 = vrot.slane %v7297_v25, 7  ;;  %v1425_v17 = vsel %vm4166_vm5, %v4830_v40, 0  ;;  %v1428_v31 = vsel %vm4166_vm5, %v4837_v13, 0 }
 0x245   :  { %7583 = vst [vmem:[#allocation71_spill] sm:$0xff] %v4996_v20  ;;  %v5008_v41 = vor.u32 %v7298_v19, %v1345_v24  ;;  %1420 = vst [vmem:[#allocation2 + $0x8] sm:$0xff] %v1419_v8  ;;  %v7586_v33 = vshll.u32 %v4794_v53, 16  ;;  %v1431_v24 = vsel %vm4166_vm5, %v4841_v48, 0  ;;  %v1434_v8 = vsel %vm4166_vm5, %v4847_v34, 0 }
 0x246   :  { %1423 = vst [vmem:[#allocation2 + $0x10] sm:$0xff] %v1422_v4  ;;  %1426 = vst [vmem:[#allocation2 + $0x18] sm:$0xff] %v1425_v17  ;;  %v1437_v4 = vsel %vm4166_vm5, %v4860_v35, 0  ;;  %v1443_v17 = vsel %vm4166_vm5, %v4876_v5, 0  ;;  %v1446_v25 = vsel %vm4166_vm5, %v4884_v61, 0  ;;  %v7592_v46 = vshll.u32 %v4748_v0, 16 }
 0x247   :  { %7585 = vst [vmem:[#allocation44_spill] sm:$0xff] %v5008_v41  ;;  %v5020_v63 = vor.u32 %v7586_v33, %v1352_v21  ;;  %1429 = vst [vmem:[#allocation2 + $0x20] sm:$0xff] %v1428_v31  ;;  %v7588_v31 = vshll.u32 %v4796_v30, 16  ;;  %v1440_v33 = vsel %vm4166_vm5, %v4868_v28, 0  ;;  %v7596_v19 = vshll.u32 %v4756_v11, 16 }
 0x248   :  { %1509 = vst.msk [vmem:[#allocation2 + $0x8] sm:$0xff] %vm1508_vm2, %v4744_v58  ;;  %1510 = vst.msk [vmem:[#allocation2 + $0x10] sm:$0xff] %vm1508_vm2, %v4746_v1 }
 0x249   :  { %7587 = vst [vmem:[#allocation72_spill] sm:$0xff] %v5020_v63  ;;  %v5037_v21 = vor.u32 %v7588_v31, %v1359_v29  ;;  %1432 = vst [vmem:[#allocation2 + $0x28] sm:$0xff] %v1431_v24  ;;  %v1449_v29 = vsel %vm4166_vm5, %v4892_v54, 0  ;;  %v1452_v24 = vsel %vm4166_vm5, %v4900_v39, 0  ;;  %v1464_v31 = vsel %vm4166_vm5, %v4932_v27, 0 }
 0x24a   :  { %1435 = vst [vmem:[#allocation2 + $0x30] sm:$0xff] %v1434_v8  ;;  %1438 = vst [vmem:[#allocation2 + $0x38] sm:$0xff] %v1437_v4  ;;  %v1455_v8 = vsel %vm4166_vm5, %v4908_v56, 0  ;;  %v1458_v4 = vsel %vm4166_vm5, %v4916_v3, 0 }
 0x24b   :  { %7589 = vst [vmem:[#allocation73_spill] sm:$0xff] %v5037_v21  ;;  %1511 = vst.msk [vmem:[#allocation2 + $0x18] sm:$0xff] %vm1508_vm2, %v4748_v0 }
 0x24c   :  { %1512 = vst.msk [vmem:[#allocation2 + $0x20] sm:$0xff] %vm1508_vm2, %v4750_v36  ;;  %1441 = vst [vmem:[#allocation2 + $0x40] sm:$0xff] %v1440_v33  ;;  %v1467_v33 = vsel %vm4166_vm5, %v4940_v44, 0  ;;  %v7618_v44 = vshll.u32 %v4768_v47, 16 }
 0x24d   :  { %1444 = vst [vmem:[#allocation2 + $0x48] sm:$0xff] %v1443_v17  ;;  %1447 = vst [vmem:[#allocation2 + $0x50] sm:$0xff] %v1446_v25  ;;  %v1461_v25 = vsel %vm4166_vm5, %v4924_v50, 0  ;;  %v1470_v17 = vsel %vm4166_vm5, %v4948_v52, 0 }
 0x24e   :  { %1513 = vst.msk [vmem:[#allocation2 + $0x28] sm:$0xff] %vm1508_vm2, %v4752_v14  ;;  %1514 = vst.msk [vmem:[#allocation2 + $0x30] sm:$0xff] %vm1508_vm2, %v4754_v22 }
 0x24f   :  { %1515 = vst.msk [vmem:[#allocation2 + $0x38] sm:$0xff] %vm1508_vm2, %v4756_v11  ;;  %1450 = vst [vmem:[#allocation2 + $0x58] sm:$0xff] %v1449_v29  ;;  %v1473_v29 = vsel %vm4166_vm5, %v4956_v51, 0 }
 0x250   :  { %1453 = vst [vmem:[#allocation2 + $0x60] sm:$0xff] %v1452_v24  ;;  %1456 = vst [vmem:[#allocation2 + $0x68] sm:$0xff] %v1455_v8  ;;  %v1476_v24 = vsel %vm4166_vm5, %v4964_v60, 0  ;;  %v1479_v8 = vsel %vm4166_vm5, %v4972_v45, 0  ;;  %v7606_v60 = vshrl.u32 %v4752_v14, 16 }
 0x251   :  { %1459 = vst [vmem:[#allocation2 + $0x70] sm:$0xff] %v1458_v4  ;;  %1516 = vst.msk [vmem:[#allocation2 + $0x40] sm:$0xff] %vm1508_vm2, %v4758_v18  ;;  %v1482_v4 = vsel %vm4166_vm5, %v4980_v38, 0 }
 0x252   :  { %1517 = vst.msk [vmem:[#allocation2 + $0x48] sm:$0xff] %vm1508_vm2, %v4760_v2  ;;  %1518 = vst.msk [vmem:[#allocation2 + $0x50] sm:$0xff] %vm1508_vm2, %v4762_v9 }
 0x253   :  { %1462 = vst [vmem:[#allocation2 + $0x78] sm:$0xff] %v1461_v25  ;;  %1465 = vst [vmem:[#allocation2 + $0x88] sm:$0xff] %v1464_v31  ;;  %v1485_v25 = vsel %vm4166_vm5, %v4988_v16, 0  ;;  %v1488_v31 = vsel %vm4166_vm5, %v4996_v20, 0  ;;  %v7599_v20 = vshrl.u32 %v4746_v1, 16 }
 0x254   :  { %1468 = vst [vmem:[#allocation2 + $0x90] sm:$0xff] %v1467_v33  ;;  %1471 = vst [vmem:[#allocation2 + $0x98] sm:$0xff] %v1470_v17  ;;  %v1491_v33 = vsel %vm4166_vm5, %v5008_v41, 0  ;;  %v1494_v17 = vsel %vm4166_vm5, %v5020_v63, 0  ;;  %v7597_v63 = vshrl.u32 %v4744_v58, 16 }
 0x255   :  { %1519 = vst.msk [vmem:[#allocation2 + $0x58] sm:$0xff] %vm1508_vm2, %v4764_v12  ;;  %1520 = vst.msk [vmem:[#allocation2 + $0x60] sm:$0xff] %vm1508_vm2, %v4766_v42  ;;  %v5283_v39 = vld [vmem:[#allocation2 + $0x30] sm:$0xff] }
 0x256   :  { %1521 = vst.msk [vmem:[#allocation2 + $0x68] sm:$0xff] %vm1508_vm2, %v4768_v47  ;;  %1522 = vst.msk [vmem:[#allocation2 + $0x70] sm:$0xff] %vm1508_vm2, %v4770_v49 }
 0x257   :  { %1474 = vst [vmem:[#allocation2 + $0xa0] sm:$0xff] %v1473_v29  ;;  %1477 = vst [vmem:[#allocation2 + $0xa8] sm:$0xff] %v1476_v24  ;;  %v1497_v29 = vsel %vm4166_vm5, %v5037_v21, 0  ;;  %v7590_v24 = vshll.u32 %v4744_v58, 16  ;;  %v1551_v21 = vrot.slane %v7596_v19, 1  ;;  %v7604_v19 = vshrl.u32 %v4750_v36, 16 }
 0x258   :  { %1480 = vst [vmem:[#allocation2 + $0xb0] sm:$0xff] %v1479_v8  ;;  %1483 = vst [vmem:[#allocation2 + $0xb8] sm:$0xff] %v1482_v4  ;;  %v7591_v4 = vshll.u32 %v4746_v1, 16 }
 0x259   :  { %1523 = vst.msk [vmem:[#allocation2 + $0x78] sm:$0xff] %vm1508_vm2, %v4772_v10  ;;  %1524 = vst.msk [vmem:[#allocation2 + $0x88] sm:$0xff] %vm1508_vm2, %v4774_v32  ;;  %v1539_v8 = vrot.slane %v7590_v24, 1  ;;  %v7594_v24 = vshll.u32 %v4752_v14, 16  ;;  %v5285_v14 = vld [vmem:[#allocation2 + $0x38] sm:$0xff] }
 0x25a   :  { %1525 = vst.msk [vmem:[#allocation2 + $0x90] sm:$0xff] %vm1508_vm2, %v4776_v7  ;;  %1526 = vst.msk [vmem:[#allocation2 + $0x98] sm:$0xff] %vm1508_vm2, %v4778_v57 }
 0x25b   :  { %1486 = vst [vmem:[#allocation2 + $0xc0] sm:$0xff] %v1485_v25  ;;  %1489 = vst [vmem:[#allocation2 + $0xc8] sm:$0xff] %v1488_v31  ;;  %v1541_v25 = vrot.slane %v7591_v4, 1  ;;  %v1543_v31 = vrot.slane %v7592_v46, 1  ;;  %v1547_v4 = vrot.slane %v7594_v24, 1  ;;  %v5165_v41 = vor.u32 %v1539_v8, %v7597_v63 }
 0x25c   :  { %1492 = vst [vmem:[#allocation2 + $0xd0] sm:$0xff] %v1491_v33  ;;  %1495 = vst [vmem:[#allocation2 + $0xd8] sm:$0xff] %v1494_v17  ;;  %v7593_v33 = vshll.u32 %v4750_v36, 16  ;;  %v7608_v63 = vshrl.u32 %v4754_v22, 16  ;;  %v5307_v36 = vld [vmem:[#allocation2 + $0x50] sm:$0xff] }
 0x25d   :  { %1527 = vst.msk [vmem:[#allocation2 + $0xa0] sm:$0xff] %vm1508_vm2, %v4780_v43  ;;  %1528 = vst.msk [vmem:[#allocation2 + $0xa8] sm:$0xff] %vm1508_vm2, %v4782_v23  ;;  %v5169_v16 = vor.u32 %v1541_v25, %v7599_v20  ;;  %v5183_v51 = vor.u32 %v1547_v4, %v7606_v60  ;;  %v7610_v20 = vshrl.u32 %v4756_v11, 16  ;;  %v7616_v60 = vshll.u32 %v4764_v12, 16 }
 0x25e   :  { %1529 = vst.msk [vmem:[#allocation2 + $0xb0] sm:$0xff] %vm1508_vm2, %v4784_v59  ;;  %1530 = vst.msk [vmem:[#allocation2 + $0xb8] sm:$0xff] %vm1508_vm2, %v4786_v37  ;;  %v1545_v17 = vrot.slane %v7593_v33, 1  ;;  %v7601_v33 = vshrl.u32 %v4748_v0, 16 }
 0x25f   :  { %1498 = vst [vmem:[#allocation2 + $0xe0] sm:$0xff] %v1497_v29  ;;  %1531 = vst.msk [vmem:[#allocation2 + $0xc0] sm:$0xff] %vm1508_vm2, %v4788_v55  ;;  %v7595_v29 = vshll.u32 %v4754_v22, 16  ;;  %v5191_v25 = vor.u32 %v1551_v21, %v7610_v20  ;;  %v1559_v4 = vrot.slane %v7616_v60, 1  ;;  %v1563_v21 = vrot.slane %v7618_v44, 1 }
 0x260   :  { %1532 = vst.msk [vmem:[#allocation2 + $0xc8] sm:$0xff] %vm1508_vm2, %v4790_v15  ;;  %1533 = vst.msk [vmem:[#allocation2 + $0xd0] sm:$0xff] %vm1508_vm2, %v4792_v6  ;;  %v5173_v24 = vor.u32 %v1543_v31, %v7601_v33  ;;  %v5179_v45 = vor.u32 %v1545_v17, %v7604_v19  ;;  %v7612_v31 = vshrl.u32 %v4758_v18, 16  ;;  %v7615_v19 = vshll.u32 %v4762_v9, 16 }
 0x261   :  { %1534 = vst.msk [vmem:[#allocation2 + $0xd8] sm:$0xff] %vm1508_vm2, %v4794_v53  ;;  %v1549_v46 = vrot.slane %v7595_v29, 1  ;;  %1535 = vst.msk [vmem:[#allocation2 + $0xe0] sm:$0xff] %vm1508_vm2, %v4796_v30  ;;  %v7603_v29 = vshll.u32 %v4758_v18, 16  ;;  %v7619_v20 = vshll.u32 %v4770_v49, 16  ;;  %v7625_v60 = vshrl.u32 %v4764_v12, 16 }
 0x262   :  { %7598 = vst [vmem:[#allocation74_spill] sm:$0xff] %v5165_v41  ;;  %7600 = vst [vmem:[#allocation75_spill] sm:$0xff] %v5169_v16  ;;  %v1557_v52 = vrot.slane %v7615_v19, 1  ;;  %v7623_v19 = vshrl.u32 %v4762_v9, 16  ;;  %v7627_v44 = vshll.u32 %v4774_v32, 16  ;;  %v7646_v9 = vshrl.u32 %v4778_v57, 16 }
 0x263   :  { %7602 = vst [vmem:[#allocation76_spill] sm:$0xff] %v5173_v24  ;;  %v1553_v38 = vrot.slane %v7603_v29, 1  ;;  %7605 = vst [vmem:[#allocation77_spill] sm:$0xff] %v5179_v45  ;;  %v5187_v8 = vor.u32 %v1549_v46, %v7608_v63  ;;  %v7614_v29 = vshll.u32 %v4760_v2, 16  ;;  %v7617_v46 = vshll.u32 %v4766_v42, 16  ;;  %v5365_v1 = vld [vmem:[#allocation2 + $0x98] sm:$0xff] }
 0x264   :  { %7607 = vst [vmem:[#allocation78_spill] sm:$0xff] %v5183_v51  ;;  %7611 = vst [vmem:[#allocation80_spill] sm:$0xff] %v5191_v25  ;;  %v1565_v18 = vrot.slane %v7619_v20, 1  ;;  %v5217_v50 = vor.u32 %v1557_v52, %v7623_v19  ;;  %v1569_v11 = vrot.slane %v7627_v44, 1  ;;  %v7628_v20 = vshrl.u32 %v4766_v42, 16  ;;  %v5265_v42 = vld [vmem:[#allocation2 + $0x20] sm:$0xff] }
 0x265   :  { %7609 = vst [vmem:[#allocation79_spill] sm:$0xff] %v5187_v8  ;;  %v5195_v33 = vor.u32 %v1553_v38, %v7612_v31  ;;  %v1555_v17 = vrot.slane %v7614_v29, 1  ;;  %v1561_v63 = vrot.slane %v7617_v46, 1  ;;  %v7620_v38 = vshll.u32 %v4772_v10, 16 }
 0x266   :  { %v7621_v29 = vshrl.u32 %v4760_v2, 16  ;;  %7624 = vst [vmem:[#allocation83_spill] sm:$0xff] %v5217_v50  ;;  %v5221_v46 = vor.u32 %v1559_v4, %v7625_v60  ;;  %v7634_v52 = vshrl.u32 %v4772_v10, 16  ;;  %v7635_v4 = vshrl.u32 %v4774_v32, 16 }
 0x267   :  { %7613 = vst [vmem:[#allocation81_spill] sm:$0xff] %v5195_v33  ;;  %v1567_v31 = vrot.slane %v7620_v38, 1  ;;  %v5227_v22 = vor.u32 %v1561_v63, %v7628_v20  ;;  %v7630_v38 = vshrl.u32 %v4768_v47, 16  ;;  %v7637_v44 = vshll.u32 %v4776_v7, 16 }
 0x268   :  { %v5213_v27 = vor.u32 %v1555_v17, %v7621_v29  ;;  %7626 = vst [vmem:[#allocation84_spill] sm:$0xff] %v5221_v46  ;;  %v7632_v17 = vshrl.u32 %v4770_v49, 16  ;;  %v5243_v60 = vor.u32 %v1569_v11, %v7635_v4  ;;  %v7638_v20 = vshll.u32 %v4778_v57, 16  ;;  %v5251_v49 = vld [vmem:[#allocation2 + $0x8] sm:$0xff]  ;;  %v5303_v57 = vld [vmem:[#allocation2 + $0x40] sm:$0xff] }
 0x269   :  { %7629 = vst [vmem:[#allocation85_spill] sm:$0xff] %v5227_v22  ;;  %v5231_v2 = vor.u32 %v1563_v21, %v7630_v38  ;;  %v5239_v19 = vor.u32 %v1567_v31, %v7634_v52  ;;  %v1571_v63 = vrot.slane %v7637_v44, 1  ;;  %v7639_v21 = vshll.u32 %v4780_v43, 16 }
 0x26a   :  { %7622 = vst [vmem:[#allocation82_spill] sm:$0xff] %v5213_v27  ;;  %v5235_v29 = vor.u32 %v1565_v18, %v7632_v17  ;;  %7636 = vst [vmem:[#allocation88_spill] sm:$0xff] %v5243_v60  ;;  %v1573_v47 = vrot.slane %v7638_v20, 1  ;;  %v5253_v18 = vld [vmem:[#allocation2 + $0x10] sm:$0xff]  ;;  %v7640_v31 = vshll.u32 %v4782_v23, 16  ;;  %v7641_v52 = vshll.u32 %v4784_v59, 16 }
 0x26b   :  { %7631 = vst [vmem:[#allocation86_spill] sm:$0xff] %v5231_v2  ;;  %v1575_v38 = vrot.slane %v7639_v21, 1  ;;  %v7642_v4 = vshll.u32 %v4786_v37, 16  ;;  %v7643_v44 = vshll.u32 %v4788_v55, 16  ;;  %v5263_v20 = vld [vmem:[#allocation2 + $0x18] sm:$0xff]  ;;  %v7644_v21 = vshrl.u32 %v4776_v7, 16 }
 0x26c   :  { %7633 = vst [vmem:[#allocation87_spill] sm:$0xff] %v5235_v29  ;;  %v1577_v17 = vrot.slane %v7640_v31, 1  ;;  %v1579_v11 = vrot.slane %v7641_v52, 1  ;;  %v5273_v31 = vor.u32 %v1573_v47, %v7646_v9  ;;  %v7647_v52 = vshrl.u32 %v4780_v43, 16  ;;  %v5305_v7 = vld [vmem:[#allocation2 + $0x48] sm:$0xff] }
 0x26d   :  { %v1581_v32 = vrot.slane %v7642_v4, 1  ;;  %v1583_v10 = vrot.slane %v7643_v44, 1  ;;  %v5269_v12 = vor.u32 %v1571_v63, %v7644_v21  ;;  %v7648_v4 = vshll.u32 %v4790_v15, 16  ;;  %v5281_v44 = vld [vmem:[#allocation2 + $0x28] sm:$0xff] }
 0x26e   :  { %v5277_v3 = vor.u32 %v1575_v38, %v7647_v52  ;;  %v7649_v63 = vshrl.u32 %v4782_v23, 16  ;;  %v7650_v9 = vshrl.u32 %v4784_v59, 16  ;;  %v7651_v38 = vshrl.u32 %v4786_v37, 16  ;;  %v5321_v37 = vld [vmem:[#allocation2 + $0x60] sm:$0xff]  ;;  %v5323_v59 = vld [vmem:[#allocation2 + $0x68] sm:$0xff]  ;;  %v5343_v23 = vld [vmem:[#allocation2 + $0x78] sm:$0xff] }
 0x26f   :  { %7645 = vst [vmem:[#allocation89_spill] sm:$0xff] %v5269_v12  ;;  %v1585_v56 = vrot.slane %v7648_v4, 1  ;;  %v7652_v4 = vshrl.u32 %v4788_v55, 16  ;;  %v7656_v55 = vshll.u32 %v4796_v30, 16 }
 0x270   :  { %v5289_v21 = vor.u32 %v1577_v17, %v7649_v63  ;;  %v5293_v47 = vor.u32 %v1579_v11, %v7650_v9  ;;  %v5297_v52 = vor.u32 %v1581_v32, %v7651_v38  ;;  %v7653_v17 = vshrl.u32 %v4790_v15, 16  ;;  %v7715_v15 = vld [vmem:[#allocation53_spill] sm:$0xff] }
 0x271   :  { %v5301_v43 = vor.u32 %v1583_v10, %v7652_v4  ;;  %v7654_v11 = vshll.u32 %v4792_v6, 16  ;;  %v7655_v32 = vshll.u32 %v4794_v53, 16  ;;  %v1591_v10 = vrot.slane %v7656_v55, 1  ;;  %v5319_v4 = vld [vmem:[#allocation2 + $0x58] sm:$0xff] }
 0x272   :  { %v5311_v63 = vor.u32 %v1585_v56, %v7653_v17  ;;  %v1633_v56 = vsel %vm4313_vm8, %v5165_v41, %v5251_v49  ;;  %v1636_v17 = vsel %vm4313_vm8, %v5169_v16, %v5253_v18  ;;  %v1639_v55 = vsel %vm4313_vm8, %v5173_v24, %v5263_v20  ;;  %v5345_v49 = vld [vmem:[#allocation2 + $0x88] sm:$0xff] }
 0x273   :  { %v1587_v9 = vrot.slane %v7654_v11, 1  ;;  %v1589_v38 = vrot.slane %v7655_v32, 1  ;;  %v1642_v11 = vsel %vm4313_vm8, %v5179_v45, %v5265_v42  ;;  %v5341_v32 = vld [vmem:[#allocation2 + $0x70] sm:$0xff]  ;;  %v7658_v41 = vshrl.u32 %v4792_v6, 16  ;;  %v5367_v6 = vld [vmem:[#allocation2 + $0xa0] sm:$0xff] }
 0x274   :  { %v7659_v18 = vshrl.u32 %v4794_v53, 16  ;;  %v7660_v20 = vshrl.u32 %v4796_v30, 16  ;;  %v1645_v42 = vsel %vm4313_vm8, %v5183_v51, %v5281_v44  ;;  %v5363_v45 = vld [vmem:[#allocation2 + $0x90] sm:$0xff]  ;;  %v1654_v44 = vsel %vm4313_vm8, %v5195_v33, %v5303_v57  ;;  %v5409_v33 = vld [vmem:[#allocation2 + $0xc8] sm:$0xff] }
 0x275   :  { %v5349_v0 = vor.u32 %v1587_v9, %v7658_v41  ;;  %v1648_v41 = vsel %vm4313_vm8, %v5187_v8, %v5283_v39  ;;  %v1651_v9 = vsel %vm4313_vm8, %v5191_v25, %v5285_v14  ;;  %v5389_v39 = vld [vmem:[#allocation2 + $0xb8] sm:$0xff]  ;;  %v1660_v14 = vsel %vm4313_vm8, %v5217_v50, %v5307_v36  ;;  %v5411_v36 = vld [vmem:[#allocation2 + $0xd0] sm:$0xff] }
 0x276   :  { %v5353_v16 = vor.u32 %v1589_v38, %v7659_v18  ;;  %v5357_v24 = vor.u32 %v1591_v10, %v7660_v20  ;;  %v1657_v38 = vsel %vm4313_vm8, %v5213_v27, %v5305_v7  ;;  %v5385_v10 = vld [vmem:[#allocation2 + $0xa8] sm:$0xff]  ;;  %v5387_v18 = vld [vmem:[#allocation2 + $0xb0] sm:$0xff]  ;;  %v1663_v57 = vsel %vm4313_vm8, %v5221_v46, %v5319_v4  ;;  %v5407_v27 = vld [vmem:[#allocation2 + $0xc0] sm:$0xff] }
 0x277   :  { %v1666_v7 = vsel %vm4313_vm8, %v5227_v22, %v5321_v37  ;;  %v1669_v20 = vsel %vm4313_vm8, %v5231_v2, %v5323_v59  ;;  %v1672_v4 = vsel %vm4313_vm8, %v5235_v29, %v5341_v32  ;;  %v1678_v59 = vsel %vm4313_vm8, %v5243_v60, %v5345_v49  ;;  %v5429_v22 = vld [vmem:[#allocation2 + $0xd8] sm:$0xff]  ;;  %v5431_v46 = vld [vmem:[#allocation2 + $0xe0] sm:$0xff] }
 0x278   :  { %v1681_v2 = vsel %vm4313_vm8, %v5269_v12, %v5363_v45  ;;  %v7661_v12 = vld [vmem:[#allocation33_spill] sm:$0xff]  ;;  %v7663_v29 = vld [vmem:[#allocation35_spill] sm:$0xff]  ;;  %v1743_v45 = vsel %vm4367_vm10, %v4817_v26, 0  ;;  %v1746_v32 = vsel %vm4367_vm10, %v4826_v62, %v1633_v56  ;;  %v1749_v8 = vsel %vm4367_vm10, %v4830_v40, %v1636_v17  ;;  %v7680_v37 = vld [vmem:[#allocation20_spill] sm:$0xff] }
 0x279   :  { %v7662_v60 = vmax.f32 %v7661_v12, 0.0  ;;  %v7664_v50 = vmax.f32 %v7663_v29, 0.0  ;;  %1744 = vst [vmem:[#allocation2] sm:$0xff] %v1743_v45  ;;  %v1752_v12 = vsel %vm4367_vm10, %v4837_v13, %v1639_v55  ;;  %1747 = vst [vmem:[#allocation2 + $0x8] sm:$0xff] %v1746_v32  ;;  %v1761_v56 = vsel %vm4367_vm10, %v4860_v35, %v1648_v41  ;;  %v7669_v41 = vld [vmem:[#allocation16_spill] sm:$0xff]  ;;  %v7717_v25 = vld [vmem:[#allocation55_spill] sm:$0xff] }
 0x27a   :  { %1750 = vst [vmem:[#allocation2 + $0x10] sm:$0xff] %v1749_v8  ;;  %1753 = vst [vmem:[#allocation2 + $0x18] sm:$0xff] %v1752_v12  ;;  %v1764_v17 = vsel %vm4367_vm10, %v4868_v28, %v1651_v9  ;;  %v1767_v8 = vsel %vm4367_vm10, %v4876_v5, %v1654_v44  ;;  %v1770_v55 = vsel %vm4367_vm10, %v4884_v61, %v1657_v38  ;;  %v7670_v9 = vld [vmem:[#allocation18_spill] sm:$0xff]  ;;  %v7671_v38 = vld [vmem:[#allocation59_spill] sm:$0xff] }
 0x27b   :  { %v5477_v49 = vpack.c.bf16 %v7664_v50, %v7662_v60  ;;  %v1755_v50 = vsel %vm4367_vm10, %v4841_v48, %v1642_v11  ;;  %v1758_v60 = vsel %vm4367_vm10, %v4847_v34, %v1645_v42  ;;  %1839 = vst.msk [vmem:[#allocation2] sm:$0xff] %vm1838_vm7, %v4744_v58  ;;  %1762 = vst [vmem:[#allocation2 + $0x30] sm:$0xff] %v1761_v56  ;;  %v7667_v42 = vld [vmem:[#allocation38_spill] sm:$0xff]  ;;  %v7668_v58 = vld [vmem:[#allocation19_spill] sm:$0xff] }
 0x27c   :  { %1756 = vst [vmem:[#allocation2 + $0x20] sm:$0xff] %v1755_v50  ;;  %1759 = vst [vmem:[#allocation2 + $0x28] sm:$0xff] %v1758_v60  ;;  %v1773_v11 = vsel %vm4367_vm10, %v4892_v54, %v1660_v14  ;;  %v1776_v14 = vsel %vm4367_vm10, %v7671_v38, %v1663_v57  ;;  %v7672_v32 = vld [vmem:[#allocation60_spill] sm:$0xff]  ;;  %v7673_v12 = vld [vmem:[#allocation61_spill] sm:$0xff] }
 0x27d   :  { %7665 = vst [vmem:[#allocation17_spill] sm:$0xff] %v5477_v49  ;;  %v7405_v29 = vshrl.u32 %v5477_v49, 16  ;;  %v7406_v26 = vshll.u32 %v5477_v49, 16  ;;  %1840 = vst.msk [vmem:[#allocation2 + $0x8] sm:$0xff] %vm1838_vm7, %v7667_v42  ;;  %v1779_v45 = vsel %vm4367_vm10, %v7672_v32, %v1666_v7  ;;  %v1782_v50 = vsel %vm4367_vm10, %v7673_v12, %v1669_v20  ;;  %v7674_v60 = vld [vmem:[#allocation21_spill] sm:$0xff]  ;;  %v7675_v56 = vld [vmem:[#allocation23_spill] sm:$0xff] }
 0x27e   :  { %1841 = vst.msk [vmem:[#allocation2 + $0x10] sm:$0xff] %vm1838_vm7, %v7668_v58  ;;  %1842 = vst.msk [vmem:[#allocation2 + $0x18] sm:$0xff] %vm1838_vm7, %v7669_v41 }
 0x27f   :  { %1843 = vst.msk [vmem:[#allocation2 + $0x20] sm:$0xff] %vm1838_vm7, %v7670_v9  ;;  %v1727_v44 = vrot.slane %v7405_v29, 7  ;;  %1765 = vst [vmem:[#allocation2 + $0x38] sm:$0xff] %v1764_v17  ;;  %v7676_v17 = vld [vmem:[#allocation62_spill] sm:$0xff] }
 0x280   :  { %1768 = vst [vmem:[#allocation2 + $0x40] sm:$0xff] %v1767_v8  ;;  %1771 = vst [vmem:[#allocation2 + $0x48] sm:$0xff] %v1770_v55  ;;  %v1785_v57 = vsel %vm4367_vm10, %v7676_v17, %v1672_v4  ;;  %v7677_v8 = vld [vmem:[#allocation63_spill] sm:$0xff]  ;;  %v7678_v55 = vld [vmem:[#allocation64_spill] sm:$0xff] }
 0x281   :  { %1774 = vst [vmem:[#allocation2 + $0x50] sm:$0xff] %v1773_v11  ;;  %1844 = vst.msk [vmem:[#allocation2 + $0x28] sm:$0xff] %vm1838_vm7, %v7674_v60  ;;  %v1791_v7 = vsel %vm4367_vm10, %v7677_v8, 0  ;;  %v1794_v20 = vsel %vm4367_vm10, %v7678_v55, %v1678_v59  ;;  %v7679_v11 = vld [vmem:[#allocation65_spill] sm:$0xff]  ;;  %v7683_v4 = vld [vmem:[#allocation27_spill] sm:$0xff] }
 0x282   :  { %1845 = vst.msk [vmem:[#allocation2 + $0x30] sm:$0xff] %vm1838_vm7, %v7675_v56  ;;  %1777 = vst [vmem:[#allocation2 + $0x58] sm:$0xff] %v1776_v14  ;;  %v1797_v29 = vsel %vm4367_vm10, %v7679_v11, %v1681_v2  ;;  %v7681_v14 = vld [vmem:[#allocation22_spill] sm:$0xff]  ;;  %v7684_v2 = vsel %vm4313_vm8, %v5273_v31, %v5365_v1 }
 0x283   :  { %1780 = vst [vmem:[#allocation2 + $0x60] sm:$0xff] %v1779_v45  ;;  %1783 = vst [vmem:[#allocation2 + $0x68] sm:$0xff] %v1782_v50  ;;  %v7682_v45 = vld [vmem:[#allocation25_spill] sm:$0xff]  ;;  %v5561_v50 = vor.u32 %v7406_v26, %v1727_v44  ;;  %v7685_v59 = vld [vmem:[#allocation66_spill] sm:$0xff]  ;;  %v7695_v26 = vsel %vm4313_vm8, %v5297_v52, %v5389_v39 }
 0x284   :  { %1846 = vst.msk [vmem:[#allocation2 + $0x38] sm:$0xff] %vm1838_vm7, %v7680_v37  ;;  %1847 = vst.msk [vmem:[#allocation2 + $0x40] sm:$0xff] %vm1838_vm7, %v7681_v14  ;;  %v1800_v8 = vsel %vm4367_vm10, %v7685_v59, %v7684_v2  ;;  %v7687_v44 = vld [vmem:[#allocation67_spill] sm:$0xff]  ;;  %v7691_v2 = vld [vmem:[#allocation29_spill] sm:$0xff] }
 0x285   :  { %1848 = vst.msk [vmem:[#allocation2 + $0x48] sm:$0xff] %vm1838_vm7, %v7682_v45  ;;  %1849 = vst.msk [vmem:[#allocation2 + $0x50] sm:$0xff] %vm1838_vm7, %v7683_v4  ;;  %v7686_v4 = vsel %vm4313_vm8, %v5277_v3, %v5367_v6  ;;  %v7692_v6 = vld [vmem:[#allocation32_spill] sm:$0xff] }
 0x286   :  { %1786 = vst [vmem:[#allocation2 + $0x70] sm:$0xff] %v1785_v57  ;;  %1792 = vst [vmem:[#allocation2 + $0x80] sm:$0xff] %v1791_v7  ;;  %v1803_v57 = vsel %vm4367_vm10, %v7687_v44, %v7686_v4  ;;  %v7689_v7 = vld [vmem:[#allocation68_spill] sm:$0xff]  ;;  %v7694_v4 = vld [vmem:[#allocation69_spill] sm:$0xff] }
 0x287   :  { %1795 = vst [vmem:[#allocation2 + $0x88] sm:$0xff] %v1794_v20  ;;  %1798 = vst [vmem:[#allocation2 + $0x90] sm:$0xff] %v1797_v29  ;;  %v7688_v29 = vsel %vm4313_vm8, %v5289_v21, %v5385_v10  ;;  %v7690_v20 = vld [vmem:[#allocation24_spill] sm:$0xff]  ;;  %v7693_v10 = vsel %vm4313_vm8, %v5293_v47, %v5387_v18 }
 0x288   :  { %v1806_v1 = vsel %vm4367_vm10, %v7689_v7, %v7688_v29  ;;  %1850 = vst.msk [vmem:[#allocation2 + $0x58] sm:$0xff] %vm1838_vm7, %v7690_v20  ;;  %1851 = vst.msk [vmem:[#allocation2 + $0x60] sm:$0xff] %vm1838_vm7, %v7691_v2  ;;  %v1809_v29 = vsel %vm4367_vm10, %v7694_v4, %v7693_v10  ;;  %v7696_v2 = vld [vmem:[#allocation70_spill] sm:$0xff]  ;;  %v7699_v10 = vsel %vm4313_vm8, %v5311_v63, %v5409_v33 }
 0x289   :  { %1852 = vst.msk [vmem:[#allocation2 + $0x68] sm:$0xff] %vm1838_vm7, %v7692_v6  ;;  %1801 = vst [vmem:[#allocation2 + $0x98] sm:$0xff] %v1800_v8  ;;  %v1812_v8 = vsel %vm4367_vm10, %v7696_v2, %v7695_v26  ;;  %v7700_v6 = vld [vmem:[#allocation44_spill] sm:$0xff]  ;;  %v7701_v4 = vld [vmem:[#allocation34_spill] sm:$0xff]  ;;  %v7705_v33 = vsel %vm4313_vm8, %v5239_v19, %v5343_v23  ;;  %v7708_v23 = vsel %vm4313_vm8, %v5353_v16, %v5429_v22 }
 0x28a   :  { %1804 = vst [vmem:[#allocation2 + $0xa0] sm:$0xff] %v1803_v57  ;;  %1807 = vst [vmem:[#allocation2 + $0xa8] sm:$0xff] %v1806_v1  ;;  %v7697_v57 = vsel %vm4313_vm8, %v5301_v43, %v5407_v27  ;;  %v7698_v1 = vld [vmem:[#allocation71_spill] sm:$0xff]  ;;  %v1818_v39 = vsel %vm4367_vm10, %v7700_v6, %v7699_v10  ;;  %v7702_v26 = vld [vmem:[#allocation37_spill] sm:$0xff]  ;;  %v7706_v10 = vsel %vm4313_vm8, %v5349_v0, %v5411_v36 }
 0x28b   :  { %v1815_v18 = vsel %vm4367_vm10, %v7698_v1, %v7697_v57  ;;  %1853 = vst.msk [vmem:[#allocation2 + $0x70] sm:$0xff] %vm1838_vm7, %v7701_v4  ;;  %1855 = vst.msk [vmem:[#allocation2 + $0x80] sm:$0xff] %vm1838_vm7, %v7702_v26  ;;  %v7703_v27 = vld [vmem:[#allocation39_spill] sm:$0xff]  ;;  %v7704_v2 = vld [vmem:[#allocation49_spill] sm:$0xff]  ;;  %v1788_v57 = vsel %vm4367_vm10, %v5561_v50, %v7705_v33 }
 0x28c   :  { %1856 = vst.msk [vmem:[#allocation2 + $0x88] sm:$0xff] %vm1838_vm7, %v7703_v27  ;;  %1857 = vst.msk [vmem:[#allocation2 + $0x90] sm:$0xff] %vm1838_vm7, %v7704_v2  ;;  %v7707_v26 = vld [vmem:[#allocation72_spill] sm:$0xff]  ;;  %v7709_v27 = vld [vmem:[#allocation73_spill] sm:$0xff] }
 0x28d   :  { %1810 = vst [vmem:[#allocation2 + $0xb0] sm:$0xff] %v1809_v29  ;;  %1813 = vst [vmem:[#allocation2 + $0xb8] sm:$0xff] %v1812_v8  ;;  %v1821_v2 = vsel %vm4367_vm10, %v7707_v26, %v7706_v10  ;;  %v1824_v29 = vsel %vm4367_vm10, %v7709_v27, %v7708_v23  ;;  %v7710_v8 = vsel %vm4313_vm8, %v5357_v24, %v5431_v46  ;;  %v7713_v33 = vld [vmem:[#allocation51_spill] sm:$0xff]  ;;  %v7714_v22 = vld [vmem:[#allocation52_spill] sm:$0xff]  ;;  %v7719_v23 = vshll.u32 %v5477_v49, 16 }
 0x28e   :  { %1816 = vst [vmem:[#allocation2 + $0xc0] sm:$0xff] %v1815_v18  ;;  %1819 = vst [vmem:[#allocation2 + $0xc8] sm:$0xff] %v1818_v39  ;;  %v7711_v18 = vld [vmem:[#allocation45_spill] sm:$0xff]  ;;  %v7712_v39 = vld [vmem:[#allocation50_spill] sm:$0xff] }
 0x28f   :  { %v1827_v36 = vsel %vm4367_vm10, %v7711_v18, %v7710_v8  ;;  %1858 = vst.msk [vmem:[#allocation2 + $0x98] sm:$0xff] %vm1838_vm7, %v7712_v39  ;;  %1859 = vst.msk [vmem:[#allocation2 + $0xa0] sm:$0xff] %vm1838_vm7, %v7713_v33  ;;  %v7716_v46 = vld [vmem:[#allocation54_spill] sm:$0xff]  ;;  %v7718_v10 = vld [vmem:[#allocation56_spill] sm:$0xff]  ;;  %v1871_v8 = vrot.slane %v7719_v23, 1 }
 0x290   :  { %1860 = vst.msk [vmem:[#allocation2 + $0xa8] sm:$0xff] %vm1838_vm7, %v7714_v22  ;;  %1789 = vst [vmem:[#allocation2 + $0x78] sm:$0xff] %v1788_v57  ;;  %v1879_v22 = vld [vmem:[#allocation2] sm:$0xff]  ;;  %v7721_v57 = vld [vmem:[#allocation43_spill] sm:$0xff] }
 0x291   :  { %1822 = vst [vmem:[#allocation2 + $0xd0] sm:$0xff] %v1821_v2  ;;  %1825 = vst [vmem:[#allocation2 + $0xd8] sm:$0xff] %v1824_v29  ;;  %v7720_v2 = vld [vmem:[#allocation41_spill] sm:$0xff]  ;;  %v7722_v29 = vshrl.u32 %v7721_v57, 16  ;;  %v1885_v33 = vld [vmem:[#allocation2 + $0x10] sm:$0xff] }
 0x292   :  { %1828 = vst [vmem:[#allocation2 + $0xe0] sm:$0xff] %v1827_v36  ;;  %1861 = vst.msk [vmem:[#allocation2 + $0xb0] sm:$0xff] %vm1838_vm7, %v7715_v15  ;;  %v7723_v36 = vld [vmem:[#allocation31_spill] sm:$0xff]  ;;  %v1882_v15 = vld [vmem:[#allocation2 + $0x8] sm:$0xff] }
 0x293   :  { %1862 = vst.msk [vmem:[#allocation2 + $0xb8] sm:$0xff] %vm1838_vm7, %v7716_v46  ;;  %1863 = vst.msk [vmem:[#allocation2 + $0xc0] sm:$0xff] %vm1838_vm7, %v7717_v25  ;;  %v7725_v25 = vld [vmem:[#allocation74_spill] sm:$0xff]  ;;  %v1888_v39 = vld [vmem:[#allocation2 + $0x18] sm:$0xff] }
 0x294   :  { %1864 = vst.msk [vmem:[#allocation2 + $0xc8] sm:$0xff] %vm1838_vm7, %v7718_v10  ;;  %1854 = vst.msk [vmem:[#allocation2 + $0x78] sm:$0xff] %vm1838_vm7, %v5477_v49  ;;  %v5692_v10 = vor.u32 %v7723_v36, %v7722_v29  ;;  %v1880_v46 = vsel %vm4533_vm14, %v7725_v25, %v1879_v22  ;;  %v7730_v27 = vld [vmem:[#allocation76_spill] sm:$0xff]  ;;  %v7731_v29 = vld [vmem:[#allocation77_spill] sm:$0xff] }
 0x295   :  { %1865 = vst.msk [vmem:[#allocation2 + $0xd0] sm:$0xff] %vm1838_vm7, %v4794_v53  ;;  %1866 = vst.msk [vmem:[#allocation2 + $0xd8] sm:$0xff] %vm1838_vm7, %v4796_v30  ;;  %v7727_v53 = vshrl.u32 %v5477_v49, 16  ;;  %v7729_v30 = vld [vmem:[#allocation75_spill] sm:$0xff]  ;;  %v1886_v57 = vsel %vm4533_vm14, %v7730_v27, %v1885_v33  ;;  %v1889_v36 = vsel %vm4533_vm14, %v7731_v29, %v1888_v39  ;;  %v1891_v22 = vld [vmem:[#allocation2 + $0x20] sm:$0xff]  ;;  %v1978_v26 = vsel %vm4555_vm15, %v4826_v62, %v1880_v46 }
 0x296   :  { %1867 = vst.msk [vmem:[#allocation2 + $0xe0] sm:$0xff] %vm1838_vm7, %v7720_v2  ;;  %7724 = vst [vmem:[#allocation33_spill] sm:$0xff] %v5692_v10  ;;  %v1883_v2 = vsel %vm4533_vm14, %v7729_v30, %v1882_v15  ;;  %v1894_v25 = vld [vmem:[#allocation2 + $0x28] sm:$0xff]  ;;  %v1897_v10 = vld [vmem:[#allocation2 + $0x30] sm:$0xff] }
 0x297   :  { %v5699_v18 = vor.u32 %v1871_v8, %v7727_v53  ;;  %v1892_v53 = vsel %vm4533_vm14, %v5183_v51, %v1891_v22  ;;  %v7732_v8 = vld [vmem:[#allocation79_spill] sm:$0xff]  ;;  %v7733_v15 = vld [vmem:[#allocation80_spill] sm:$0xff]  ;;  %v5723_v39 = vld [vmem:[#allocation2 + $0x48] sm:$0xff]  ;;  %1979 = vst [vmem:[#allocation2] sm:$0xff] %v1978_v26  ;;  %v1981_v62 = vsel %vm4555_vm15, %v4830_v40, %v1883_v2  ;;  %v1984_v40 = vsel %vm4555_vm15, %v4837_v13, %v1886_v57 }
 0x298   :  { %v1898_v30 = vsel %vm4533_vm14, %v7733_v15, %v1897_v10  ;;  %v5719_v33 = vld [vmem:[#allocation2 + $0x38] sm:$0xff]  ;;  %v5721_v27 = vld [vmem:[#allocation2 + $0x40] sm:$0xff]  ;;  %v7735_v22 = vld [vmem:[#allocation81_spill] sm:$0xff]  ;;  %1982 = vst [vmem:[#allocation2 + $0x8] sm:$0xff] %v1981_v62  ;;  %v1987_v13 = vsel %vm4555_vm15, %v4841_v48, %v1889_v36  ;;  %v1990_v48 = vsel %vm4555_vm15, %v4847_v34, %v1892_v53 }
 0x299   :  { %7728 = vst [vmem:[#allocation35_spill] sm:$0xff] %v5699_v18  ;;  %v1895_v18 = vsel %vm4533_vm14, %v7732_v8, %v1894_v25  ;;  %v1901_v51 = vsel %vm4533_vm14, %v7735_v22, %v5719_v33  ;;  %v7736_v25 = vld [vmem:[#allocation82_spill] sm:$0xff]  ;;  %v7737_v15 = vld [vmem:[#allocation83_spill] sm:$0xff]  ;;  %v5740_v6 = vld [vmem:[#allocation2 + $0x60] sm:$0xff] }
 0x29a   :  { %v1904_v10 = vsel %vm4533_vm14, %v7736_v25, %v5721_v27  ;;  %v1907_v8 = vsel %vm4533_vm14, %v7737_v15, %v5723_v39  ;;  %v1909_v49 = vld [vmem:[#allocation2 + $0x50] sm:$0xff]  ;;  %v1912_v4 = vld [vmem:[#allocation2 + $0x58] sm:$0xff]  ;;  %v7738_v46 = vld [vmem:[#allocation84_spill] sm:$0xff]  ;;  %2068 = vst.msk [vmem:[#allocation2] sm:$0xff] %vm2067_vm12, %v7667_v42 }
 0x29b   :  { %v1910_v33 = vsel %vm4533_vm14, %v7738_v46, %v1909_v49  ;;  %v7739_v22 = vld [vmem:[#allocation85_spill] sm:$0xff]  ;;  %v7740_v25 = vld [vmem:[#allocation86_spill] sm:$0xff]  ;;  %v1927_v26 = vld [vmem:[#allocation2 + $0x80] sm:$0xff]  ;;  %1985 = vst [vmem:[#allocation2 + $0x10] sm:$0xff] %v1984_v40 }
 0x29c   :  { %v1913_v27 = vsel %vm4533_vm14, %v7739_v22, %v1912_v4  ;;  %v1916_v39 = vsel %vm4533_vm14, %v7740_v25, %v5740_v6  ;;  %v1918_v15 = vld [vmem:[#allocation2 + $0x68] sm:$0xff]  ;;  %v1921_v1 = vld [vmem:[#allocation2 + $0x70] sm:$0xff]  ;;  %v7741_v49 = vld [vmem:[#allocation87_spill] sm:$0xff]  ;;  %2069 = vst.msk [vmem:[#allocation2 + $0x8] sm:$0xff] %vm2067_vm12, %v7668_v58 }
 0x29d   :  { %v1919_v4 = vsel %vm4533_vm14, %v7741_v49, %v1918_v15  ;;  %v1922_v2 = vsel %vm4533_vm14, %v5239_v19, %v1921_v1  ;;  %v7742_v6 = vld [vmem:[#allocation88_spill] sm:$0xff]  ;;  %v1930_v62 = vld [vmem:[#allocation2 + $0x88] sm:$0xff]  ;;  %v1933_v25 = vld [vmem:[#allocation2 + $0x90] sm:$0xff]  ;;  %1988 = vst [vmem:[#allocation2 + $0x18] sm:$0xff] %v1987_v13 }
 0x29e   :  { %v1928_v22 = vsel %vm4533_vm14, %v7742_v6, %v1927_v26  ;;  %v1936_v46 = vld [vmem:[#allocation2 + $0x98] sm:$0xff]  ;;  %v7743_v42 = vld [vmem:[#allocation89_spill] sm:$0xff]  ;;  %v1934_v1 = vsel %vm4533_vm14, %v5273_v31, %v1933_v25  ;;  %v1939_v26 = vld [vmem:[#allocation2 + $0xa0] sm:$0xff]  ;;  %2070 = vst.msk [vmem:[#allocation2 + $0x10] sm:$0xff] %vm2067_vm12, %v7669_v41  ;;  %v1993_v41 = vsel %vm4555_vm15, %v4860_v35, %v1895_v18 }
 0x29f   :  { %v1931_v57 = vsel %vm4533_vm14, %v7743_v42, %v1930_v62  ;;  %v1937_v15 = vsel %vm4533_vm14, %v5277_v3, %v1936_v46  ;;  %v5783_v40 = vld [vmem:[#allocation2 + $0xa8] sm:$0xff]  ;;  %v5785_v6 = vld [vmem:[#allocation2 + $0xb0] sm:$0xff]  ;;  %v1940_v58 = vsel %vm4533_vm14, %v5289_v21, %v1939_v26  ;;  %v1948_v46 = vld [vmem:[#allocation2 + $0xb8] sm:$0xff]  ;;  %1991 = vst [vmem:[#allocation2 + $0x20] sm:$0xff] %v1990_v48 }
 0x2a0   :  { %v1943_v36 = vsel %vm4533_vm14, %v5293_v47, %v5783_v40  ;;  %v1946_v25 = vsel %vm4533_vm14, %v5297_v52, %v5785_v6  ;;  %v1951_v62 = vld [vmem:[#allocation2 + $0xc0] sm:$0xff]  ;;  %v5803_v34 = vld [vmem:[#allocation2 + $0xc8] sm:$0xff]  ;;  %2071 = vst.msk [vmem:[#allocation2 + $0x18] sm:$0xff] %vm2067_vm12, %v7670_v9  ;;  %v1949_v53 = vsel %vm4533_vm14, %v5301_v43, %v1948_v46  ;;  %v5820_v40 = vld [vmem:[#allocation2 + $0xd0] sm:$0xff]  ;;  %v1996_v9 = vsel %vm4555_vm15, %v4868_v28, %v1898_v30 }
 0x2a1   :  { %v1952_v13 = vsel %vm4533_vm14, %v5311_v63, %v1951_v62  ;;  %v1955_v26 = vsel %vm4533_vm14, %v5349_v0, %v5803_v34  ;;  %v5822_v6 = vld [vmem:[#allocation2 + $0xd8] sm:$0xff]  ;;  %v5824_v35 = vld [vmem:[#allocation2 + $0xe0] sm:$0xff]  ;;  %1994 = vst [vmem:[#allocation2 + $0x28] sm:$0xff] %v1993_v41  ;;  %2072 = vst.msk [vmem:[#allocation2 + $0x20] sm:$0xff] %vm2067_vm12, %v7674_v60  ;;  %v1958_v18 = vsel %vm4533_vm14, %v5353_v16, %v5820_v40 }
 0x2a2   :  { %v1961_v48 = vsel %vm4533_vm14, %v5357_v24, %v5822_v6  ;;  %v7744_v46 = vld [vmem:[#allocation47_spill] sm:$0xff]  ;;  %1997 = vst [vmem:[#allocation2 + $0x30] sm:$0xff] %v1996_v9  ;;  %v1999_v30 = vsel %vm4555_vm15, %v4876_v5, %v1901_v51  ;;  %2073 = vst.msk [vmem:[#allocation2 + $0x28] sm:$0xff] %vm2067_vm12, %v7675_v56  ;;  %v2002_v28 = vsel %vm4555_vm15, %v4884_v61, %v1904_v10  ;;  %v7758_v40 = vld [vmem:[#allocation46_spill] sm:$0xff] }
 0x2a3   :  { %v1964_v62 = vsel %vm4533_vm14, %v7744_v46, %v5824_v35  ;;  %2000 = vst [vmem:[#allocation2 + $0x38] sm:$0xff] %v1999_v30  ;;  %v2005_v60 = vsel %vm4555_vm15, %v4892_v54, %v1907_v8  ;;  %v2008_v41 = vsel %vm4555_vm15, %v7671_v38, %v1910_v33  ;;  %v2011_v5 = vsel %vm4555_vm15, %v7672_v32, %v1913_v27  ;;  %v7749_v8 = vld [vmem:[#allocation71_spill] sm:$0xff]  ;;  %v7751_v33 = vld [vmem:[#allocation32_spill] sm:$0xff]  ;;  %v7752_v27 = vld [vmem:[#allocation34_spill] sm:$0xff] }
 0x2a4   :  { %2074 = vst.msk [vmem:[#allocation2 + $0x30] sm:$0xff] %vm2067_vm12, %v7680_v37  ;;  %2003 = vst [vmem:[#allocation2 + $0x40] sm:$0xff] %v2002_v28  ;;  %v2014_v61 = vsel %vm4555_vm15, %v7673_v12, %v1916_v39  ;;  %v2017_v54 = vsel %vm4555_vm15, %v7676_v17, %v1919_v4  ;;  %v2020_v51 = vsel %vm4555_vm15, %v5561_v50, %v1922_v2  ;;  %v7745_v17 = vld [vmem:[#allocation27_spill] sm:$0xff]  ;;  %v7753_v39 = vld [vmem:[#allocation17_spill] sm:$0xff] }
 0x2a5   :  { %2006 = vst [vmem:[#allocation2 + $0x48] sm:$0xff] %v2005_v60  ;;  %2009 = vst [vmem:[#allocation2 + $0x50] sm:$0xff] %v2008_v41  ;;  %v2023_v37 = vsel %vm4555_vm15, %v7678_v55, %v1928_v22  ;;  %v2026_v38 = vsel %vm4555_vm15, %v7679_v11, %v1931_v57  ;;  %v2029_v32 = vsel %vm4555_vm15, %v7685_v59, %v1934_v1  ;;  %v7746_v55 = vld [vmem:[#allocation29_spill] sm:$0xff]  ;;  %v1972_v50 = vld [vmem:[#allocation2 + $0xf8] sm:$0xff] }
 0x2a6   :  { %2012 = vst [vmem:[#allocation2 + $0x58] sm:$0xff] %v2011_v5  ;;  %2075 = vst.msk [vmem:[#allocation2 + $0x38] sm:$0xff] %vm2067_vm12, %v7681_v14  ;;  %v2032_v12 = vsel %vm4555_vm15, %v7687_v44, %v1937_v15  ;;  %v2035_v56 = vsel %vm4555_vm15, %v7689_v7, %v1940_v58  ;;  %v2103_v11 = vld [vmem:[#allocation2 + $0x8] sm:$0xff]  ;;  %v2100_v14 = vld [vmem:[#allocation2] sm:$0xff]  ;;  %v2059_v6 = vsel %vm4555_vm15, %v7758_v40, %v1964_v62 }
 0x2a7   :  { %2015 = vst [vmem:[#allocation2 + $0x60] sm:$0xff] %v2014_v61  ;;  %2018 = vst [vmem:[#allocation2 + $0x68] sm:$0xff] %v2017_v54  ;;  %v7747_v59 = vld [vmem:[#allocation69_spill] sm:$0xff]  ;;  %v7748_v44 = vld [vmem:[#allocation70_spill] sm:$0xff] }
 0x2a8   :  { %2021 = vst [vmem:[#allocation2 + $0x70] sm:$0xff] %v2020_v51  ;;  %2024 = vst [vmem:[#allocation2 + $0x80] sm:$0xff] %v2023_v37  ;;  %v2041_v7 = vsel %vm4555_vm15, %v7748_v44, %v1946_v25  ;;  %v7750_v22 = vld [vmem:[#allocation44_spill] sm:$0xff]  ;;  %v7754_v4 = vld [vmem:[#allocation39_spill] sm:$0xff] }
 0x2a9   :  { %2076 = vst.msk [vmem:[#allocation2 + $0x40] sm:$0xff] %vm2067_vm12, %v7682_v45  ;;  %2077 = vst.msk [vmem:[#allocation2 + $0x48] sm:$0xff] %vm2067_vm12, %v7745_v17  ;;  %v2038_v45 = vsel %vm4555_vm15, %v7747_v59, %v1943_v36  ;;  %v2047_v10 = vsel %vm4555_vm15, %v7750_v22, %v1952_v13  ;;  %v2106_v2 = vld [vmem:[#allocation2 + $0x10] sm:$0xff]  ;;  %v1924_v57 = vld [vmem:[#allocation2 + $0x78] sm:$0xff] }
 0x2aa   :  { %2078 = vst.msk [vmem:[#allocation2 + $0x50] sm:$0xff] %vm2067_vm12, %v7690_v20  ;;  %2079 = vst.msk [vmem:[#allocation2 + $0x58] sm:$0xff] %vm2067_vm12, %v7746_v55  ;;  %v2044_v20 = vsel %vm4555_vm15, %v7749_v8, %v1949_v53  ;;  %v2187_v1 = vld [vmem:[#allocation2 + $0xf0] sm:$0xff]  ;;  %v7755_v15 = vld [vmem:[#allocation72_spill] sm:$0xff] }
 0x2ab   :  { %2027 = vst [vmem:[#allocation2 + $0x88] sm:$0xff] %v2026_v38  ;;  %2030 = vst [vmem:[#allocation2 + $0x90] sm:$0xff] %v2029_v32  ;;  %v2050_v58 = vsel %vm4555_vm15, %v7755_v15, %v1955_v26  ;;  %v7756_v36 = vld [vmem:[#allocation73_spill] sm:$0xff]  ;;  %v7760_v34 = vld [vmem:[#allocation50_spill] sm:$0xff] }
 0x2ac   :  { %2033 = vst [vmem:[#allocation2 + $0x98] sm:$0xff] %v2032_v12  ;;  %2036 = vst [vmem:[#allocation2 + $0xa0] sm:$0xff] %v2035_v56  ;;  %v2053_v25 = vsel %vm4555_vm15, %v7756_v36, %v1958_v18  ;;  %v7757_v53 = vld [vmem:[#allocation45_spill] sm:$0xff]  ;;  %v7761_v9 = vld [vmem:[#allocation51_spill] sm:$0xff] }
 0x2ad   :  { %2080 = vst.msk [vmem:[#allocation2 + $0x60] sm:$0xff] %vm2067_vm12, %v7751_v33  ;;  %2081 = vst.msk [vmem:[#allocation2 + $0x68] sm:$0xff] %vm2067_vm12, %v7752_v27  ;;  %v2056_v13 = vsel %vm4555_vm15, %v7757_v53, %v1961_v48  ;;  %v7759_v35 = vld [vmem:[#allocation49_spill] sm:$0xff]  ;;  %v7762_v26 = vld [vmem:[#allocation52_spill] sm:$0xff] }
 0x2ae   :  { %2082 = vst.msk [vmem:[#allocation2 + $0x70] sm:$0xff] %vm2067_vm12, %v7753_v39  ;;  %2083 = vst.msk [vmem:[#allocation2 + $0x80] sm:$0xff] %vm2067_vm12, %v7754_v4  ;;  %v2109_v18 = vld [vmem:[#allocation2 + $0x18] sm:$0xff]  ;;  %v7763_v48 = vld [vmem:[#allocation53_spill] sm:$0xff] }
 0x2af   :  { %2039 = vst [vmem:[#allocation2 + $0xa8] sm:$0xff] %v2038_v45  ;;  %2042 = vst [vmem:[#allocation2 + $0xb0] sm:$0xff] %v2041_v7  ;;  %v7764_v29 = vld [vmem:[#allocation54_spill] sm:$0xff]  ;;  %v7765_v62 = vld [vmem:[#allocation55_spill] sm:$0xff] }
 0x2b0   :  { %2045 = vst [vmem:[#allocation2 + $0xb8] sm:$0xff] %v2044_v20  ;;  %2048 = vst [vmem:[#allocation2 + $0xc0] sm:$0xff] %v2047_v10  ;;  %v7766_v30 = vld [vmem:[#allocation56_spill] sm:$0xff]  ;;  %v7769_v5 = vld [vmem:[#allocation78_spill] sm:$0xff] }
 0x2b1   :  { %2084 = vst.msk [vmem:[#allocation2 + $0x88] sm:$0xff] %vm2067_vm12, %v7759_v35  ;;  %2085 = vst.msk [vmem:[#allocation2 + $0x90] sm:$0xff] %vm2067_vm12, %v7760_v34  ;;  %v7767_v28 = vld [vmem:[#allocation76_spill] sm:$0xff]  ;;  %v5955_v61 = vsel %vm4691_vm0, %v7769_v5, %v2109_v18  ;;  %v7770_v54 = vld [vmem:[#allocation75_spill] sm:$0xff] }
 0x2b2   :  { %2086 = vst.msk [vmem:[#allocation2 + $0x98] sm:$0xff] %vm2067_vm12, %v7761_v9  ;;  %2087 = vst.msk [vmem:[#allocation2 + $0xa0] sm:$0xff] %vm2067_vm12, %v7762_v26  ;;  %v2104_v41 = vsel %vm4691_vm0, %v7767_v28, %v2103_v11  ;;  %v2101_v51 = vsel %vm4691_vm0, %v7770_v54, %v2100_v14  ;;  %v7771_v37 = vld [vmem:[#allocation77_spill] sm:$0xff]  ;;  %v2112_v32 = vld [vmem:[#allocation2 + $0x20] sm:$0xff] }
 0x2b3   :  { %2051 = vst [vmem:[#allocation2 + $0xc8] sm:$0xff] %v2050_v58  ;;  %2054 = vst [vmem:[#allocation2 + $0xd0] sm:$0xff] %v2053_v25  ;;  %v2107_v38 = vsel %vm4691_vm0, %v7771_v37, %v2106_v2  ;;  %v7772_v12 = vld [vmem:[#allocation57_spill] sm:$0xff]  ;;  %v7773_v56 = vld [vmem:[#allocation58_spill] sm:$0xff]  ;;  %3427 = vmatprep.mubr.bf16.mxu1 %v2101_v51 }
 0x2b4   :  { %2057 = vst [vmem:[#allocation2 + $0xd8] sm:$0xff] %v2056_v13  ;;  %2060 = vst [vmem:[#allocation2 + $0xe0] sm:$0xff] %v2059_v6  ;;  %v7774_v17 = vld [vmem:[#allocation41_spill] sm:$0xff]  ;;  %v7775_v55 = vld [vmem:[#allocation42_spill] sm:$0xff]  ;;  %3428 = vmatmul.mubr.bf16.vlgmr.msra.gmra.mrb[0].mxu1 %v2104_v41 }
 0x2b5   :  { %2088 = vst.msk [vmem:[#allocation2 + $0xa8] sm:$0xff] %vm2067_vm12, %v7763_v48  ;;  %2089 = vst.msk [vmem:[#allocation2 + $0xb0] sm:$0xff] %vm2067_vm12, %v7764_v29  ;;  %v2115_v11 = vld [vmem:[#allocation2 + $0x28] sm:$0xff]  ;;  %v7776_v14 = vld [vmem:[#allocation79_spill] sm:$0xff]  ;;  %3431 = vmatprep.mubr.bf16.mxu1 %v2107_v38 }
 0x2b6   :  { %2090 = vst.msk [vmem:[#allocation2 + $0xb8] sm:$0xff] %vm2067_vm12, %v7765_v62  ;;  %2091 = vst.msk [vmem:[#allocation2 + $0xc0] sm:$0xff] %vm2067_vm12, %v7766_v30  ;;  %v5975_v59 = vsel %vm4691_vm0, %v7776_v14, %v2112_v32  ;;  %v7777_v45 = vld [vmem:[#allocation35_spill] sm:$0xff]  ;;  %v7778_v7 = vld [vmem:[#allocation33_spill] sm:$0xff] }
 0x2b7   :  { %2092 = vst.msk [vmem:[#allocation2 + $0xc8] sm:$0xff] %vm2067_vm12, %v7772_v12  ;;  %2093 = vst.msk [vmem:[#allocation2 + $0xd0] sm:$0xff] %vm2067_vm12, %v7773_v56  ;;  %v5980_v44 = vsel %vm4533_vm14, %v7777_v45, %v1924_v57  ;;  %v5985_v8 = vsel %vm4691_vm0, %v7778_v7, %v2187_v1  ;;  %v5990_v20 = vsel %vm4533_vm14, %v7778_v7, %v1972_v50  ;;  %v7779_v22 = vld [vmem:[#allocation80_spill] sm:$0xff]  ;;  %v2118_v33 = vld [vmem:[#allocation2 + $0x30] sm:$0xff] }
 0x2b8   :  { %2094 = vst.msk [vmem:[#allocation2 + $0xd8] sm:$0xff] %vm2067_vm12, %v7774_v17  ;;  %2095 = vst.msk [vmem:[#allocation2 + $0xe0] sm:$0xff] %vm2067_vm12, %v7775_v55  ;;  %v5995_v10 = vsel %vm4691_vm0, %v7779_v22, %v2115_v11  ;;  %v2121_v23 = vld [vmem:[#allocation2 + $0x38] sm:$0xff]  ;;  %v7780_v50 = vld [vmem:[#allocation81_spill] sm:$0xff] }
 0x2b9   :  { %2105 = vst [vmem:[#allocation2 + $0x8] sm:$0xff] %v2104_v41  ;;  %2111 = vst [vmem:[#allocation2 + $0x18] sm:$0xff] %v5955_v61  ;;  %v6005_v27 = vsel %vm4691_vm0, %v7780_v50, %v2118_v33  ;;  %v7781_v39 = vld [vmem:[#allocation82_spill] sm:$0xff]  ;;  %v2127_v2 = vld [vmem:[#allocation2 + $0x48] sm:$0xff] }
 0x2ba   :  { %2102 = vst [vmem:[#allocation2] sm:$0xff] %v2101_v51  ;;  %2108 = vst [vmem:[#allocation2 + $0x10] sm:$0xff] %v2107_v38  ;;  %v6010_v4 = vsel %vm4691_vm0, %v7781_v39, %v2121_v23  ;;  %v2133_v57 = vld [vmem:[#allocation2 + $0x58] sm:$0xff]  ;;  %v2124_v1 = vld [vmem:[#allocation2 + $0x40] sm:$0xff] }
 0x2bb   :  { %2114 = vst [vmem:[#allocation2 + $0x20] sm:$0xff] %v5975_v59  ;;  %1926 = vst [vmem:[#allocation2 + $0x78] sm:$0xff] %v5980_v44  ;;  %v7782_v15 = vld [vmem:[#allocation84_spill] sm:$0xff]  ;;  %v7783_v36 = vld [vmem:[#allocation86_spill] sm:$0xff] }
 0x2bc   :  { %2189 = vst [vmem:[#allocation2 + $0xf0] sm:$0xff] %v5985_v8  ;;  %1974 = vst [vmem:[#allocation2 + $0xf8] sm:$0xff] %v5990_v20  ;;  %v2128_v58 = vsel %vm4691_vm0, %v7782_v15, %v2127_v2  ;;  %v6020_v25 = vsel %vm4691_vm0, %v7783_v36, %v2133_v57  ;;  %v2139_v53 = vld [vmem:[#allocation2 + $0x68] sm:$0xff]  ;;  %v2145_v13 = vld [vmem:[#allocation2 + $0x80] sm:$0xff]  ;;  %3432 = vmatmul.mubr.bf16.gmra.mrb[4].mxu1 %v5955_v61 }
 0x2bd   :  { %2117 = vst [vmem:[#allocation2 + $0x28] sm:$0xff] %v5995_v10  ;;  %2120 = vst [vmem:[#allocation2 + $0x30] sm:$0xff] %v6005_v27  ;;  %v7784_v40 = vld [vmem:[#allocation83_spill] sm:$0xff]  ;;  %v2130_v35 = vld [vmem:[#allocation2 + $0x50] sm:$0xff]  ;;  %v2140_v34 = vsel %vm4691_vm0, %v5239_v19, %v2139_v53  ;;  %v2146_v9 = vsel %vm4691_vm0, %v7743_v42, %v2145_v13  ;;  %3435 = vmatprep.mubr.bf16.mxu1 %v5975_v59 }
 0x2be   :  { %2123 = vst [vmem:[#allocation2 + $0x38] sm:$0xff] %v6010_v4  ;;  %v2125_v6 = vsel %vm4691_vm0, %v7784_v40, %v2124_v1  ;;  %2129 = vst [vmem:[#allocation2 + $0x48] sm:$0xff] %v2128_v58  ;;  %v2148_v26 = vld [vmem:[#allocation2 + $0x88] sm:$0xff]  ;;  %v2154_v18 = vld [vmem:[#allocation2 + $0x98] sm:$0xff] }
 0x2bf   :  { %2135 = vst [vmem:[#allocation2 + $0x58] sm:$0xff] %v6020_v25  ;;  %2126 = vst [vmem:[#allocation2 + $0x40] sm:$0xff] %v2125_v6  ;;  %v7785_v48 = vld [vmem:[#allocation85_spill] sm:$0xff]  ;;  %v2136_v62 = vld [vmem:[#allocation2 + $0x60] sm:$0xff]  ;;  %v2149_v30 = vsel %vm4691_vm0, %v5273_v31, %v2148_v26  ;;  %v2155_v19 = vsel %vm4691_vm0, %v5289_v21, %v2154_v18 }
 0x2c0   :  { %v2131_v29 = vsel %vm4691_vm0, %v7785_v48, %v2130_v35  ;;  %2141 = vst [vmem:[#allocation2 + $0x68] sm:$0xff] %v2140_v34  ;;  %2147 = vst [vmem:[#allocation2 + $0x80] sm:$0xff] %v2146_v9  ;;  %v2160_v28 = vld [vmem:[#allocation2 + $0xa8] sm:$0xff]  ;;  %v2166_v42 = vld [vmem:[#allocation2 + $0xb8] sm:$0xff]  ;;  %v2137_v41 = vsel %vm4691_vm0, %v7741_v49, %v2136_v62 }
 0x2c1   :  { %2132 = vst [vmem:[#allocation2 + $0x50] sm:$0xff] %v2131_v29  ;;  %v2142_v5 = vld [vmem:[#allocation2 + $0x70] sm:$0xff]  ;;  %2150 = vst [vmem:[#allocation2 + $0x88] sm:$0xff] %v2149_v30  ;;  %v2161_v54 = vsel %vm4691_vm0, %v5297_v52, %v2160_v28  ;;  %v2167_v31 = vsel %vm4691_vm0, %v5311_v63, %v2166_v42  ;;  %v2172_v51 = vld [vmem:[#allocation2 + $0xc8] sm:$0xff] }
 0x2c2   :  { %2156 = vst [vmem:[#allocation2 + $0x98] sm:$0xff] %v2155_v19  ;;  %v2178_v21 = vld [vmem:[#allocation2 + $0xd8] sm:$0xff]  ;;  %2138 = vst [vmem:[#allocation2 + $0x60] sm:$0xff] %v2137_v41  ;;  %v2143_v37 = vsel %vm4691_vm0, %v7777_v45, %v2142_v5  ;;  %v2151_v38 = vld [vmem:[#allocation2 + $0x90] sm:$0xff]  ;;  %v2173_v49 = vsel %vm4691_vm0, %v5353_v16, %v2172_v51 }
 0x2c3   :  { %2162 = vst [vmem:[#allocation2 + $0xa8] sm:$0xff] %v2161_v54  ;;  %2168 = vst [vmem:[#allocation2 + $0xb8] sm:$0xff] %v2167_v31  ;;  %v2179_v52 = vsel %vm4691_vm0, %v7744_v46, %v2178_v21  ;;  %v2152_v63 = vsel %vm4691_vm0, %v5277_v3, %v2151_v38  ;;  %v2157_v32 = vld [vmem:[#allocation2 + $0xa0] sm:$0xff]  ;;  %v2163_v12 = vld [vmem:[#allocation2 + $0xb0] sm:$0xff] }
 0x2c4   :  { %2144 = vst [vmem:[#allocation2 + $0x70] sm:$0xff] %v2143_v37  ;;  %v2169_v56 = vld [vmem:[#allocation2 + $0xc0] sm:$0xff]  ;;  %2174 = vst [vmem:[#allocation2 + $0xc8] sm:$0xff] %v2173_v49  ;;  %v2158_v16 = vsel %vm4691_vm0, %v5293_v47, %v2157_v32  ;;  %v2164_v46 = vsel %vm4691_vm0, %v5301_v43, %v2163_v12  ;;  %v2175_v17 = vld [vmem:[#allocation2 + $0xd0] sm:$0xff]  ;;  %3436 = vmatmul.mubr.bf16.gmra.mrb[8].mxu1 %v5995_v10 }
 0x2c5   :  { %2180 = vst [vmem:[#allocation2 + $0xd8] sm:$0xff] %v2179_v52  ;;  %2153 = vst [vmem:[#allocation2 + $0x90] sm:$0xff] %v2152_v63  ;;  %v2170_v3 = vsel %vm4691_vm0, %v5349_v0, %v2169_v56  ;;  %v2181_v55 = vld [vmem:[#allocation2 + $0xe0] sm:$0xff]  ;;  %v2176_v61 = vsel %vm4691_vm0, %v5357_v24, %v2175_v17  ;;  %3439 = vmatprep.mubr.bf16.mxu1 %v6005_v27  ;;  %v2219_v0 = vld [vmem:[#allocation2 + $0xe8] sm:$0xff] }
 0x2c6   :  { %2159 = vst [vmem:[#allocation2 + $0xa0] sm:$0xff] %v2158_v16  ;;  %2165 = vst [vmem:[#allocation2 + $0xb0] sm:$0xff] %v2164_v46  ;;  %v7786_v47 = vld [vmem:[#allocation48_spill] sm:$0xff] }
 0x2c7   :  { %2171 = vst [vmem:[#allocation2 + $0xc0] sm:$0xff] %v2170_v3  ;;  %v2182_v11 = vsel %vm4691_vm0, %v7786_v47, %v2181_v55  ;;  %2177 = vst [vmem:[#allocation2 + $0xd0] sm:$0xff] %v2176_v61 }
 0x2c8   :  { %2183 = vst [vmem:[#allocation2 + $0xe0] sm:$0xff] %v2182_v11 }
 0x2cc   :  { %3440 = vmatmul.mubr.bf16.gmra.mrb[12].mxu1 %v6010_v4 }
 0x2cd   :  { %3443 = vmatprep.mubr.bf16.mxu1 %v2125_v6 }
 0x2d4   :  { %3444 = vmatmul.mubr.bf16.gmra.mrb[16].mxu1 %v2128_v58 }
 0x2d5   :  { %3447 = vmatprep.mubr.bf16.mxu1 %v2131_v29 }
 0x2dc   :  { %3448 = vmatmul.mubr.bf16.gmra.mrb[20].mxu1 %v6020_v25 }
 0x2dd   :  { %3451 = vmatprep.mubr.bf16.mxu1 %v2137_v41 }
 0x2e4   :  { %3452 = vmatmul.mubr.bf16.gmra.mrb[24].mxu1 %v2140_v34 }
 0x2e5   :  { %3455 = vmatprep.mubr.bf16.mxu1 %v2143_v37 }
 0x2ec   :  { %3456 = vmatmul.mubr.bf16.gmra.mrb[28].mxu1 %v5980_v44 }
 0x2ed   :  { %3459 = vmatprep.mubr.bf16.mxu1 %v2146_v9 }
 0x2f4   :  { %3460 = vmatmul.mubr.bf16.gmra.mrb[32].mxu1 %v2149_v30 }
 0x2f5   :  { %3463 = vmatprep.mubr.bf16.mxu1 %v2152_v63 }
 0x2fc   :  { %3464 = vmatmul.mubr.bf16.gmra.mrb[36].mxu1 %v2155_v19 }
 0x2fd   :  { %3467 = vmatprep.mubr.bf16.mxu1 %v2158_v16 }
 0x304   :  { %3468 = vmatmul.mubr.bf16.gmra.mrb[40].mxu1 %v2161_v54 }
 0x305   :  { %3471 = vmatprep.mubr.bf16.mxu1 %v2164_v46 }
 0x30c   :  { %3472 = vmatmul.mubr.bf16.gmra.mrb[44].mxu1 %v2167_v31 }
 0x30d   :  { %3475 = vmatprep.mubr.bf16.mxu1 %v2170_v3 }
 0x314   :  { %3476 = vmatmul.mubr.bf16.gmra.mrb[48].mxu1 %v2173_v49 }
 0x315   :  { %3479 = vmatprep.mubr.bf16.mxu1 %v2176_v61 }
 0x31c   :  { %3480 = vmatmul.mubr.bf16.gmra.mrb[52].mxu1 %v2179_v52 }
 0x31d   :  { %3483 = vmatprep.mubr.bf16.mxu1 %v2182_v11 }
 0x324   :  { %3484 = vmatmul.mubr.bf16.gmra.mrb[56].mxu1 %v2219_v0 }
 0x325   :  { %3487 = vmatprep.mubr.bf16.mxu1 %v5985_v8 }
 0x32c   :  { %3488 = vmatmul.mubr.bf16.gmra.mrb[60].mxu1 %v5990_v20 }
 0x387   :  { %v6086_v43 = vpop.f32.mrb[0].mxu1 }
 0x388   :  { %v6088_v24 = vpop.f32.mrb[1].mxu1  ;;  %v2647_v7 = vmul.f32 %v6086_v43, %v6086_v43 }
 0x389   :  { %v6090_v60 = vpop.f32.mrb[2].mxu1  ;;  %v2645_v59 = vmul.f32 %v6088_v24, %v6088_v24 }
 0x38a   :  { %v6092_v14 = vpop.f32.mrb[3].mxu1  ;;  %v2648_v22 = vmul.f32 %v6090_v60, %v6090_v60 }
 0x38b   :  { %v2575_v45 = vadd.f32 %v6092_v14, %v6088_v24  ;;  %v2646_v44 = vmul.f32 %v6092_v14, %v6092_v14 }
 0x38d   :  { %v2576_v8 = vadd.f32 %v6086_v43, %v2575_v45  ;;  %v2709_v20 = vadd.f32 %v2646_v44, %v2645_v59 }
 0x38f   :  { %v2710_v10 = vadd.f32 %v2709_v20, %v2647_v7  ;;  %v6105_v33 = vpop.f32.mrb[4].mxu1  ;;  %v2577_v23 = vadd.f32 %v6090_v60, %v2576_v8 }
 0x390   :  { %v6108_v50 = vpop.f32.mrb[5].mxu1  ;;  %v2651_v36 = vmul.f32 %v6105_v33, %v6105_v33 }
 0x391   :  { %v2578_v27 = vadd.f32 %v2577_v23, %v6108_v50  ;;  %v2649_v39 = vmul.f32 %v6108_v50, %v6108_v50  ;;  %v2711_v4 = vadd.f32 %v2710_v10, %v2648_v22  ;;  %v6113_v2 = vpop.f32.mrb[6].mxu1 }
 0x392   :  { %v6115_v57 = vpop.f32.mrb[7].mxu1  ;;  %v2652_v13 = vmul.f32 %v6113_v2, %v6113_v2 }
 0x393   :  { %v2712_v1 = vadd.f32 %v2711_v4, %v2649_v39  ;;  %v2579_v15 = vadd.f32 %v2578_v27, %v6115_v57  ;;  %v2650_v58 = vmul.f32 %v6115_v57, %v6115_v57 }
 0x395   :  { %v2580_v25 = vadd.f32 %v6105_v33, %v2579_v15  ;;  %v2713_v53 = vadd.f32 %v2712_v1, %v2650_v58 }
 0x397   :  { %v2714_v40 = vadd.f32 %v2713_v53, %v2651_v36  ;;  %v6125_v6 = vpop.f32.mrb[8].mxu1  ;;  %v2581_v35 = vadd.f32 %v6113_v2, %v2580_v25 }
 0x398   :  { %v6128_v34 = vpop.f32.mrb[9].mxu1  ;;  %v2655_v28 = vmul.f32 %v6125_v6, %v6125_v6 }
 0x399   :  { %v2582_v9 = vadd.f32 %v2581_v35, %v6128_v34  ;;  %v2653_v26 = vmul.f32 %v6128_v34, %v6128_v34  ;;  %v2715_v18 = vadd.f32 %v2714_v40, %v2652_v13  ;;  %v6133_v48 = vpop.f32.mrb[10].mxu1 }
 0x39a   :  { %v6135_v29 = vpop.f32.mrb[11].mxu1  ;;  %v2656_v5 = vmul.f32 %v6133_v48, %v6133_v48 }
 0x39b   :  { %v2716_v62 = vadd.f32 %v2715_v18, %v2653_v26  ;;  %v2583_v30 = vadd.f32 %v2582_v9, %v6135_v29  ;;  %v2654_v19 = vmul.f32 %v6135_v29, %v6135_v29 }
 0x39d   :  { %v2584_v42 = vadd.f32 %v6125_v6, %v2583_v30  ;;  %v2717_v41 = vadd.f32 %v2716_v62, %v2654_v19 }
 0x39f   :  { %v2718_v54 = vadd.f32 %v2717_v41, %v2655_v28  ;;  %v6145_v31 = vpop.f32.mrb[12].mxu1  ;;  %v2585_v51 = vadd.f32 %v6133_v48, %v2584_v42 }
 0x3a0   :  { %v6148_v21 = vpop.f32.mrb[13].mxu1  ;;  %v2659_v16 = vmul.f32 %v6145_v31, %v6145_v31 }
 0x3a1   :  { %v2586_v37 = vadd.f32 %v2585_v51, %v6148_v21  ;;  %v2657_v38 = vmul.f32 %v6148_v21, %v6148_v21  ;;  %v2719_v49 = vadd.f32 %v2718_v54, %v2656_v5  ;;  %v6153_v52 = vpop.f32.mrb[14].mxu1 }
 0x3a2   :  { %v6155_v63 = vpop.f32.mrb[15].mxu1  ;;  %v2660_v17 = vmul.f32 %v6153_v52, %v6153_v52 }
 0x3a3   :  { %v2720_v32 = vadd.f32 %v2719_v49, %v2657_v38  ;;  %v2587_v12 = vadd.f32 %v2586_v37, %v6155_v63  ;;  %v2658_v56 = vmul.f32 %v6155_v63, %v6155_v63 }
 0x3a5   :  { %v2588_v46 = vadd.f32 %v6145_v31, %v2587_v12  ;;  %v2721_v3 = vadd.f32 %v2720_v32, %v2658_v56 }
 0x3a7   :  { %v2722_v55 = vadd.f32 %v2721_v3, %v2659_v16  ;;  %v6165_v61 = vpop.f32.mrb[16].mxu1  ;;  %v2589_v47 = vadd.f32 %v6153_v52, %v2588_v46 }
 0x3a8   :  { %v6168_v11 = vpop.f32.mrb[17].mxu1  ;;  %v2663_v10 = vmul.f32 %v6165_v61, %v6165_v61 }
 0x3a9   :  { %v2590_v0 = vadd.f32 %v2589_v47, %v6168_v11  ;;  %v2661_v59 = vmul.f32 %v6168_v11, %v6168_v11  ;;  %v2723_v45 = vadd.f32 %v2722_v55, %v2660_v17  ;;  %v6173_v44 = vpop.f32.mrb[18].mxu1 }
 0x3aa   :  { %v6175_v7 = vpop.f32.mrb[19].mxu1  ;;  %v2664_v39 = vmul.f32 %v6173_v44, %v6173_v44 }
 0x3ab   :  { %v2724_v8 = vadd.f32 %v2723_v45, %v2661_v59  ;;  %v2591_v20 = vadd.f32 %v2590_v0, %v6175_v7  ;;  %v2662_v22 = vmul.f32 %v6175_v7, %v6175_v7 }
 0x3ad   :  { %v2592_v23 = vadd.f32 %v6165_v61, %v2591_v20  ;;  %v2725_v27 = vadd.f32 %v2724_v8, %v2662_v22 }
 0x3af   :  { %v2726_v4 = vadd.f32 %v2725_v27, %v2663_v10  ;;  %v6185_v1 = vpop.f32.mrb[20].mxu1  ;;  %v2593_v15 = vadd.f32 %v6173_v44, %v2592_v23 }
 0x3b0   :  { %v6188_v58 = vpop.f32.mrb[21].mxu1  ;;  %v2667_v18 = vmul.f32 %v6185_v1, %v6185_v1 }
 0x3b1   :  { %v2594_v36 = vadd.f32 %v2593_v15, %v6188_v58  ;;  %v2665_v25 = vmul.f32 %v6188_v58, %v6188_v58  ;;  %v2727_v53 = vadd.f32 %v2726_v4, %v2664_v39  ;;  %v6193_v13 = vpop.f32.mrb[22].mxu1 }
 0x3b2   :  { %v6195_v40 = vpop.f32.mrb[23].mxu1  ;;  %v2668_v19 = vmul.f32 %v6193_v13, %v6193_v13 }
 0x3b3   :  { %v2728_v35 = vadd.f32 %v2727_v53, %v2665_v25  ;;  %v2595_v9 = vadd.f32 %v2594_v36, %v6195_v40  ;;  %v2666_v26 = vmul.f32 %v6195_v40, %v6195_v40 }
 0x3b5   :  { %v2596_v62 = vadd.f32 %v6185_v1, %v2595_v9  ;;  %v2729_v30 = vadd.f32 %v2728_v35, %v2666_v26 }
 0x3b7   :  { %v2730_v28 = vadd.f32 %v2729_v30, %v2667_v18  ;;  %v6205_v42 = vpop.f32.mrb[24].mxu1  ;;  %v2597_v41 = vadd.f32 %v6193_v13, %v2596_v62 }
 0x3b8   :  { %v6208_v5 = vpop.f32.mrb[25].mxu1  ;;  %v2671_v16 = vmul.f32 %v6205_v42, %v6205_v42 }
 0x3b9   :  { %v2598_v54 = vadd.f32 %v2597_v41, %v6208_v5  ;;  %v2669_v51 = vmul.f32 %v6208_v5, %v6208_v5  ;;  %v2731_v37 = vadd.f32 %v2730_v28, %v2668_v19  ;;  %v6213_v38 = vpop.f32.mrb[26].mxu1 }
 0x3ba   :  { %v6215_v49 = vpop.f32.mrb[27].mxu1  ;;  %v2672_v17 = vmul.f32 %v6213_v38, %v6213_v38 }
 0x3bb   :  { %v2732_v32 = vadd.f32 %v2731_v37, %v2669_v51  ;;  %v2599_v12 = vadd.f32 %v2598_v54, %v6215_v49  ;;  %v2670_v56 = vmul.f32 %v6215_v49, %v6215_v49 }
 0x3bd   :  { %v2600_v46 = vadd.f32 %v6205_v42, %v2599_v12  ;;  %v2733_v3 = vadd.f32 %v2732_v32, %v2670_v56 }
 0x3bf   :  { %v2734_v55 = vadd.f32 %v2733_v3, %v2671_v16  ;;  %v6225_v47 = vpop.f32.mrb[28].mxu1  ;;  %v2601_v0 = vadd.f32 %v6213_v38, %v2600_v46 }
 0x3c0   :  { %v6228_v59 = vpop.f32.mrb[29].mxu1  ;;  %v2675_v4 = vmul.f32 %v6225_v47, %v6225_v47 }
 0x3c1   :  { %v2602_v45 = vadd.f32 %v2601_v0, %v6228_v59  ;;  %v2673_v8 = vmul.f32 %v6228_v59, %v6228_v59  ;;  %v2735_v20 = vadd.f32 %v2734_v55, %v2672_v17  ;;  %v6233_v22 = vpop.f32.mrb[30].mxu1 }
 0x3c2   :  { %v6235_v10 = vpop.f32.mrb[31].mxu1  ;;  %v2676_v25 = vmul.f32 %v6233_v22, %v6233_v22 }
 0x3c3   :  { %v2736_v23 = vadd.f32 %v2735_v20, %v2673_v8  ;;  %v2603_v27 = vadd.f32 %v2602_v45, %v6235_v10  ;;  %v2674_v39 = vmul.f32 %v6235_v10, %v6235_v10 }
 0x3c5   :  { %v2604_v15 = vadd.f32 %v6225_v47, %v2603_v27  ;;  %v2737_v36 = vadd.f32 %v2736_v23, %v2674_v39 }
 0x3c7   :  { %v2738_v53 = vadd.f32 %v2737_v36, %v2675_v4  ;;  %v6245_v35 = vpop.f32.mrb[32].mxu1  ;;  %v2605_v9 = vadd.f32 %v6233_v22, %v2604_v15 }
 0x3c8   :  { %v6248_v26 = vpop.f32.mrb[33].mxu1  ;;  %v2679_v37 = vmul.f32 %v6245_v35, %v6245_v35 }
 0x3c9   :  { %v2606_v18 = vadd.f32 %v2605_v9, %v6248_v26  ;;  %v2677_v62 = vmul.f32 %v6248_v26, %v6248_v26  ;;  %v2739_v30 = vadd.f32 %v2738_v53, %v2676_v25  ;;  %v6253_v19 = vpop.f32.mrb[34].mxu1 }
 0x3ca   :  { %v6255_v28 = vpop.f32.mrb[35].mxu1  ;;  %v2680_v56 = vmul.f32 %v6253_v19, %v6253_v19 }
 0x3cb   :  { %v2740_v41 = vadd.f32 %v2739_v30, %v2677_v62  ;;  %v2607_v54 = vadd.f32 %v2606_v18, %v6255_v28  ;;  %v2678_v51 = vmul.f32 %v6255_v28, %v6255_v28 }
 0x3cd   :  { %v2608_v32 = vadd.f32 %v6245_v35, %v2607_v54  ;;  %v2741_v12 = vadd.f32 %v2740_v41, %v2678_v51 }
 0x3cf   :  { %v2742_v16 = vadd.f32 %v2741_v12, %v2679_v37  ;;  %v6265_v46 = vpop.f32.mrb[36].mxu1  ;;  %v2609_v3 = vadd.f32 %v6253_v19, %v2608_v32 }
 0x3d0   :  { %7787 = vst [vmem:[#allocation26_spill] sm:$0xff] %v6265_v46  ;;  %v6268_v17 = vpop.f32.mrb[37].mxu1  ;;  %v2683_v4 = vmul.f32 %v6265_v46, %v6265_v46 }
 0x3d1   :  { %v2610_v55 = vadd.f32 %v2609_v3, %v6268_v17  ;;  %v2681_v0 = vmul.f32 %v6268_v17, %v6268_v17  ;;  %v2743_v45 = vadd.f32 %v2742_v16, %v2680_v56  ;;  %v6273_v8 = vpop.f32.mrb[38].mxu1 }
 0x3d2   :  { %7788 = vst [vmem:[#allocation38_spill] sm:$0xff] %v6273_v8  ;;  %v6275_v20 = vpop.f32.mrb[39].mxu1  ;;  %v2684_v25 = vmul.f32 %v6273_v8, %v6273_v8 }
 0x3d3   :  { %v2744_v23 = vadd.f32 %v2743_v45, %v2681_v0  ;;  %v2611_v27 = vadd.f32 %v2610_v55, %v6275_v20  ;;  %v2682_v39 = vmul.f32 %v6275_v20, %v6275_v20 }
 0x3d5   :  { %v2612_v15 = vadd.f32 %v6265_v46, %v2611_v27  ;;  %v2745_v36 = vadd.f32 %v2744_v23, %v2682_v39 }
 0x3d7   :  { %v2746_v53 = vadd.f32 %v2745_v36, %v2683_v4  ;;  %v6285_v9 = vpop.f32.mrb[40].mxu1  ;;  %v2613_v18 = vadd.f32 %v6273_v8, %v2612_v15 }
 0x3d8   :  { %7789 = vst [vmem:[#allocation19_spill] sm:$0xff] %v6285_v9  ;;  %v6288_v62 = vpop.f32.mrb[41].mxu1  ;;  %v2687_v16 = vmul.f32 %v6285_v9, %v6285_v9 }
 0x3d9   :  { %7790 = vst [vmem:[#allocation16_spill] sm:$0xff] %v6288_v62  ;;  %v2614_v30 = vadd.f32 %v2613_v18, %v6288_v62  ;;  %v2685_v41 = vmul.f32 %v6288_v62, %v6288_v62  ;;  %v2747_v54 = vadd.f32 %v2746_v53, %v2684_v25  ;;  %v6293_v51 = vpop.f32.mrb[42].mxu1 }
 0x3da   :  { %7791 = vst [vmem:[#allocation18_spill] sm:$0xff] %v6293_v51  ;;  %v6295_v37 = vpop.f32.mrb[43].mxu1  ;;  %v2688_v0 = vmul.f32 %v6293_v51, %v6293_v51 }
 0x3db   :  { %7792 = vst [vmem:[#allocation59_spill] sm:$0xff] %v6295_v37  ;;  %v2748_v32 = vadd.f32 %v2747_v54, %v2685_v41  ;;  %v2615_v12 = vadd.f32 %v2614_v30, %v6295_v37  ;;  %v2686_v56 = vmul.f32 %v6295_v37, %v6295_v37 }
 0x3dd   :  { %v2616_v3 = vadd.f32 %v6285_v9, %v2615_v12  ;;  %v2749_v55 = vadd.f32 %v2748_v32, %v2686_v56 }
 0x3df   :  { %v2750_v45 = vadd.f32 %v2749_v55, %v2687_v16  ;;  %v6305_v23 = vpop.f32.mrb[44].mxu1  ;;  %v2617_v27 = vadd.f32 %v6293_v51, %v2616_v3 }
 0x3e0   :  { %7793 = vst [vmem:[#allocation60_spill] sm:$0xff] %v6305_v23  ;;  %v6308_v39 = vpop.f32.mrb[45].mxu1  ;;  %v2691_v54 = vmul.f32 %v6305_v23, %v6305_v23 }
 0x3e1   :  { %7794 = vst [vmem:[#allocation61_spill] sm:$0xff] %v6308_v39  ;;  %v2618_v4 = vadd.f32 %v2617_v27, %v6308_v39  ;;  %v2689_v15 = vmul.f32 %v6308_v39, %v6308_v39  ;;  %v2751_v36 = vadd.f32 %v2750_v45, %v2688_v0  ;;  %v6313_v25 = vpop.f32.mrb[46].mxu1 }
 0x3e2   :  { %7795 = vst [vmem:[#allocation21_spill] sm:$0xff] %v6313_v25  ;;  %v6315_v53 = vpop.f32.mrb[47].mxu1  ;;  %v2692_v56 = vmul.f32 %v6313_v25, %v6313_v25 }
 0x3e3   :  { %7796 = vst [vmem:[#allocation23_spill] sm:$0xff] %v6315_v53  ;;  %v2752_v18 = vadd.f32 %v2751_v36, %v2689_v15  ;;  %v2619_v30 = vadd.f32 %v2618_v4, %v6315_v53  ;;  %v2690_v41 = vmul.f32 %v6315_v53, %v6315_v53 }
 0x3e5   :  { %v2620_v32 = vadd.f32 %v6305_v23, %v2619_v30  ;;  %v2753_v12 = vadd.f32 %v2752_v18, %v2690_v41 }
 0x3e7   :  { %v2754_v16 = vadd.f32 %v2753_v12, %v2691_v54  ;;  %v6325_v3 = vpop.f32.mrb[48].mxu1  ;;  %v2621_v55 = vadd.f32 %v6313_v25, %v2620_v32 }
 0x3e8   :  { %7797 = vst [vmem:[#allocation62_spill] sm:$0xff] %v6325_v3  ;;  %v6328_v0 = vpop.f32.mrb[49].mxu1  ;;  %v2695_v54 = vmul.f32 %v6325_v3, %v6325_v3 }
 0x3e9   :  { %7798 = vst [vmem:[#allocation63_spill] sm:$0xff] %v6328_v0  ;;  %v2622_v45 = vadd.f32 %v2621_v55, %v6328_v0  ;;  %v2693_v27 = vmul.f32 %v6328_v0, %v6328_v0  ;;  %v2755_v4 = vadd.f32 %v2754_v16, %v2692_v56  ;;  %v6333_v15 = vpop.f32.mrb[50].mxu1 }
 0x3ea   :  { %7799 = vst [vmem:[#allocation64_spill] sm:$0xff] %v6333_v15  ;;  %v6335_v36 = vpop.f32.mrb[51].mxu1  ;;  %v2696_v55 = vmul.f32 %v6333_v15, %v6333_v15 }
 0x3eb   :  { %7800 = vst [vmem:[#allocation65_spill] sm:$0xff] %v6335_v36  ;;  %v2756_v18 = vadd.f32 %v2755_v4, %v2693_v27  ;;  %v2623_v30 = vadd.f32 %v2622_v45, %v6335_v36  ;;  %v2694_v41 = vmul.f32 %v6335_v36, %v6335_v36 }
 0x3ed   :  { %v2624_v32 = vadd.f32 %v6325_v3, %v2623_v30  ;;  %v2757_v12 = vadd.f32 %v2756_v18, %v2694_v41 }
 0x3ef   :  { %v2758_v56 = vadd.f32 %v2757_v12, %v2695_v54  ;;  %v6345_v16 = vpop.f32.mrb[52].mxu1  ;;  %v2625_v0 = vadd.f32 %v6333_v15, %v2624_v32 }
 0x3f0   :  { %7801 = vst [vmem:[#allocation20_spill] sm:$0xff] %v6345_v16  ;;  %v6348_v27 = vpop.f32.mrb[53].mxu1  ;;  %v2699_v32 = vmul.f32 %v6345_v16, %v6345_v16 }
 0x3f1   :  { %7802 = vst [vmem:[#allocation22_spill] sm:$0xff] %v6348_v27  ;;  %v2626_v45 = vadd.f32 %v2625_v0, %v6348_v27  ;;  %v2697_v4 = vmul.f32 %v6348_v27, %v6348_v27  ;;  %v2759_v36 = vadd.f32 %v2758_v56, %v2696_v55  ;;  %v6353_v25 = vpop.f32.mrb[54].mxu1 }
 0x3f2   :  { %7803 = vst [vmem:[#allocation25_spill] sm:$0xff] %v6353_v25  ;;  %v6355_v30 = vpop.f32.mrb[55].mxu1  ;;  %v2700_v27 = vmul.f32 %v6353_v25, %v6353_v25 }
 0x3f3   :  { %7804 = vst [vmem:[#allocation66_spill] sm:$0xff] %v6355_v30  ;;  %v2760_v18 = vadd.f32 %v2759_v36, %v2697_v4  ;;  %v2627_v41 = vadd.f32 %v2626_v45, %v6355_v30  ;;  %v2698_v54 = vmul.f32 %v6355_v30, %v6355_v30 }
 0x3f5   :  { %v2628_v12 = vadd.f32 %v6345_v16, %v2627_v41  ;;  %v2761_v0 = vadd.f32 %v2760_v18, %v2698_v54 }
 0x3f7   :  { %v2762_v55 = vadd.f32 %v2761_v0, %v2699_v32  ;;  %v6365_v56 = vpop.f32.mrb[56].mxu1  ;;  %v2629_v15 = vadd.f32 %v6353_v25, %v2628_v12 }
 0x3f8   :  { %7805 = vst [vmem:[#allocation67_spill] sm:$0xff] %v6365_v56  ;;  %v6368_v36 = vpop.f32.mrb[57].mxu1  ;;  %v2703_v12 = vmul.f32 %v6365_v56, %v6365_v56 }
 0x3f9   :  { %7806 = vst [vmem:[#allocation68_spill] sm:$0xff] %v6368_v36  ;;  %v2630_v45 = vadd.f32 %v2629_v15, %v6368_v36  ;;  %v2701_v4 = vmul.f32 %v6368_v36, %v6368_v36  ;;  %v2763_v30 = vadd.f32 %v2762_v55, %v2700_v27  ;;  %v6373_v3 = vpop.f32.mrb[58].mxu1 }
 0x3fa   :  { %7807 = vst [vmem:[#allocation24_spill] sm:$0xff] %v6373_v3  ;;  %v6375_v41 = vpop.f32.mrb[59].mxu1  ;;  %v2704_v36 = vmul.f32 %v6373_v3, %v6373_v3 }
 0x3fb   :  { %7808 = vst [vmem:[#allocation37_spill] sm:$0xff] %v6375_v41  ;;  %v2764_v18 = vadd.f32 %v2763_v30, %v2701_v4  ;;  %v2631_v54 = vadd.f32 %v2630_v45, %v6375_v41  ;;  %v2702_v32 = vmul.f32 %v6375_v41, %v6375_v41 }
 0x3fd   :  { %v2632_v0 = vadd.f32 %v6365_v56, %v2631_v54  ;;  %v2765_v15 = vadd.f32 %v2764_v18, %v2702_v32 }
 0x3ff   :  { %v2766_v27 = vadd.f32 %v2765_v15, %v2703_v12  ;;  %v6385_v55 = vpop.f32.mrb[60].mxu1  ;;  %v2633_v25 = vadd.f32 %v6373_v3, %v2632_v0 }
 0x400   :  { %7809 = vst [vmem:[#allocation43_spill] sm:$0xff] %v6385_v55  ;;  %v6388_v30 = vpop.f32.mrb[61].mxu1  ;;  %v2707_v12 = vmul.f32 %v6385_v55, %v6385_v55 }
 0x401   :  { %7810 = vst [vmem:[#allocation31_spill] sm:$0xff] %v6388_v30  ;;  %v2634_v45 = vadd.f32 %v2633_v25, %v6388_v30  ;;  %v2705_v4 = vmul.f32 %v6388_v30, %v6388_v30  ;;  %v2767_v41 = vadd.f32 %v2766_v27, %v2704_v36  ;;  %v6393_v16 = vpop.f32.mrb[62].mxu1 }
 0x402   :  { %v2563_v54 = vpop.f32.mrb[63].mxu1  ;;  %v2708_v3 = vmul.f32 %v6393_v16, %v6393_v16 }
 0x403   :  { %v2768_v18 = vadd.f32 %v2767_v41, %v2705_v4  ;;  %v2635_v32 = vadd.f32 %v2634_v45, %v2563_v54  ;;  %v2706_v56 = vmul.f32 %v2563_v54, %v2563_v54 }
 0x405   :  { %v2636_v15 = vadd.f32 %v6385_v55, %v2635_v32  ;;  %v2769_v0 = vadd.f32 %v2768_v18, %v2706_v56 }
 0x407   :  { %v2637_v25 = vadd.f32 %v6393_v16, %v2636_v15  ;;  %v2770_v23 = vadd.f32 %v2769_v0, %v2707_v12 }
 0x409   :  { %v2638_v30 = vrot.slane %v2637_v25, 4  ;;  %v2771_v36 = vadd.f32 %v2770_v23, %v2708_v3  ;;  %v2781_v23 = vld [vmem:[%s7192_s6] sm:$0x1]  ;;  %s3679_s6 = smov [#allocation11]  }
 0x40b   :  { %v2639_v27 = vadd.f32 %v2638_v30, %v2637_v25  ;;  %v2772_v53 = vrot.slane %v2771_v36, 4 }
 0x40d   :  { %v2640_v39 = vrot.slane %v2639_v27, 2  ;;  %v2773_v41 = vadd.f32 %v2772_v53, %v2771_v36 }
 0x40f   :  { %v2641_v45 = vadd.f32 %v2640_v39, %v2639_v27  ;;  %v2774_v4 = vrot.slane %v2773_v41, 2  ;;  %v2785_v39 = vld [vmem:[%s7193_s7] sm:$0x1]  ;;  %s3189_s7 = sshll.u32 %s3679_s6, 4  ;;  %s3190_s7 = int_to_ptr.vmem [resolvable:$true] %s3189_s7 }
 0x410   :  { %s3641_s18 = scalar_lea.vmem %s3190_s7, 8192  ;;  %p3646_p5 = scmp.lt.s32.totalorder %s3190_s7, %s3190_s7 }
 0x411   :  { %v2642_v51 = vrot.slane %v2641_v45, 1  ;;  %v2775_v9 = vadd.f32 %v2774_v4, %v2773_v41  ;;  %v7814_v4 = vld [vmem:[#allocation16_spill] sm:$0xff]  ;;  %p3642_p4 = scmp.ne.s32.totalorder %s3190_s7, %s3641_s18  ;;  %p3647_p6 = scmp.lt.s32.totalorder %s3641_s18, %s3641_s18 }
 0x413   :  { %v2643_v37 = vadd.f32 %v2642_v51, %v2641_v45  ;;  %v2776_v62 = vrot.slane %v2775_v9, 1  ;;  %v7811_v51 = vld [vmem:[#allocation40_spill] sm:$0xff]  ;;  %v7813_v45 = vld [vmem:[#allocation38_spill] sm:$0xff]  ;;  %p3648_p7 = por %p3647_p6, %p3646_p5 }
 0x415   :  { %v2644_v32 = vmul.f32 0.001953125, %v2643_v37  ;;  %v2777_v56 = vadd.f32 %v2776_v62, %v2775_v9  ;;  %p3649_p8 = pnand %p3648_p7, %p3642_p4 }
 0x417   :  { %v2778_v18 = vmul.f32 0.001953125, %v2777_v56  ;;  %v2779_v55 = vmul.f32 %v2644_v32, %v2644_v32  ;;  %v7816_v56 = vld [vmem:[#allocation19_spill] sm:$0xff] }
 0x419   :  { %v2780_v8 = vsub.f32 %v2778_v18, %v2779_v55  ;;  %v7817_v18 = vld [vmem:[#allocation18_spill] sm:$0xff] }
 0x41b   :  { %v2782_v46 = vadd.f32 1e-05, %v2780_v8 }
 0x41d   :  { %3551 = vrsqrt.f32 %v2782_v46 }
 0x427   :  { %v3552_v3 = vpop.eup %3551 }
 0x428   :  { %v2784_v30 = vmul.f32 %v3552_v3, %v2781_v23  ;;  %v7818_v3 = vld [vmem:[#allocation61_spill] sm:$0xff] }
 0x42a   :  { %v2786_v53 = vmul.f32 %v2784_v30, %v2644_v32  ;;  %v6408_v12 = vrot.slane %v2784_v30, %v7811_v51  ;;  %v7815_v32 = vld [vmem:[#allocation59_spill] sm:$0xff] }
 0x42c   :  { %v2787_v9 = vsub.f32 %v2785_v39, %v2786_v53  ;;  %v2855_v62 = vmul.f32 %v6408_v12, %v2563_v54  ;;  %v6413_v46 = vmul.f32 %v6408_v12, %v6088_v24  ;;  %v6417_v8 = vmul.f32 %v6408_v12, %v6092_v14  ;;  %v7819_v39 = vld [vmem:[#allocation23_spill] sm:$0xff] }
 0x42d   :  { %v6421_v37 = vmul.f32 %v6086_v43, %v6408_v12  ;;  %v6425_v55 = vmul.f32 %v6090_v60, %v6408_v12  ;;  %v6429_v15 = vmul.f32 %v6408_v12, %v6108_v50  ;;  %v6433_v24 = vmul.f32 %v6408_v12, %v6115_v57  ;;  %v2989_v50 = vld [vmem:[#allocation6 + $0x1e8] sm:$0xff] }
 0x42e   :  { %v6436_v54 = vrot.slane %v2787_v9, %v7811_v51  ;;  %v6440_v14 = vmul.f32 %v6105_v33, %v6408_v12  ;;  %v6444_v43 = vmul.f32 %v6113_v2, %v6408_v12  ;;  %v6448_v60 = vmul.f32 %v6408_v12, %v6128_v34  ;;  %v7820_v51 = vld [vmem:[#allocation60_spill] sm:$0xff] }
 0x42f   :  { %v6452_v57 = vmul.f32 %v6408_v12, %v6135_v29  ;;  %v6456_v0 = vmul.f32 %v6125_v6, %v6408_v12  ;;  %v6460_v33 = vmul.f32 %v6133_v48, %v6408_v12  ;;  %v6464_v2 = vmul.f32 %v6408_v12, %v6148_v21 }
 0x430   :  { %v2925_v34 = vadd.f32 %v6436_v54, %v2855_v62  ;;  %v6469_v25 = vmul.f32 %v6408_v12, %v6155_v63  ;;  %v6473_v29 = vmul.f32 %v6145_v31, %v6408_v12  ;;  %v6477_v6 = vmul.f32 %v6153_v52, %v6408_v12  ;;  %v7821_v62 = vld [vmem:[#allocation21_spill] sm:$0xff] }
 0x431   :  { %v6481_v48 = vmul.f32 %v6408_v12, %v6168_v11  ;;  %v6485_v21 = vmul.f32 %v6408_v12, %v6175_v7  ;;  %v6489_v63 = vmul.f32 %v6165_v61, %v6408_v12  ;;  %v6493_v31 = vmul.f32 %v6173_v44, %v6408_v12 }
 0x432   :  { %v3053_v36 = vadd.f32 %v2989_v50, %v2925_v34  ;;  %v6497_v52 = vmul.f32 %v6408_v12, %v6188_v58  ;;  %v6501_v11 = vmul.f32 %v6408_v12, %v6195_v40  ;;  %v6505_v7 = vmul.f32 %v6185_v1, %v6408_v12  ;;  %v7822_v34 = vld [vmem:[#allocation63_spill] sm:$0xff] }
 0x433   :  { %v6509_v61 = vmul.f32 %v6193_v13, %v6408_v12  ;;  %v6513_v44 = vmul.f32 %v6408_v12, %v6208_v5  ;;  %v6517_v58 = vmul.f32 %v6408_v12, %v6215_v49  ;;  %v6521_v40 = vmul.f32 %v6205_v42, %v6408_v12 }
 0x434   :  { %v3117_v27 = vmax.f32 %v3053_v36, 0.0  ;;  %v6525_v1 = vmul.f32 %v6213_v38, %v6408_v12  ;;  %v6529_v13 = vmul.f32 %v6408_v12, %v6228_v59  ;;  %v6533_v5 = vmul.f32 %v6408_v12, %v6235_v10 }
 0x435   :  { %v6537_v49 = vmul.f32 %v6225_v47, %v6408_v12  ;;  %v6541_v42 = vmul.f32 %v6233_v22, %v6408_v12  ;;  %v6545_v38 = vmul.f32 %v6408_v12, %v6248_v26  ;;  %v6549_v59 = vmul.f32 %v6408_v12, %v6255_v28  ;;  %v7812_v28 = vld [vmem:[#allocation26_spill] sm:$0xff] }
 0x436   :  { %3181 = vst [vmem:[#allocation11 + $0x1e8] sm:$0xff] %v3117_v27  ;;  %v6553_v10 = vmul.f32 %v6245_v35, %v6408_v12  ;;  %v6557_v47 = vmul.f32 %v6253_v19, %v6408_v12  ;;  %v6561_v22 = vmul.f32 %v6408_v12, %v6268_v17  ;;  %v6565_v26 = vmul.f32 %v6408_v12, %v6275_v20  ;;  %v7823_v27 = vld [vmem:[#allocation65_spill] sm:$0xff] }
 0x437   :  { %v6569_v41 = vmul.f32 %v7812_v28, %v6408_v12  ;;  %v6573_v35 = vmul.f32 %v7813_v45, %v6408_v12  ;;  %v6577_v19 = vmul.f32 %v6408_v12, %v7814_v4  ;;  %v6581_v17 = vmul.f32 %v6408_v12, %v7815_v32  ;;  %v7824_v45 = vld [vmem:[#allocation62_spill] sm:$0xff]  ;;  %v7826_v32 = vld [vmem:[#allocation64_spill] sm:$0xff] }
 0x438   :  { %v6585_v20 = vmul.f32 %v7816_v56, %v6408_v12  ;;  %v6589_v23 = vmul.f32 %v7817_v18, %v6408_v12  ;;  %v6593_v30 = vmul.f32 %v6408_v12, %v7818_v3  ;;  %v6597_v53 = vmul.f32 %v6408_v12, %v7819_v39  ;;  %v7828_v18 = vld [vmem:[#allocation22_spill] sm:$0xff] }
 0x439   :  { %v6601_v9 = vmul.f32 %v7820_v51, %v6408_v12  ;;  %v6605_v50 = vmul.f32 %v7821_v62, %v6408_v12  ;;  %v6609_v36 = vmul.f32 %v6408_v12, %v7822_v34  ;;  %v6613_v28 = vmul.f32 %v6408_v12, %v7823_v27  ;;  %v7830_v39 = vld [vmem:[#allocation66_spill] sm:$0xff]  ;;  %v7832_v62 = vld [vmem:[#allocation20_spill] sm:$0xff]  ;;  %v7834_v27 = vld [vmem:[#allocation25_spill] sm:$0xff] }
 0x43a   :  { %v6617_v4 = vmul.f32 %v7824_v45, %v6408_v12  ;;  %v6621_v56 = vmul.f32 %v7826_v32, %v6408_v12  ;;  %v6625_v3 = vmul.f32 %v6408_v12, %v7828_v18  ;;  %v6629_v51 = vmul.f32 %v6408_v12, %v7830_v39 }
 0x43b   :  { %v6633_v34 = vmul.f32 %v7832_v62, %v6408_v12  ;;  %v6637_v45 = vmul.f32 %v7834_v27, %v6408_v12 }
 0x43c   :  { %7825 = vst [vmem:[#allocation74_spill] sm:$0xff] %v6617_v4  ;;  %7827 = vst [vmem:[#allocation28_spill] sm:$0xff] %v6621_v56  ;;  %v7836_v4 = vld [vmem:[#allocation68_spill] sm:$0xff]  ;;  %v7837_v56 = vld [vmem:[#allocation37_spill] sm:$0xff] }
 0x43d   :  { %7829 = vst [vmem:[#allocation30_spill] sm:$0xff] %v6625_v3  ;;  %7831 = vst [vmem:[#allocation87_spill] sm:$0xff] %v6629_v51  ;;  %v6641_v32 = vmul.f32 %v6408_v12, %v7836_v4  ;;  %v6645_v18 = vmul.f32 %v6408_v12, %v7837_v56  ;;  %v7838_v3 = vld [vmem:[#allocation67_spill] sm:$0xff]  ;;  %v7839_v51 = vld [vmem:[#allocation24_spill] sm:$0xff]  ;;  %v6665_v56 = vmul.f32 %v6393_v16, %v6408_v12 }
 0x43e   :  { %7833 = vst [vmem:[#allocation88_spill] sm:$0xff] %v6633_v34  ;;  %7835 = vst [vmem:[#allocation89_spill] sm:$0xff] %v6637_v45  ;;  %v6649_v39 = vmul.f32 %v7838_v3, %v6408_v12  ;;  %v6653_v62 = vmul.f32 %v7839_v51, %v6408_v12  ;;  %v7840_v34 = vld [vmem:[#allocation31_spill] sm:$0xff]  ;;  %v6669_v3 = vadd.f32 %v6436_v54, %v6413_v46 }
 0x43f   :  { %v6657_v27 = vmul.f32 %v6408_v12, %v7840_v34  ;;  %v7841_v45 = vld [vmem:[#allocation43_spill] sm:$0xff]  ;;  %v6673_v51 = vadd.f32 %v6436_v54, %v6417_v8  ;;  %v6677_v34 = vadd.f32 %v6436_v54, %v6421_v37  ;;  %v6685_v16 = vadd.f32 %v6436_v54, %v6429_v15 }
 0x440   :  { %v6661_v4 = vmul.f32 %v7841_v45, %v6408_v12  ;;  %v6681_v45 = vadd.f32 %v6436_v54, %v6425_v55  ;;  %v6689_v12 = vadd.f32 %v6436_v54, %v6433_v24  ;;  %v6693_v46 = vadd.f32 %v6436_v54, %v6440_v14 }
 0x441   :  { %v6697_v8 = vadd.f32 %v6436_v54, %v6444_v43  ;;  %v6701_v37 = vadd.f32 %v6436_v54, %v6448_v60  ;;  %v6705_v55 = vadd.f32 %v6436_v54, %v6452_v57  ;;  %v6709_v15 = vadd.f32 %v6436_v54, %v6456_v0 }
 0x442   :  { %v6713_v24 = vadd.f32 %v6436_v54, %v6460_v33  ;;  %v6717_v14 = vadd.f32 %v6436_v54, %v6464_v2  ;;  %v6721_v43 = vadd.f32 %v6436_v54, %v6469_v25  ;;  %v6725_v60 = vadd.f32 %v6436_v54, %v6473_v29 }
 0x443   :  { %v6729_v57 = vadd.f32 %v6436_v54, %v6477_v6  ;;  %v6733_v0 = vadd.f32 %v6436_v54, %v6481_v48  ;;  %v6737_v33 = vadd.f32 %v6436_v54, %v6485_v21  ;;  %v6741_v2 = vadd.f32 %v6436_v54, %v6489_v63 }
 0x444   :  { %v6745_v25 = vadd.f32 %v6436_v54, %v6493_v31  ;;  %v6749_v29 = vadd.f32 %v6436_v54, %v6497_v52  ;;  %v6753_v6 = vadd.f32 %v6436_v54, %v6501_v11  ;;  %v6757_v48 = vadd.f32 %v6436_v54, %v6505_v7 }
 0x445   :  { %v6761_v21 = vadd.f32 %v6436_v54, %v6509_v61  ;;  %v6765_v63 = vadd.f32 %v6436_v54, %v6513_v44  ;;  %v6769_v31 = vadd.f32 %v6436_v54, %v6517_v58  ;;  %v6773_v52 = vadd.f32 %v6436_v54, %v6521_v40 }
 0x446   :  { %v6777_v11 = vadd.f32 %v6436_v54, %v6525_v1  ;;  %v6781_v7 = vadd.f32 %v6436_v54, %v6529_v13  ;;  %v6785_v61 = vadd.f32 %v6436_v54, %v6533_v5  ;;  %v6789_v44 = vadd.f32 %v6436_v54, %v6537_v49 }
 0x447   :  { %v6793_v58 = vadd.f32 %v6436_v54, %v6541_v42  ;;  %v6797_v40 = vadd.f32 %v6436_v54, %v6545_v38  ;;  %v6801_v1 = vadd.f32 %v6436_v54, %v6549_v59  ;;  %v6805_v13 = vadd.f32 %v6436_v54, %v6553_v10 }
 0x448   :  { %7842 = vst [vmem:[#allocation47_spill] sm:$0xff] %v6789_v44  ;;  %v6809_v5 = vadd.f32 %v6436_v54, %v6557_v47  ;;  %v6813_v49 = vadd.f32 %v6436_v54, %v6561_v22  ;;  %v6817_v42 = vadd.f32 %v6436_v54, %v6565_v26  ;;  %v6821_v38 = vadd.f32 %v6436_v54, %v6569_v41  ;;  %v2930_v26 = vld [vmem:[#allocation6 + $0x10] sm:$0xff]  ;;  %v2931_v41 = vld [vmem:[#allocation6 + $0x18] sm:$0xff] }
 0x449   :  { %7843 = vst [vmem:[#allocation27_spill] sm:$0xff] %v6793_v58  ;;  %7844 = vst [vmem:[#allocation29_spill] sm:$0xff] %v6797_v40  ;;  %v6825_v59 = vadd.f32 %v6436_v54, %v6573_v35  ;;  %v6829_v10 = vadd.f32 %v6436_v54, %v6577_v19  ;;  %v6833_v47 = vadd.f32 %v6436_v54, %v6581_v17  ;;  %v2941_v40 = vld [vmem:[#allocation6 + $0x68] sm:$0xff] }
 0x44a   :  { %7845 = vst [vmem:[#allocation69_spill] sm:$0xff] %v6801_v1  ;;  %7846 = vst [vmem:[#allocation70_spill] sm:$0xff] %v6805_v13  ;;  %v6837_v22 = vadd.f32 %v6436_v54, %v6585_v20  ;;  %v6841_v35 = vadd.f32 %v6436_v54, %v6589_v23  ;;  %v6845_v19 = vadd.f32 %v6436_v54, %v6593_v30  ;;  %v2940_v13 = vld [vmem:[#allocation6 + $0x60] sm:$0xff]  ;;  %v2943_v1 = vld [vmem:[#allocation6 + $0x78] sm:$0xff] }
 0x44b   :  { %7847 = vst [vmem:[#allocation71_spill] sm:$0xff] %v6809_v5  ;;  %7848 = vst [vmem:[#allocation44_spill] sm:$0xff] %v6813_v49  ;;  %v6849_v17 = vadd.f32 %v6436_v54, %v6597_v53  ;;  %v6853_v20 = vadd.f32 %v6436_v54, %v6601_v9  ;;  %v6857_v23 = vadd.f32 %v6436_v54, %v6605_v50  ;;  %v2937_v49 = vld [vmem:[#allocation6 + $0x48] sm:$0xff]  ;;  %v7864_v5 = vld [vmem:[#allocation28_spill] sm:$0xff] }
 0x44c   :  { %7849 = vst [vmem:[#allocation32_spill] sm:$0xff] %v6817_v42  ;;  %7850 = vst [vmem:[#allocation34_spill] sm:$0xff] %v6821_v38  ;;  %v2928_v42 = vld [vmem:[#allocation6] sm:$0xff]  ;;  %v2929_v38 = vld [vmem:[#allocation6 + $0x8] sm:$0xff]  ;;  %v6861_v30 = vadd.f32 %v6436_v54, %v6609_v36  ;;  %v6865_v53 = vadd.f32 %v6436_v54, %v6613_v28  ;;  %v6873_v50 = vadd.f32 %v6436_v54, %v7864_v5 }
 0x44d   :  { %7851 = vst [vmem:[#allocation17_spill] sm:$0xff] %v6825_v59  ;;  %7852 = vst [vmem:[#allocation39_spill] sm:$0xff] %v6829_v10  ;;  %v2935_v10 = vld [vmem:[#allocation6 + $0x38] sm:$0xff]  ;;  %v2933_v59 = vld [vmem:[#allocation6 + $0x28] sm:$0xff]  ;;  %v6920_v44 = vadd.f32 %v2928_v42, %v6669_v3 }
 0x44e   :  { %7853 = vst [vmem:[#allocation72_spill] sm:$0xff] %v6833_v47  ;;  %7854 = vst [vmem:[#allocation73_spill] sm:$0xff] %v6837_v22  ;;  %v2934_v22 = vld [vmem:[#allocation6 + $0x30] sm:$0xff]  ;;  %v2932_v47 = vld [vmem:[#allocation6 + $0x20] sm:$0xff] }
 0x44f   :  { %7855 = vst [vmem:[#allocation45_spill] sm:$0xff] %v6841_v35  ;;  %7856 = vst [vmem:[#allocation46_spill] sm:$0xff] %v6845_v19  ;;  %v2936_v19 = vld [vmem:[#allocation6 + $0x40] sm:$0xff]  ;;  %v2939_v35 = vld [vmem:[#allocation6 + $0x58] sm:$0xff]  ;;  %v6938_v3 = vadd.f32 %v2934_v22, %v6693_v46  ;;  %v6959_v22 = vadd.f32 %v2941_v40, %v6721_v43 }
 0x450   :  { %7857 = vst [vmem:[#allocation49_spill] sm:$0xff] %v6849_v17  ;;  %7858 = vst [vmem:[#allocation50_spill] sm:$0xff] %v6853_v20  ;;  %v7862_v17 = vld [vmem:[#allocation74_spill] sm:$0xff]  ;;  %v7872_v58 = vld [vmem:[#allocation89_spill] sm:$0xff] }
 0x451   :  { %7859 = vst [vmem:[#allocation51_spill] sm:$0xff] %v6857_v23  ;;  %7860 = vst [vmem:[#allocation52_spill] sm:$0xff] %v6861_v30  ;;  %v6869_v9 = vadd.f32 %v6436_v54, %v7862_v17  ;;  %v2938_v20 = vld [vmem:[#allocation6 + $0x50] sm:$0xff]  ;;  %v7868_v30 = vld [vmem:[#allocation87_spill] sm:$0xff]  ;;  %v6889_v5 = vadd.f32 %v6436_v54, %v7872_v58  ;;  %v6905_v58 = vadd.f32 %v6436_v54, %v6653_v62 }
 0x452   :  { %7861 = vst [vmem:[#allocation53_spill] sm:$0xff] %v6865_v53  ;;  %7865 = vst [vmem:[#allocation55_spill] sm:$0xff] %v6873_v50  ;;  %v7866_v23 = vld [vmem:[#allocation30_spill] sm:$0xff]  ;;  %v6881_v28 = vadd.f32 %v6436_v54, %v7868_v30  ;;  %v7870_v53 = vld [vmem:[#allocation88_spill] sm:$0xff]  ;;  %v6897_v30 = vadd.f32 %v6436_v54, %v6645_v18  ;;  %v6913_v18 = vadd.f32 %v6436_v54, %v6661_v4 }
 0x453   :  { %7863 = vst [vmem:[#allocation54_spill] sm:$0xff] %v6869_v9  ;;  %v6877_v36 = vadd.f32 %v6436_v54, %v7866_v23  ;;  %v6885_v17 = vadd.f32 %v6436_v54, %v7870_v53  ;;  %v2942_v9 = vld [vmem:[#allocation6 + $0x70] sm:$0xff]  ;;  %7873 = vst [vmem:[#allocation78_spill] sm:$0xff] %v6889_v5  ;;  %v6893_v23 = vadd.f32 %v6436_v54, %v6641_v32  ;;  %v2945_v50 = vld [vmem:[#allocation6 + $0x88] sm:$0xff] }
 0x454   :  { %7869 = vst [vmem:[#allocation76_spill] sm:$0xff] %v6881_v28  ;;  %7875 = vst [vmem:[#allocation77_spill] sm:$0xff] %v6897_v30  ;;  %v6901_v53 = vadd.f32 %v6436_v54, %v6649_v39  ;;  %v2944_v28 = vld [vmem:[#allocation6 + $0x80] sm:$0xff]  ;;  %v6909_v32 = vadd.f32 %v6436_v54, %v6657_v27  ;;  %v6917_v39 = vadd.f32 %v6436_v54, %v6665_v56  ;;  %v2949_v5 = vld [vmem:[#allocation6 + $0xa8] sm:$0xff] }
 0x455   :  { %7867 = vst [vmem:[#allocation56_spill] sm:$0xff] %v6877_v36  ;;  %7871 = vst [vmem:[#allocation36_spill] sm:$0xff] %v6885_v17  ;;  %v2946_v17 = vld [vmem:[#allocation6 + $0x90] sm:$0xff]  ;;  %v2947_v36 = vld [vmem:[#allocation6 + $0x98] sm:$0xff]  ;;  %v6923_v62 = vadd.f32 %v2929_v38, %v6673_v51  ;;  %v6926_v27 = vadd.f32 %v2930_v26, %v6677_v34  ;;  %v6929_v4 = vadd.f32 %v2931_v41, %v6681_v45 }
 0x456   :  { %7874 = vst [vmem:[#allocation75_spill] sm:$0xff] %v6893_v23  ;;  %7876 = vst [vmem:[#allocation57_spill] sm:$0xff] %v6901_v53  ;;  %v2950_v53 = vld [vmem:[#allocation6 + $0xb0] sm:$0xff]  ;;  %v2948_v30 = vld [vmem:[#allocation6 + $0xa0] sm:$0xff]  ;;  %v6941_v51 = vadd.f32 %v2935_v10, %v6697_v8  ;;  %v6944_v26 = vadd.f32 %v2936_v19, %v6701_v37  ;;  %v6947_v41 = vadd.f32 %v2937_v49, %v6705_v55 }
 0x457   :  { %7877 = vst [vmem:[#allocation58_spill] sm:$0xff] %v6905_v58  ;;  %7878 = vst [vmem:[#allocation41_spill] sm:$0xff] %v6909_v32  ;;  %v2951_v23 = vld [vmem:[#allocation6 + $0xb8] sm:$0xff]  ;;  %v2952_v32 = vld [vmem:[#allocation6 + $0xc0] sm:$0xff]  ;;  %v6935_v58 = vadd.f32 %v2933_v59, %v6689_v12  ;;  %v6953_v12 = vadd.f32 %v2939_v35, %v6713_v24  ;;  %v6962_v37 = vadd.f32 %v2942_v9, %v6725_v60 }
 0x458   :  { %7879 = vst [vmem:[#allocation42_spill] sm:$0xff] %v6913_v18  ;;  %7880 = vst [vmem:[#allocation79_spill] sm:$0xff] %v6917_v39  ;;  %v2954_v18 = vld [vmem:[#allocation6 + $0xd0] sm:$0xff]  ;;  %v2955_v54 = vld [vmem:[#allocation6 + $0xd8] sm:$0xff]  ;;  %v6932_v39 = vadd.f32 %v2932_v47, %v6685_v16  ;;  %v6950_v16 = vadd.f32 %v2938_v20, %v6709_v15  ;;  %v6956_v47 = vadd.f32 %v2940_v13, %v6717_v14 }
 0x459   :  { %v2953_v56 = vld [vmem:[#allocation6 + $0xc8] sm:$0xff]  ;;  %v2958_v34 = vld [vmem:[#allocation6 + $0xf0] sm:$0xff]  ;;  %v2956_v42 = vld [vmem:[#allocation6 + $0xe0] sm:$0xff]  ;;  %v6965_v55 = vadd.f32 %v2943_v1, %v6729_v57  ;;  %v6968_v35 = vadd.f32 %v2944_v28, %v6733_v0  ;;  %v6971_v19 = vadd.f32 %v2945_v50, %v6737_v33  ;;  %v6974_v14 = vadd.f32 %v2946_v17, %v6741_v2 }
 0x45a   :  { %v2959_v45 = vld [vmem:[#allocation6 + $0xf8] sm:$0xff]  ;;  %v2957_v38 = vld [vmem:[#allocation6 + $0xe8] sm:$0xff]  ;;  %v2962_v46 = vld [vmem:[#allocation6 + $0x110] sm:$0xff]  ;;  %v6977_v43 = vadd.f32 %v2947_v36, %v6745_v25  ;;  %v6980_v57 = vadd.f32 %v2948_v30, %v6749_v29  ;;  %v6983_v1 = vadd.f32 %v2949_v5, %v6753_v6  ;;  %v6986_v0 = vadd.f32 %v2950_v53, %v6757_v48 }
 0x45b   :  { %v2960_v59 = vld [vmem:[#allocation6 + $0x100] sm:$0xff]  ;;  %v2963_v8 = vld [vmem:[#allocation6 + $0x118] sm:$0xff]  ;;  %v2961_v10 = vld [vmem:[#allocation6 + $0x108] sm:$0xff]  ;;  %v6989_v33 = vadd.f32 %v2951_v23, %v6761_v21  ;;  %v6992_v25 = vadd.f32 %v2952_v32, %v6765_v63  ;;  %v6995_v50 = vadd.f32 %v2953_v56, %v6769_v31  ;;  %v6998_v29 = vadd.f32 %v2954_v18, %v6773_v52 }
 0x45c   :  { %v2966_v15 = vld [vmem:[#allocation6 + $0x130] sm:$0xff]  ;;  %v2964_v49 = vld [vmem:[#allocation6 + $0x120] sm:$0xff]  ;;  %v2967_v24 = vld [vmem:[#allocation6 + $0x138] sm:$0xff]  ;;  %v7001_v6 = vadd.f32 %v2955_v54, %v6777_v11  ;;  %v7004_v21 = vadd.f32 %v2956_v42, %v6781_v7  ;;  %v7007_v17 = vadd.f32 %v2957_v38, %v6785_v61 }
 0x45d   :  { %v2965_v60 = vld [vmem:[#allocation6 + $0x128] sm:$0xff]  ;;  %v2970_v40 = vld [vmem:[#allocation6 + $0x150] sm:$0xff]  ;;  %v2968_v13 = vld [vmem:[#allocation6 + $0x140] sm:$0xff] }
 0x45e   :  { %v2971_v2 = vld [vmem:[#allocation6 + $0x158] sm:$0xff]  ;;  %v2969_v20 = vld [vmem:[#allocation6 + $0x148] sm:$0xff]  ;;  %v2974_v9 = vld [vmem:[#allocation6 + $0x170] sm:$0xff] }
 0x45f   :  { %v2972_v48 = vld [vmem:[#allocation6 + $0x160] sm:$0xff]  ;;  %v2975_v36 = vld [vmem:[#allocation6 + $0x178] sm:$0xff]  ;;  %v2973_v28 = vld [vmem:[#allocation6 + $0x168] sm:$0xff] }
 0x460   :  { %v7881_v63 = vld [vmem:[#allocation47_spill] sm:$0xff]  ;;  %v2978_v52 = vld [vmem:[#allocation6 + $0x190] sm:$0xff]  ;;  %v2976_v30 = vld [vmem:[#allocation6 + $0x180] sm:$0xff] }
 0x461   :  { %v7010_v5 = vadd.f32 %v2958_v34, %v7881_v63  ;;  %v7883_v31 = vld [vmem:[#allocation27_spill] sm:$0xff]  ;;  %v7885_v11 = vld [vmem:[#allocation29_spill] sm:$0xff]  ;;  %v7888_v7 = vld [vmem:[#allocation70_spill] sm:$0xff] }
 0x462   :  { %v7013_v23 = vadd.f32 %v2959_v45, %v7883_v31  ;;  %v2979_v53 = vld [vmem:[#allocation6 + $0x198] sm:$0xff]  ;;  %v7016_v32 = vadd.f32 %v2960_v59, %v7885_v11  ;;  %v7886_v18 = vld [vmem:[#allocation69_spill] sm:$0xff]  ;;  %v7022_v56 = vadd.f32 %v2962_v46, %v7888_v7  ;;  %v2982_v38 = vld [vmem:[#allocation6 + $0x1b0] sm:$0xff] }
 0x463   :  { %7882 = vst [vmem:[#allocation35_spill] sm:$0xff] %v7010_v5  ;;  %v7019_v54 = vadd.f32 %v2961_v10, %v7886_v18  ;;  %v7890_v61 = vld [vmem:[#allocation71_spill] sm:$0xff]  ;;  %v2977_v34 = vld [vmem:[#allocation6 + $0x188] sm:$0xff]  ;;  %v2980_v63 = vld [vmem:[#allocation6 + $0x1a0] sm:$0xff] }
 0x464   :  { %7884 = vst [vmem:[#allocation33_spill] sm:$0xff] %v7013_v23  ;;  %7889 = vst [vmem:[#allocation81_spill] sm:$0xff] %v7022_v56  ;;  %v7025_v42 = vadd.f32 %v2963_v8, %v7890_v61  ;;  %v7892_v45 = vld [vmem:[#allocation44_spill] sm:$0xff]  ;;  %v7895_v59 = vld [vmem:[#allocation34_spill] sm:$0xff] }
 0x465   :  { %7887 = vst [vmem:[#allocation80_spill] sm:$0xff] %v7019_v54  ;;  %v7028_v31 = vadd.f32 %v2964_v49, %v7892_v45  ;;  %v7893_v23 = vld [vmem:[#allocation32_spill] sm:$0xff]  ;;  %v7034_v11 = vadd.f32 %v2966_v15, %v7895_v59  ;;  %v7897_v10 = vld [vmem:[#allocation17_spill] sm:$0xff]  ;;  %v2983_v46 = vld [vmem:[#allocation6 + $0x1b8] sm:$0xff] }
 0x466   :  { %7891 = vst [vmem:[#allocation82_spill] sm:$0xff] %v7025_v42  ;;  %v7031_v5 = vadd.f32 %v2965_v60, %v7893_v23  ;;  %v7037_v18 = vadd.f32 %v2967_v24, %v7897_v10  ;;  %v2981_v7 = vld [vmem:[#allocation6 + $0x1a8] sm:$0xff]  ;;  %v2986_v56 = vld [vmem:[#allocation6 + $0x1d0] sm:$0xff]  ;;  %v7899_v8 = vld [vmem:[#allocation39_spill] sm:$0xff] }
 0x467   :  { %7896 = vst [vmem:[#allocation86_spill] sm:$0xff] %v7034_v11  ;;  %v7040_v61 = vadd.f32 %v2968_v13, %v7899_v8  ;;  %v7900_v42 = vld [vmem:[#allocation72_spill] sm:$0xff]  ;;  %v7902_v49 = vld [vmem:[#allocation73_spill] sm:$0xff]  ;;  %v2987_v59 = vld [vmem:[#allocation6 + $0x1d8] sm:$0xff] }
 0x468   :  { %7894 = vst [vmem:[#allocation84_spill] sm:$0xff] %v7031_v5  ;;  %7898 = vst [vmem:[#allocation83_spill] sm:$0xff] %v7037_v18  ;;  %v7043_v54 = vadd.f32 %v2969_v20, %v7900_v42  ;;  %v7046_v45 = vadd.f32 %v2970_v40, %v7902_v49  ;;  %v7904_v60 = vld [vmem:[#allocation45_spill] sm:$0xff]  ;;  %v2984_v15 = vld [vmem:[#allocation6 + $0x1c0] sm:$0xff] }
 0x469   :  { %v7049_v23 = vadd.f32 %v2971_v2, %v7904_v60  ;;  %v2985_v11 = vld [vmem:[#allocation6 + $0x1c8] sm:$0xff]  ;;  %v7906_v24 = vld [vmem:[#allocation46_spill] sm:$0xff]  ;;  %v7910_v20 = vld [vmem:[#allocation51_spill] sm:$0xff] }
 0x46a   :  { %7901 = vst [vmem:[#allocation85_spill] sm:$0xff] %v7043_v54  ;;  %7903 = vst [vmem:[#allocation48_spill] sm:$0xff] %v7046_v45  ;;  %v7052_v10 = vadd.f32 %v2972_v48, %v7906_v24  ;;  %v7907_v18 = vld [vmem:[#allocation49_spill] sm:$0xff]  ;;  %v7908_v13 = vld [vmem:[#allocation50_spill] sm:$0xff]  ;;  %v7061_v42 = vadd.f32 %v2975_v36, %v7910_v20 }
 0x46b   :  { %7905 = vst [vmem:[#allocation40_spill] sm:$0xff] %v7049_v23  ;;  %v7055_v5 = vadd.f32 %v2973_v28, %v7907_v18  ;;  %v7058_v8 = vadd.f32 %v2974_v9, %v7908_v13  ;;  %v2990_v40 = vld [vmem:[#allocation6 + $0x1f0] sm:$0xff]  ;;  %v2988_v49 = vld [vmem:[#allocation6 + $0x1e0] sm:$0xff]  ;;  %v2991_v45 = vld [vmem:[#allocation6 + $0x1f8] sm:$0xff] }
 0x46c   :  { %7911 = vst [vmem:[#allocation38_spill] sm:$0xff] %v7061_v42  ;;  %v7912_v2 = vld [vmem:[#allocation52_spill] sm:$0xff]  ;;  %v7913_v23 = vld [vmem:[#allocation53_spill] sm:$0xff]  ;;  %v7914_v48 = vld [vmem:[#allocation54_spill] sm:$0xff] }
 0x46d   :  { %7909 = vst [vmem:[#allocation26_spill] sm:$0xff] %v7058_v8  ;;  %v7064_v60 = vadd.f32 %v2976_v30, %v7912_v2  ;;  %v7067_v54 = vadd.f32 %v2977_v34, %v7913_v23  ;;  %v7070_v24 = vadd.f32 %v2978_v52, %v7914_v48  ;;  %v7915_v28 = vld [vmem:[#allocation55_spill] sm:$0xff]  ;;  %v7916_v9 = vld [vmem:[#allocation56_spill] sm:$0xff]  ;;  %v7919_v30 = vld [vmem:[#allocation78_spill] sm:$0xff] }
 0x46e   :  { %v7073_v18 = vadd.f32 %v2979_v53, %v7915_v28  ;;  %v7076_v13 = vadd.f32 %v2980_v63, %v7916_v9  ;;  %v7917_v36 = vld [vmem:[#allocation76_spill] sm:$0xff]  ;;  %v7085_v2 = vadd.f32 %v2983_v46, %v7919_v30  ;;  %v7920_v34 = vld [vmem:[#allocation75_spill] sm:$0xff]  ;;  %v7921_v52 = vld [vmem:[#allocation77_spill] sm:$0xff] }
 0x46f   :  { %v7079_v20 = vadd.f32 %v2981_v7, %v7917_v36  ;;  %v7918_v42 = vld [vmem:[#allocation36_spill] sm:$0xff]  ;;  %v7088_v23 = vadd.f32 %v2984_v15, %v7920_v34  ;;  %v7091_v48 = vadd.f32 %v2985_v11, %v7921_v52  ;;  %v7922_v53 = vld [vmem:[#allocation57_spill] sm:$0xff]  ;;  %v7923_v63 = vld [vmem:[#allocation58_spill] sm:$0xff]  ;;  %v3056_v15 = vmax.f32 %v6920_v44, 0.0 }
 0x470   :  { %v7082_v8 = vadd.f32 %v2982_v38, %v7918_v42  ;;  %v7094_v28 = vadd.f32 %v2986_v56, %v7922_v53  ;;  %v7097_v9 = vadd.f32 %v2987_v59, %v7923_v63  ;;  %v7924_v7 = vld [vmem:[#allocation41_spill] sm:$0xff]  ;;  %v7925_v38 = vld [vmem:[#allocation42_spill] sm:$0xff]  ;;  %v7926_v46 = vld [vmem:[#allocation79_spill] sm:$0xff]  ;;  %v3057_v11 = vmax.f32 %v6923_v62, 0.0 }
 0x471   :  { %v7100_v36 = vadd.f32 %v2988_v49, %v7924_v7  ;;  %v7103_v42 = vadd.f32 %v2990_v40, %v7925_v38  ;;  %v7106_v30 = vadd.f32 %v2991_v45, %v7926_v46  ;;  %v3058_v34 = vmax.f32 %v6926_v27, 0.0  ;;  %3120 = vst [vmem:[#allocation11] sm:$0xff] %v3056_v15  ;;  %v7931_v63 = vld [vmem:[#allocation82_spill] sm:$0xff] }
 0x472   :  { %v3059_v56 = vmax.f32 %v6929_v4, 0.0  ;;  %v3060_v59 = vmax.f32 %v6932_v39, 0.0  ;;  %v3061_v52 = vmax.f32 %v6935_v58, 0.0  ;;  %v3062_v49 = vmax.f32 %v6938_v3, 0.0  ;;  %3121 = vst [vmem:[#allocation11 + $0x8] sm:$0xff] %v3057_v11  ;;  %v7933_v15 = vld [vmem:[#allocation86_spill] sm:$0xff] }
 0x473   :  { %v3063_v40 = vmax.f32 %v6941_v51, 0.0  ;;  %v3064_v53 = vmax.f32 %v6944_v26, 0.0  ;;  %v3065_v45 = vmax.f32 %v6947_v41, 0.0  ;;  %v3066_v44 = vmax.f32 %v6950_v16, 0.0  ;;  %3122 = vst [vmem:[#allocation11 + $0x10] sm:$0xff] %v3058_v34  ;;  %v7934_v11 = vld [vmem:[#allocation83_spill] sm:$0xff] }
 0x474   :  { %v3067_v62 = vmax.f32 %v6953_v12, 0.0  ;;  %v3068_v27 = vmax.f32 %v6956_v47, 0.0  ;;  %3123 = vst [vmem:[#allocation11 + $0x18] sm:$0xff] %v3059_v56  ;;  %3124 = vst [vmem:[#allocation11 + $0x20] sm:$0xff] %v3060_v59  ;;  %v3069_v58 = vmax.f32 %v6959_v22, 0.0  ;;  %v3070_v39 = vmax.f32 %v6962_v37, 0.0 }
 0x475   :  { %v3071_v4 = vmax.f32 %v6965_v55, 0.0  ;;  %v3072_v3 = vmax.f32 %v6968_v35, 0.0  ;;  %3125 = vst [vmem:[#allocation11 + $0x28] sm:$0xff] %v3061_v52  ;;  %3126 = vst [vmem:[#allocation11 + $0x30] sm:$0xff] %v3062_v49  ;;  %v3073_v51 = vmax.f32 %v6971_v19, 0.0  ;;  %v3074_v26 = vmax.f32 %v6974_v14, 0.0 }
 0x476   :  { %3127 = vst [vmem:[#allocation11 + $0x38] sm:$0xff] %v3063_v40  ;;  %3128 = vst [vmem:[#allocation11 + $0x40] sm:$0xff] %v3064_v53  ;;  %v3075_v41 = vmax.f32 %v6977_v43, 0.0  ;;  %v3076_v16 = vmax.f32 %v6980_v57, 0.0  ;;  %v3077_v12 = vmax.f32 %v6983_v1, 0.0  ;;  %v3078_v47 = vmax.f32 %v6986_v0, 0.0 }
 0x477   :  { %3129 = vst [vmem:[#allocation11 + $0x48] sm:$0xff] %v3065_v45  ;;  %3130 = vst [vmem:[#allocation11 + $0x50] sm:$0xff] %v3066_v44  ;;  %v3079_v22 = vmax.f32 %v6989_v33, 0.0  ;;  %v3080_v37 = vmax.f32 %v6992_v25, 0.0  ;;  %v3081_v55 = vmax.f32 %v6995_v50, 0.0  ;;  %v3082_v35 = vmax.f32 %v6998_v29, 0.0 }
 0x478   :  { %3131 = vst [vmem:[#allocation11 + $0x58] sm:$0xff] %v3067_v62  ;;  %3132 = vst [vmem:[#allocation11 + $0x60] sm:$0xff] %v3068_v27  ;;  %v3083_v19 = vmax.f32 %v7001_v6, 0.0  ;;  %v3084_v14 = vmax.f32 %v7004_v21, 0.0  ;;  %v3085_v43 = vmax.f32 %v7007_v17, 0.0  ;;  %v7927_v57 = vld [vmem:[#allocation35_spill] sm:$0xff] }
 0x479   :  { %3133 = vst [vmem:[#allocation11 + $0x68] sm:$0xff] %v3069_v58  ;;  %3134 = vst [vmem:[#allocation11 + $0x70] sm:$0xff] %v3070_v39  ;;  %v3086_v1 = vmax.f32 %v7927_v57, 0.0  ;;  %v7928_v0 = vld [vmem:[#allocation33_spill] sm:$0xff]  ;;  %v3088_v25 = vmax.f32 %v7016_v32, 0.0  ;;  %v7929_v50 = vld [vmem:[#allocation80_spill] sm:$0xff] }
 0x47a   :  { %3135 = vst [vmem:[#allocation11 + $0x78] sm:$0xff] %v3071_v4  ;;  %3136 = vst [vmem:[#allocation11 + $0x80] sm:$0xff] %v3072_v3  ;;  %v3087_v33 = vmax.f32 %v7928_v0, 0.0  ;;  %v3089_v29 = vmax.f32 %v7929_v50, 0.0  ;;  %v7930_v6 = vld [vmem:[#allocation81_spill] sm:$0xff]  ;;  %v3091_v7 = vmax.f32 %v7931_v63, 0.0 }
 0x47b   :  { %3137 = vst [vmem:[#allocation11 + $0x88] sm:$0xff] %v3073_v51  ;;  %3138 = vst [vmem:[#allocation11 + $0x90] sm:$0xff] %v3074_v26  ;;  %v3090_v21 = vmax.f32 %v7930_v6, 0.0  ;;  %v3092_v38 = vmax.f32 %v7028_v31, 0.0  ;;  %v7932_v17 = vld [vmem:[#allocation84_spill] sm:$0xff]  ;;  %v3094_v32 = vmax.f32 %v7933_v15, 0.0 }
 0x47c   :  { %3139 = vst [vmem:[#allocation11 + $0x98] sm:$0xff] %v3075_v41  ;;  %3140 = vst [vmem:[#allocation11 + $0xa0] sm:$0xff] %v3076_v16  ;;  %v3093_v46 = vmax.f32 %v7932_v17, 0.0  ;;  %v3095_v34 = vmax.f32 %v7934_v11, 0.0  ;;  %v3096_v56 = vmax.f32 %v7040_v61, 0.0  ;;  %v7935_v59 = vld [vmem:[#allocation85_spill] sm:$0xff] }
 0x47d   :  { %3141 = vst [vmem:[#allocation11 + $0xa8] sm:$0xff] %v3077_v12  ;;  %3142 = vst [vmem:[#allocation11 + $0xb0] sm:$0xff] %v3078_v47  ;;  %v3097_v52 = vmax.f32 %v7935_v59, 0.0  ;;  %v7936_v49 = vld [vmem:[#allocation48_spill] sm:$0xff]  ;;  %v3100_v45 = vmax.f32 %v7052_v10, 0.0  ;;  %v3101_v44 = vmax.f32 %v7055_v5, 0.0 }
 0x47e   :  { %3143 = vst [vmem:[#allocation11 + $0xb8] sm:$0xff] %v3079_v22  ;;  %3144 = vst [vmem:[#allocation11 + $0xc0] sm:$0xff] %v3080_v37  ;;  %v3098_v31 = vmax.f32 %v7936_v49, 0.0  ;;  %v7937_v40 = vld [vmem:[#allocation40_spill] sm:$0xff]  ;;  %v7938_v62 = vld [vmem:[#allocation26_spill] sm:$0xff]  ;;  %v3104_v39 = vmax.f32 %v7064_v60, 0.0 }
 0x47f   :  { %3145 = vst [vmem:[#allocation11 + $0xc8] sm:$0xff] %v3081_v55  ;;  %3146 = vst [vmem:[#allocation11 + $0xd0] sm:$0xff] %v3082_v35  ;;  %v3099_v53 = vmax.f32 %v7937_v40, 0.0  ;;  %v3102_v61 = vmax.f32 %v7938_v62, 0.0  ;;  %v7939_v27 = vld [vmem:[#allocation38_spill] sm:$0xff]  ;;  %v3105_v4 = vmax.f32 %v7067_v54, 0.0 }
 0x480   :  { %3147 = vst [vmem:[#allocation11 + $0xd8] sm:$0xff] %v3083_v19  ;;  %3148 = vst [vmem:[#allocation11 + $0xe0] sm:$0xff] %v3084_v14  ;;  %v3103_v58 = vmax.f32 %v7939_v27, 0.0  ;;  %v3106_v10 = vmax.f32 %v7070_v24, 0.0  ;;  %v3107_v3 = vmax.f32 %v7073_v18, 0.0  ;;  %v3108_v51 = vmax.f32 %v7076_v13, 0.0 }
 0x481   :  { %3149 = vst [vmem:[#allocation11 + $0xe8] sm:$0xff] %v3085_v43  ;;  %3150 = vst [vmem:[#allocation11 + $0xf0] sm:$0xff] %v3086_v1  ;;  %v3109_v5 = vmax.f32 %v7079_v20, 0.0  ;;  %v3110_v60 = vmax.f32 %v7082_v8, 0.0  ;;  %v3111_v26 = vmax.f32 %v7085_v2, 0.0  ;;  %v3112_v54 = vmax.f32 %v7088_v23, 0.0 }
 0x482   :  { %3151 = vst [vmem:[#allocation11 + $0xf8] sm:$0xff] %v3087_v33  ;;  %3152 = vst [vmem:[#allocation11 + $0x100] sm:$0xff] %v3088_v25  ;;  %v3113_v24 = vmax.f32 %v7091_v48, 0.0  ;;  %v3114_v18 = vmax.f32 %v7094_v28, 0.0  ;;  %v3115_v13 = vmax.f32 %v7097_v9, 0.0  ;;  %v3116_v41 = vmax.f32 %v7100_v36, 0.0 }
 0x483   :  { %3153 = vst [vmem:[#allocation11 + $0x108] sm:$0xff] %v3089_v29  ;;  %3154 = vst [vmem:[#allocation11 + $0x110] sm:$0xff] %v3090_v21  ;;  %v3118_v8 = vmax.f32 %v7103_v42, 0.0  ;;  %v3119_v20 = vmax.f32 %v7106_v30, 0.0 }
 0x484   :  { %3155 = vst [vmem:[#allocation11 + $0x118] sm:$0xff] %v3091_v7  ;;  %3156 = vst [vmem:[#allocation11 + $0x120] sm:$0xff] %v3092_v38 }
 0x485   :  { %3157 = vst [vmem:[#allocation11 + $0x128] sm:$0xff] %v3093_v46  ;;  %3158 = vst [vmem:[#allocation11 + $0x130] sm:$0xff] %v3094_v32 }
 0x486   :  { %3159 = vst [vmem:[#allocation11 + $0x138] sm:$0xff] %v3095_v34  ;;  %3160 = vst [vmem:[#allocation11 + $0x140] sm:$0xff] %v3096_v56 }
 0x487   :  { %3161 = vst [vmem:[#allocation11 + $0x148] sm:$0xff] %v3097_v52  ;;  %3162 = vst [vmem:[#allocation11 + $0x150] sm:$0xff] %v3098_v31 }
 0x488   :  { %3163 = vst [vmem:[#allocation11 + $0x158] sm:$0xff] %v3099_v53  ;;  %3164 = vst [vmem:[#allocation11 + $0x160] sm:$0xff] %v3100_v45 }
 0x489   :  { %3165 = vst [vmem:[#allocation11 + $0x168] sm:$0xff] %v3101_v44  ;;  %3166 = vst [vmem:[#allocation11 + $0x170] sm:$0xff] %v3102_v61 }
 0x48a   :  { %3167 = vst [vmem:[#allocation11 + $0x178] sm:$0xff] %v3103_v58  ;;  %3168 = vst [vmem:[#allocation11 + $0x180] sm:$0xff] %v3104_v39 }
 0x48b   :  { %3169 = vst [vmem:[#allocation11 + $0x188] sm:$0xff] %v3105_v4  ;;  %3170 = vst [vmem:[#allocation11 + $0x190] sm:$0xff] %v3106_v10 }
 0x48c   :  { %3171 = vst [vmem:[#allocation11 + $0x198] sm:$0xff] %v3107_v3  ;;  %3172 = vst [vmem:[#allocation11 + $0x1a0] sm:$0xff] %v3108_v51 }
 0x48d   :  { %3173 = vst [vmem:[#allocation11 + $0x1a8] sm:$0xff] %v3109_v5  ;;  %3174 = vst [vmem:[#allocation11 + $0x1b0] sm:$0xff] %v3110_v60 }
 0x48e   :  { %3175 = vst [vmem:[#allocation11 + $0x1b8] sm:$0xff] %v3111_v26  ;;  %3176 = vst [vmem:[#allocation11 + $0x1c0] sm:$0xff] %v3112_v54 }
 0x48f   :  { %3177 = vst [vmem:[#allocation11 + $0x1c8] sm:$0xff] %v3113_v24  ;;  %3178 = vst [vmem:[#allocation11 + $0x1d0] sm:$0xff] %v3114_v18 }
 0x490   :  { %3179 = vst [vmem:[#allocation11 + $0x1d8] sm:$0xff] %v3115_v13  ;;  %3180 = vst [vmem:[#allocation11 + $0x1e0] sm:$0xff] %v3116_v41 }
 0x491   :  { %3182 = vst [vmem:[#allocation11 + $0x1f0] sm:$0xff] %v3118_v8  ;;  %3183 = vst [vmem:[#allocation11 + $0x1f8] sm:$0xff] %v3119_v20 }
 0x492   :  { %3652 = shalt.err (!%p3649_p8)
}
 0x493   :  { %s3653_s22 = scalar_lea.hbm %s7194_s8, 8192 }
 0x494   :  { %p3654_p9 = scmp.ne.s32.totalorder %s7194_s8, %s3653_s22  ;;  %p3657_p10 = scmp.lt.u32.totalorder %s3653_s22, %s7194_s8 }
 0x496   :  { %p3659_p11 = pnand %p3657_p10, %p3654_p9 }
 0x498   :  { %3662 = shalt.err (!%p3659_p11)
}
 0x499   :  { %3195 = dma.vmem_to_hbm [thread:$0]  %s3190_s7, 8192, %s7194_s8, [#allocation5], %s3672_s15, %s3672_s15, %s3673_s16  }
 0x49a   :  { %3669 = dma.done.wait [#allocation5], 8192  }
 0x49b   :  { %3670 = vsyncadd [#allocation5], 4294959104 }
 0x49c   :  { %3199 = vsyncpa [#allocation4], 1 }
 0x49d   :  { %3200 = vsyncpa [#allocation7], 1 }
 0x49e   :  { %3201 = vsyncpa [#allocation10], 1 }
 0x49f   :  { %3202 = vsyncpa [#allocation5], 1 }

</bundles_post_ra>
